<compile_context>
chip_gen: v7x
topology: tpu7x:2x2x1
jax: 0.10.0
libtpu: 0.0.40
codegen_flags: <defaults>
</compile_context>

<pallas_src>
import functools

import jax
import jax.numpy as jnp
from jax.experimental import pallas as pl
from jax.experimental.pallas import tpu as pltpu

BN_EPS = 1e-5
LANES = 128


def _round_up(a, m):
    return (a + m - 1) // m * m


def _act(y, act):
    if act == "relu":
        return jnp.maximum(y, 0.0)
    if act == "hswish":            # x * relu6(x + 3) / 6
        return y * jnp.clip(y + 3.0, 0.0, 6.0) * (1.0 / 6.0)
    if act == "hsigmoid":          # relu6(x + 3) / 6
        return jnp.clip(y + 3.0, 0.0, 6.0) * (1.0 / 6.0)
    return y


# ----------------------------- fused block kernel -----------------------------

def _make_block_kernel(*, k, s, H, W, Hh, Wh, ho, wo, act, use_se, use_res,
                       use_sc_conv, cin_p, cexp_p, cout_p):
    PH = s * s
    nrows = PH * Hh
    inv_hw = 1.0 / float(ho * wo)

    def kernel(*refs):
        exp_ref = refs[-1]                   # bf16 canvas scratch (PH*Hh, Wh, cexp_p)
        o_ref = refs[-2]                     # (1, ho, wo, cout_p) bf16
        it = iter(refs[:-2])
        x_ref = next(it)                     # (1, PH*Hh, Wh, cin_p) bf16 (phase-folded, padded)
        mask_ref = next(it)                  # (PH*Hh, Wh, 1) f32 interior mask
        w1_ref, b1_ref = next(it), next(it)
        dw_ref, b2_ref = next(it), next(it)
        w3_ref, b3_ref = next(it), next(it)
        if use_se:
            wse1_ref, bse1_ref = next(it), next(it)
            wse2_ref, bse2_ref = next(it), next(it)
        if use_res:
            xres_ref = next(it)
        if use_sc_conv:
            wsc_ref, bsc_ref = next(it), next(it)

        # ---- expand 1x1 conv (BN scale pre-folded into w1) + shift + act ----
        x2 = x_ref[...].reshape(nrows * Wh, cin_p)
        e = jnp.dot(x2, w1_ref[...], preferred_element_type=jnp.float32)
        e = _act(e + b1_ref[...], act)
        # single aligned, unmasked full-canvas bf16 store; the mask zeroes the depthwise
        # padding ring (realizes conv2's zero padding on the *expanded* tensor).
        exp_ref[...] = (e.reshape(nrows, Wh, cexp_p) * mask_ref[...]).astype(jnp.bfloat16)

        # ---- depthwise kxk conv (stride folded into phase layout, BN scale folded in dw) ----
        dwf = dw_ref[...]                    # (k*k, cexp_p) f32
        nflat = ho * Wh
        acc = jnp.zeros((nflat, cexp_p), jnp.float32)
        for i in range(k):
            di = i // s
            for jm in range(s):              # column phase (j % s)
                q = (i % s) * s + jm
                # aligned full-width row-window load; bf16 -> f32 once per window
                rows = exp_ref[pl.ds(q * Hh + di, ho), :, :]
                rows = rows.astype(jnp.float32).reshape(nflat, cexp_p)
                for dj in range((k - 1 - jm) // s + 1):
                    j = jm + s * dj
                    t = i * k + j
                    # column offset dj realized as a sublane roll (XLU slot); wrapped elements
                    # only land in the columns >= wo, which are discarded below.
                    tap = rows if dj == 0 else pltpu.roll(rows, shift=nflat - dj, axis=0)
                    acc = acc + tap * dwf[t:t + 1, :]
        y = _act(acc + b2_ref[...], act)                       # (ho*Wh, cexp_p) f32
        y = y.reshape(ho, Wh, cexp_p)[:, :wo, :]               # drop junk columns once

        # ---- project 1x1 conv (BN scale pre-folded) + shift (no activation) ----
        y2 = y.reshape(ho * wo, cexp_p).astype(jnp.bfloat16)
        out = jnp.dot(y2, w3_ref[...], preferred_element_type=jnp.float32) + b3_ref[...]

        # ---- SE: GAP -> 1x1 + shift + relu -> 1x1 + shift + hsigmoid -> channel gate ----
        if use_se:
            pooled = jnp.sum(out, axis=0, keepdims=True) * inv_hw          # (1, cout_p)
            hh = jnp.dot(pooled.astype(jnp.bfloat16), wse1_ref[...],
                         preferred_element_type=jnp.float32)
            hh = _act(hh + bse1_ref[...], "relu")
            g = jnp.dot(hh.astype(jnp.bfloat16), wse2_ref[...],
                        preferred_element_type=jnp.float32)
            g = _act(g + bse2_ref[...], "hsigmoid")
            out = out * g

        # ---- residual / shortcut (stride 1 only); aligned read of the original x ----
        if use_res:
            xi = xres_ref[...].reshape(H * W, cin_p)
            if use_sc_conv:
                sc = jnp.dot(xi, wsc_ref[...], preferred_element_type=jnp.float32) + bsc_ref[...]
            else:
                sc = xi.astype(jnp.float32)
            out = out + sc

        o_ref[...] = out.reshape(1, ho, wo, cout_p).astype(o_ref.dtype)

    return kernel


# ----------------------------- forward wrapper -----------------------------

def mobilev3_block_forward(params, x_nchw, cfg):
    """Forward of one mobilev3_Block.  cfg = (kernel, in, expand, out, act, use_se, stride)."""
    k, cin, cexp, cout, act, use_se, s = cfg
    p = k // 2
    use_res = (s == 1)
    use_sc_conv = (s == 1 and cin != cout)

    x = jnp.transpose(x_nchw, (0, 2, 3, 1)).astype(jnp.float32)      # NCHW -> NHWC
    B, H, W, _ = x.shape
    cin_p = _round_up(cin, LANES)
    cexp_p = _round_up(cexp, LANES)
    cout_p = _round_up(cout, LANES)

    Hp, Wp = H + 2 * p, W + 2 * p
    ho = (Hp - k) // s + 1
    wo = (Wp - k) // s + 1
    Hh = _round_up(-(-Hp // s), 8)       # per-phase plane height (mult of 8 -> clean reshapes)
    Wh = _round_up(-(-Wp // s), 8)
    PH = s * s

    # zero pad: depthwise ring p + round-up to s*Hh / s*Wh, channels padded to 128 lanes.
    pad_hw = ((0, 0), (p, s * Hh - H - p), (p, s * Wh - W - p))
    xpad = jnp.pad(x, pad_hw + ((0, cin_p - cin),)).astype(jnp.bfloat16)
    mpad = jnp.pad(jnp.ones((1, H, W, 1), jnp.float32), pad_hw + ((0, 0),))
    if s == 1:
        xph, mph = xpad, mpad
    else:
        # phase / space-to-depth decomposition: plane q = a*s + b holds xpad[a::s, b::s]
        xph = jnp.concatenate([xpad[:, a::s, b::s, :] for a in range(s) for b in range(s)], axis=1)
        mph = jnp.concatenate([mpad[:, a::s, b::s, :] for a in range(s) for b in range(s)], axis=1)
    mask = mph[0]                                                    # (PH*Hh, Wh, 1) f32

    kern = _make_block_kernel(k=k, s=s, H=H, W=W, Hh=Hh, Wh=Wh, ho=ho, wo=wo, act=act,
                              use_se=use_se, use_res=use_res, use_sc_conv=use_sc_conv,
                              cin_p=cin_p, cexp_p=cexp_p, cout_p=cout_p)

    def _const_spec(arr):
        rank = arr.ndim
        return pl.BlockSpec(arr.shape, lambda b, _r=rank: (0,) * _r)

    inputs = [xph, mask, params["w1"], params["b1"], params["dw"], params["b2"],
              params["w3"], params["b3"]]
    in_specs = [pl.BlockSpec((1, PH * Hh, Wh, cin_p), lambda b: (b, 0, 0, 0))]
    in_specs += [_const_spec(a) for a in inputs[1:]]
    if use_se:
        for name in ("se_w1", "se_b1", "se_w2", "se_b2"):
            inputs.append(params[name])
            in_specs.append(_const_spec(params[name]))
    if use_res:
        xres = jnp.pad(x, ((0, 0), (0, 0), (0, 0), (0, cin_p - cin))).astype(jnp.bfloat16)
        inputs.append(xres)
        in_specs.append(pl.BlockSpec((1, H, W, cin_p), lambda b: (b, 0, 0, 0)))
    if use_sc_conv:
        for name in ("sc_w", "sc_b"):
            inputs.append(params[name])
            in_specs.append(_const_spec(params[name]))

    y = pl.pallas_call(
        kern,
        out_shape=jax.ShapeDtypeStruct((B, ho, wo, cout_p), jnp.bfloat16),
        grid=(B,),
        in_specs=in_specs,
        out_specs=pl.BlockSpec((1, ho, wo, cout_p), lambda b: (b, 0, 0, 0)),
        scratch_shapes=[pltpu.VMEM((PH * Hh, Wh, cexp_p), jnp.bfloat16)],
        compiler_params=pltpu.CompilerParams(
            dimension_semantics=("parallel",),
            vmem_limit_bytes=64 * 1024 * 1024),
    )(*inputs)

    # NOTE: when blocks are chained, keep this lane-padded NHWC bf16 tensor as-is and skip the
    # slice/transpose/upcast below (it exists only to match the PyTorch NCHW f32 interface).
    y = y[..., :cout].astype(jnp.float32)
    return jnp.transpose(y, (0, 3, 1, 2))                            # NHWC -> NCHW


# ----------------------------- deterministic init -----------------------------

class _KeyGen:
    def __init__(self, key):
        self._key = key

    def __call__(self):
        self._key, sub = jax.random.split(self._key)
        return sub


def init_block_params(key, cfg):
    """Random weights; BatchNorm folded with eval-mode (running) statistics.  The BN scale is
    folded into the conv weight columns (fold in f32, then bf16 cast); only the additive
    per-channel shift is kept for the kernel epilogues.  Padded rows/columns stay exactly 0."""
    # TODO(synk): train-mode batch statistics are not reproduced (eval-mode fold only).
    k, cin, cexp, cout, act, use_se, s = cfg
    cin_p, cexp_p, cout_p = (_round_up(c, LANES) for c in (cin, cexp, cout))
    kg = _KeyGen(key)

    def w(*shape):
        return 0.1 * jax.random.normal(kg(), shape, jnp.float32)

    def bn(c):
        gamma = 1.0 + 0.05 * jax.random.normal(kg(), (c,), jnp.float32)
        beta = 0.05 * jax.random.normal(kg(), (c,), jnp.float32)
        mean = jnp.zeros((c,), jnp.float32)
        var = jnp.ones((c,), jnp.float32)
        scale = gamma / jnp.sqrt(var + BN_EPS)
        shift = beta - mean * scale
        return scale, shift

    def fold(wt, scale, r_pad, c_pad):       # fold BN scale into weight cols, pad, cast bf16
        wf = wt * scale[None, :]
        wf = jnp.pad(wf, ((0, r_pad - wf.shape[0]), (0, c_pad - wf.shape[1])))
        return wf.astype(jnp.bfloat16)

    def shift_row(shift, c_pad):             # (c,) f32 -> (1, c_pad) f32
        return jnp.pad(shift, (0, c_pad - shift.shape[0]))[None, :]

    prm = {}
    sc1, sh1 = bn(cexp)
    prm["w1"] = fold(w(cin, cexp), sc1, cin_p, cexp_p)
    prm["b1"] = shift_row(sh1, cexp_p)

    sc2, sh2 = bn(cexp)
    dwf = w(k, k, cexp).reshape(k * k, cexp) * sc2[None, :]
    prm["dw"] = jnp.pad(dwf, ((0, 0), (0, cexp_p - cexp)))           # tiny -> keep f32
    prm["b2"] = shift_row(sh2, cexp_p)

    sc3, sh3 = bn(cout)
    prm["w3"] = fold(w(cexp, cout), sc3, cexp_p, cout_p)
    prm["b3"] = shift_row(sh3, cout_p)

    if use_se:
        red = max(cout // 4, 1)
        red_p = _round_up(red, LANES)
        se_sc1, se_sh1 = bn(red)
        prm["se_w1"] = fold(w(cout, red), se_sc1, cout_p, red_p)
        prm["se_b1"] = shift_row(se_sh1, red_p)
        se_sc2, se_sh2 = bn(cout)
        prm["se_w2"] = fold(w(red, cout), se_sc2, red_p, cout_p)
        prm["se_b2"] = shift_row(se_sh2, cout_p)
    if s == 1 and cin != cout:
        sc_sc, sc_sh = bn(cout)
        prm["sc_w"] = fold(w(cin, cout), sc_sc, cin_p, cout_p)
        prm["sc_b"] = shift_row(sc_sh, cout_p)
    return prm


if __name__ == "__main__":
    key = jax.random.PRNGKey(0)
    xkey, k1, k2, k3 = jax.random.split(key, 4)
    x = jax.random.normal(xkey, (2, 16, 16, 16), jnp.float32)        # NCHW, like the PyTorch module

    # (kernel, in, expand, out, nonlinear, use_se, stride)
    configs = [
        (3, 16, 32, 16, "relu", True, 1),      # SE + identity residual
        (3, 16, 64, 24, "hswish", True, 1),    # SE + 1x1-conv shortcut residual
        (5, 16, 48, 24, "hswish", True, 2),    # stride-2, 5x5 depthwise, SE
    ]
    pkeys = [k1, k2, k3]
    expected = [(2, 16, 16, 16), (2, 24, 16, 16), (2, 24, 8, 8)]

    for cfg, pk, exp_shape in zip(configs, pkeys, expected):
        params = init_block_params(pk, cfg)
        fwd = jax.jit(functools.partial(mobilev3_block_forward, cfg=cfg))
        out = jax.block_until_ready(fwd(params, x))
        assert out.shape == exp_shape, (cfg, out.shape)
        assert bool(jnp.all(jnp.isfinite(out))), cfg

    print("KERNEL_OK")
</pallas_src>

<mosaic_0001>
module attributes {stable_mosaic.version = 11 : i64} {
  func.func @kernel(%arg0: i32, %arg1: memref<1x24x24x128xbf16, #tpu.memory_space<vmem>>, %arg2: memref<24x24x1xf32, #tpu.memory_space<vmem>>, %arg3: memref<128x128xbf16, #tpu.memory_space<vmem>>, %arg4: memref<1x128xf32, #tpu.memory_space<vmem>>, %arg5: memref<9x128xf32, #tpu.memory_space<vmem>>, %arg6: memref<1x128xf32, #tpu.memory_space<vmem>>, %arg7: memref<128x128xbf16, #tpu.memory_space<vmem>>, %arg8: memref<1x128xf32, #tpu.memory_space<vmem>>, %arg9: memref<128x128xbf16, #tpu.memory_space<vmem>>, %arg10: memref<1x128xf32, #tpu.memory_space<vmem>>, %arg11: memref<128x128xbf16, #tpu.memory_space<vmem>>, %arg12: memref<1x128xf32, #tpu.memory_space<vmem>>, %arg13: memref<1x16x16x128xbf16, #tpu.memory_space<vmem>>, %arg14: memref<1x16x16x128xbf16, #tpu.memory_space<vmem>>, %arg15: memref<24x24x128xbf16, #tpu.memory_space<vmem>>) attributes {dimension_semantics = [#tpu.dimension_semantics<parallel>], iteration_bounds = array<i64: 2>, scalar_prefetch = 0 : i64, scratch_operands = 1 : i64, tpu.core_type = #tpu.core_type<tc>, window_params = [{transform_indices = @transform_0, window_bounds = array<i64: 1, 24, 24, 128>}, {pipeline_mode = #tpu.pipeline_mode<synchronous>, transform_indices = @transform_1, window_bounds = array<i64: 24, 24, 1>}, {pipeline_mode = #tpu.pipeline_mode<synchronous>, transform_indices = @transform_2, window_bounds = array<i64: 128, 128>}, {pipeline_mode = #tpu.pipeline_mode<synchronous>, transform_indices = @transform_3, window_bounds = array<i64: 1, 128>}, {pipeline_mode = #tpu.pipeline_mode<synchronous>, transform_indices = @transform_4, window_bounds = array<i64: 9, 128>}, {pipeline_mode = #tpu.pipeline_mode<synchronous>, transform_indices = @transform_5, window_bounds = array<i64: 1, 128>}, {pipeline_mode = #tpu.pipeline_mode<synchronous>, transform_indices = @transform_6, window_bounds = array<i64: 128, 128>}, {pipeline_mode = #tpu.pipeline_mode<synchronous>, transform_indices = @transform_7, window_bounds = array<i64: 1, 128>}, {pipeline_mode = #tpu.pipeline_mode<synchronous>, transform_indices = @transform_8, window_bounds = array<i64: 128, 128>}, {pipeline_mode = #tpu.pipeline_mode<synchronous>, transform_indices = @transform_9, window_bounds = array<i64: 1, 128>}, {pipeline_mode = #tpu.pipeline_mode<synchronous>, transform_indices = @transform_10, window_bounds = array<i64: 128, 128>}, {pipeline_mode = #tpu.pipeline_mode<synchronous>, transform_indices = @transform_11, window_bounds = array<i64: 1, 128>}, {transform_indices = @transform_12, window_bounds = array<i64: 1, 16, 16, 128>}, {transform_indices = @transform_13, window_bounds = array<i64: 1, 16, 16, 128>}]} {
    %c0 = arith.constant 0 : index
    %c0_0 = arith.constant 0 : index
    %c0_1 = arith.constant 0 : index
    %c0_2 = arith.constant 0 : index
    %0 = vector.load %arg1[%c0, %c0_0, %c0_1, %c0_2] : memref<1x24x24x128xbf16, #tpu.memory_space<vmem>>, vector<1x24x24x128xbf16>
    %1 = vector.shape_cast %0 : vector<1x24x24x128xbf16> to vector<576x128xbf16>
    %c0_3 = arith.constant 0 : index
    %c0_4 = arith.constant 0 : index
    %2 = vector.load %arg3[%c0_3, %c0_4] : memref<128x128xbf16, #tpu.memory_space<vmem>>, vector<128x128xbf16>
    %cst = arith.constant dense<0.000000e+00> : vector<576x128xf32>
    %3 = tpu.matmul %1, %2, %cst {dimension_numbers = #tpu.dot_dimension_numbers<[1], [0], [0], [1], [0, 0, 1, 1], [], []>} : vector<576x128xbf16>, vector<128x128xbf16>, vector<576x128xf32> -> vector<576x128xf32>
    %c0_5 = arith.constant 0 : index
    %c0_6 = arith.constant 0 : index
    %4 = vector.load %arg4[%c0_5, %c0_6] : memref<1x128xf32, #tpu.memory_space<vmem>>, vector<1x128xf32>
    %5 = vector.broadcast %4 : vector<1x128xf32> to vector<576x128xf32>
    %6 = arith.addf %3, %5 : vector<576x128xf32>
    %cst_7 = arith.constant 0.000000e+00 : f32
    %7 = vector.broadcast %cst_7 : f32 to vector<576x128xf32>
    %8 = arith.maximumf %6, %7 : vector<576x128xf32>
    %9 = vector.shape_cast %8 : vector<576x128xf32> to vector<24x24x128xf32>
    %c0_8 = arith.constant 0 : index
    %c0_9 = arith.constant 0 : index
    %c0_10 = arith.constant 0 : index
    %10 = vector.load %arg2[%c0_8, %c0_9, %c0_10] : memref<24x24x1xf32, #tpu.memory_space<vmem>>, vector<24x24x1xf32>
    %11 = vector.broadcast %10 : vector<24x24x1xf32> to vector<24x24x128xf32>
    %12 = arith.mulf %9, %11 : vector<24x24x128xf32>
    %13 = arith.truncf %12 : vector<24x24x128xf32> to vector<24x24x128xbf16>
    %c0_11 = arith.constant 0 : index
    %c0_12 = arith.constant 0 : index
    %c0_13 = arith.constant 0 : index
    %14 = vector.load %arg15[%c0_11, %c0_12, %c0_13] : memref<24x24x128xbf16, #tpu.memory_space<vmem>>, vector<24x24x128xbf16>
    tpu.vector_store %arg15[%c0_11, %c0_12, %c0_13], %13 {strides = array<i32>} : memref<24x24x128xbf16, #tpu.memory_space<vmem>>, vector<24x24x128xbf16>,
    %c0_14 = arith.constant 0 : index
    %c0_15 = arith.constant 0 : index
    %15 = vector.load %arg5[%c0_14, %c0_15] : memref<9x128xf32, #tpu.memory_space<vmem>>, vector<9x128xf32>
    %cst_16 = arith.constant 0.000000e+00 : f32
    %16 = vector.broadcast %cst_16 : f32 to vector<384x128xf32>
    %c0_17 = arith.constant 0 : index
    %c0_18 = arith.constant 0 : index
    %c0_19 = arith.constant 0 : index
    %17 = vector.load %arg15[%c0_17, %c0_18, %c0_19] : memref<24x24x128xbf16, #tpu.memory_space<vmem>>, vector<16x24x128xbf16>
    %18 = arith.extf %17 : vector<16x24x128xbf16> to vector<16x24x128xf32>
    %19 = vector.shape_cast %18 : vector<16x24x128xf32> to vector<384x128xf32>
    %20 = vector.extract_strided_slice %15 {offsets = [0, 0], sizes = [1, 128], strides = [1, 1]} : vector<9x128xf32> to vector<1x128xf32>
    %21 = vector.broadcast %20 : vector<1x128xf32> to vector<384x128xf32>
    %22 = arith.mulf %19, %21 : vector<384x128xf32>
    %23 = arith.addf %16, %22 : vector<384x128xf32>
    %c383_i32 = arith.constant 383 : i32
    %24 = tpu.dynamic_rotate %19 by %c383_i32 dim 0 : vector<384x128xf32>, i32 -> vector<384x128xf32>
    %25 = vector.extract_strided_slice %15 {offsets = [1, 0], sizes = [1, 128], strides = [1, 1]} : vector<9x128xf32> to vector<1x128xf32>
    %26 = vector.broadcast %25 : vector<1x128xf32> to vector<384x128xf32>
    %27 = arith.mulf %24, %26 : vector<384x128xf32>
    %28 = arith.addf %23, %27 : vector<384x128xf32>
    %c382_i32 = arith.constant 382 : i32
    %29 = tpu.dynamic_rotate %19 by %c382_i32 dim 0 : vector<384x128xf32>, i32 -> vector<384x128xf32>
    %30 = vector.extract_strided_slice %15 {offsets = [2, 0], sizes = [1, 128], strides = [1, 1]} : vector<9x128xf32> to vector<1x128xf32>
    %31 = vector.broadcast %30 : vector<1x128xf32> to vector<384x128xf32>
    %32 = arith.mulf %29, %31 : vector<384x128xf32>
    %33 = arith.addf %28, %32 : vector<384x128xf32>
    %c1 = arith.constant 1 : index
    %c0_20 = arith.constant 0 : index
    %c0_21 = arith.constant 0 : index
    %34 = vector.load %arg15[%c1, %c0_20, %c0_21] : memref<24x24x128xbf16, #tpu.memory_space<vmem>>, vector<16x24x128xbf16>
    %35 = arith.extf %34 : vector<16x24x128xbf16> to vector<16x24x128xf32>
    %36 = vector.shape_cast %35 : vector<16x24x128xf32> to vector<384x128xf32>
    %37 = vector.extract_strided_slice %15 {offsets = [3, 0], sizes = [1, 128], strides = [1, 1]} : vector<9x128xf32> to vector<1x128xf32>
    %38 = vector.broadcast %37 : vector<1x128xf32> to vector<384x128xf32>
    %39 = arith.mulf %36, %38 : vector<384x128xf32>
    %40 = arith.addf %33, %39 : vector<384x128xf32>
    %c383_i32_22 = arith.constant 383 : i32
    %41 = tpu.dynamic_rotate %36 by %c383_i32_22 dim 0 : vector<384x128xf32>, i32 -> vector<384x128xf32>
    %42 = vector.extract_strided_slice %15 {offsets = [4, 0], sizes = [1, 128], strides = [1, 1]} : vector<9x128xf32> to vector<1x128xf32>
    %43 = vector.broadcast %42 : vector<1x128xf32> to vector<384x128xf32>
    %44 = arith.mulf %41, %43 : vector<384x128xf32>
    %45 = arith.addf %40, %44 : vector<384x128xf32>
    %c382_i32_23 = arith.constant 382 : i32
    %46 = tpu.dynamic_rotate %36 by %c382_i32_23 dim 0 : vector<384x128xf32>, i32 -> vector<384x128xf32>
    %47 = vector.extract_strided_slice %15 {offsets = [5, 0], sizes = [1, 128], strides = [1, 1]} : vector<9x128xf32> to vector<1x128xf32>
    %48 = vector.broadcast %47 : vector<1x128xf32> to vector<384x128xf32>
    %49 = arith.mulf %46, %48 : vector<384x128xf32>
    %50 = arith.addf %45, %49 : vector<384x128xf32>
    %c2 = arith.constant 2 : index
    %c0_24 = arith.constant 0 : index
    %c0_25 = arith.constant 0 : index
    %51 = vector.load %arg15[%c2, %c0_24, %c0_25] : memref<24x24x128xbf16, #tpu.memory_space<vmem>>, vector<16x24x128xbf16>
    %52 = arith.extf %51 : vector<16x24x128xbf16> to vector<16x24x128xf32>
    %53 = vector.shape_cast %52 : vector<16x24x128xf32> to vector<384x128xf32>
    %54 = vector.extract_strided_slice %15 {offsets = [6, 0], sizes = [1, 128], strides = [1, 1]} : vector<9x128xf32> to vector<1x128xf32>
    %55 = vector.broadcast %54 : vector<1x128xf32> to vector<384x128xf32>
    %56 = arith.mulf %53, %55 : vector<384x128xf32>
    %57 = arith.addf %50, %56 : vector<384x128xf32>
    %c383_i32_26 = arith.constant 383 : i32
    %58 = tpu.dynamic_rotate %53 by %c383_i32_26 dim 0 : vector<384x128xf32>, i32 -> vector<384x128xf32>
    %59 = vector.extract_strided_slice %15 {offsets = [7, 0], sizes = [1, 128], strides = [1, 1]} : vector<9x128xf32> to vector<1x128xf32>
    %60 = vector.broadcast %59 : vector<1x128xf32> to vector<384x128xf32>
    %61 = arith.mulf %58, %60 : vector<384x128xf32>
    %62 = arith.addf %57, %61 : vector<384x128xf32>
    %c382_i32_27 = arith.constant 382 : i32
    %63 = tpu.dynamic_rotate %53 by %c382_i32_27 dim 0 : vector<384x128xf32>, i32 -> vector<384x128xf32>
    %64 = vector.extract_strided_slice %15 {offsets = [8, 0], sizes = [1, 128], strides = [1, 1]} : vector<9x128xf32> to vector<1x128xf32>
    %65 = vector.broadcast %64 : vector<1x128xf32> to vector<384x128xf32>
    %66 = arith.mulf %63, %65 : vector<384x128xf32>
    %67 = arith.addf %62, %66 : vector<384x128xf32>
    %c0_28 = arith.constant 0 : index
    %c0_29 = arith.constant 0 : index
    %68 = vector.load %arg6[%c0_28, %c0_29] : memref<1x128xf32, #tpu.memory_space<vmem>>, vector<1x128xf32>
    %69 = vector.broadcast %68 : vector<1x128xf32> to vector<384x128xf32>
    %70 = arith.addf %67, %69 : vector<384x128xf32>
    %cst_30 = arith.constant 0.000000e+00 : f32
    %71 = vector.broadcast %cst_30 : f32 to vector<384x128xf32>
    %72 = arith.maximumf %70, %71 : vector<384x128xf32>
    %73 = vector.shape_cast %72 : vector<384x128xf32> to vector<16x24x128xf32>
    %74 = vector.extract_strided_slice %73 {offsets = [0, 0, 0], sizes = [16, 16, 128], strides = [1, 1, 1]} : vector<16x24x128xf32> to vector<16x16x128xf32>
    %75 = vector.shape_cast %74 : vector<16x16x128xf32> to vector<256x128xf32>
    %76 = arith.truncf %75 : vector<256x128xf32> to vector<256x128xbf16>
    %c0_31 = arith.constant 0 : index
    %c0_32 = arith.constant 0 : index
    %77 = vector.load %arg7[%c0_31, %c0_32] : memref<128x128xbf16, #tpu.memory_space<vmem>>, vector<128x128xbf16>
    %cst_33 = arith.constant dense<0.000000e+00> : vector<256x128xf32>
    %78 = tpu.matmul %76, %77, %cst_33 {dimension_numbers = #tpu.dot_dimension_numbers<[1], [0], [0], [1], [0, 0, 1, 1], [], []>} : vector<256x128xbf16>, vector<128x128xbf16>, vector<256x128xf32> -> vector<256x128xf32>
    %c0_34 = arith.constant 0 : index
    %c0_35 = arith.constant 0 : index
    %79 = vector.load %arg8[%c0_34, %c0_35] : memref<1x128xf32, #tpu.memory_space<vmem>>, vector<1x128xf32>
    %80 = vector.broadcast %79 : vector<1x128xf32> to vector<256x128xf32>
    %81 = arith.addf %78, %80 : vector<256x128xf32>
    %cst_36 = arith.constant dense<0.000000e+00> : vector<128xf32>
    %82 = vector.multi_reduction <add>, %81, %cst_36 [0] : vector<256x128xf32> to vector<128xf32>
    %83 = vector.shape_cast %82 : vector<128xf32> to vector<1x128xf32>
    %cst_37 = arith.constant 3.906250e-03 : f32
    %84 = vector.broadcast %cst_37 : f32 to vector<1x128xf32>
    %85 = arith.mulf %83, %84 : vector<1x128xf32>
    %86 = arith.truncf %85 : vector<1x128xf32> to vector<1x128xbf16>
    %c0_38 = arith.constant 0 : index
    %c0_39 = arith.constant 0 : index
    %87 = vector.load %arg9[%c0_38, %c0_39] : memref<128x128xbf16, #tpu.memory_space<vmem>>, vector<128x128xbf16>
    %cst_40 = arith.constant dense<0.000000e+00> : vector<1x128xf32>
    %88 = tpu.matmul %86, %87, %cst_40 {dimension_numbers = #tpu.dot_dimension_numbers<[1], [0], [0], [1], [0, 0, 1, 1], [], []>} : vector<1x128xbf16>, vector<128x128xbf16>, vector<1x128xf32> -> vector<1x128xf32>
    %c0_41 = arith.constant 0 : index
    %c0_42 = arith.constant 0 : index
    %89 = vector.load %arg10[%c0_41, %c0_42] : memref<1x128xf32, #tpu.memory_space<vmem>>, vector<1x128xf32>
    %90 = arith.addf %88, %89 : vector<1x128xf32>
    %cst_43 = arith.constant 0.000000e+00 : f32
    %91 = vector.broadcast %cst_43 : f32 to vector<1x128xf32>
    %92 = arith.maximumf %90, %91 : vector<1x128xf32>
    %93 = arith.truncf %92 : vector<1x128xf32> to vector<1x128xbf16>
    %c0_44 = arith.constant 0 : index
    %c0_45 = arith.constant 0 : index
    %94 = vector.load %arg11[%c0_44, %c0_45] : memref<128x128xbf16, #tpu.memory_space<vmem>>, vector<128x128xbf16>
    %cst_46 = arith.constant dense<0.000000e+00> : vector<1x128xf32>
    %95 = tpu.matmul %93, %94, %cst_46 {dimension_numbers = #tpu.dot_dimension_numbers<[1], [0], [0], [1], [0, 0, 1, 1], [], []>} : vector<1x128xbf16>, vector<128x128xbf16>, vector<1x128xf32> -> vector<1x128xf32>
    %c0_47 = arith.constant 0 : index
    %c0_48 = arith.constant 0 : index
    %96 = vector.load %arg12[%c0_47, %c0_48] : memref<1x128xf32, #tpu.memory_space<vmem>>, vector<1x128xf32>
    %97 = arith.addf %95, %96 : vector<1x128xf32>
    %cst_49 = arith.constant 3.000000e+00 : f32
    %98 = vector.broadcast %cst_49 : f32 to vector<1x128xf32>
    %99 = arith.addf %97, %98 : vector<1x128xf32>
    %cst_50 = arith.constant 0.000000e+00 : f32
    %cst_51 = arith.constant 6.000000e+00 : f32
    %100 = vector.broadcast %cst_50 : f32 to vector<1x128xf32>
    %101 = arith.maximumf %100, %99 : vector<1x128xf32>
    %102 = vector.broadcast %cst_51 : f32 to vector<1x128xf32>
    %103 = arith.minimumf %102, %101 : vector<1x128xf32>
    %cst_52 = arith.constant 0.166666672 : f32
    %104 = vector.broadcast %cst_52 : f32 to vector<1x128xf32>
    %105 = arith.mulf %103, %104 : vector<1x128xf32>
    %106 = vector.broadcast %105 : vector<1x128xf32> to vector<256x128xf32>
    %107 = arith.mulf %81, %106 : vector<256x128xf32>
    %c0_53 = arith.constant 0 : index
    %c0_54 = arith.constant 0 : index
    %c0_55 = arith.constant 0 : index
    %c0_56 = arith.constant 0 : index
    %108 = vector.load %arg13[%c0_53, %c0_54, %c0_55, %c0_56] : memref<1x16x16x128xbf16, #tpu.memory_space<vmem>>, vector<1x16x16x128xbf16>
    %109 = vector.shape_cast %108 : vector<1x16x16x128xbf16> to vector<256x128xbf16>
    %110 = arith.extf %109 : vector<256x128xbf16> to vector<256x128xf32>
    %111 = arith.addf %107, %110 : vector<256x128xf32>
    %112 = vector.shape_cast %111 : vector<256x128xf32> to vector<1x16x16x128xf32>
    %113 = arith.truncf %112 : vector<1x16x16x128xf32> to vector<1x16x16x128xbf16>
    %c0_57 = arith.constant 0 : index
    %c0_58 = arith.constant 0 : index
    %c0_59 = arith.constant 0 : index
    %c0_60 = arith.constant 0 : index
    %114 = vector.load %arg14[%c0_57, %c0_58, %c0_59, %c0_60] : memref<1x16x16x128xbf16, #tpu.memory_space<vmem>>, vector<1x16x16x128xbf16>
    tpu.vector_store %arg14[%c0_57, %c0_58, %c0_59, %c0_60], %113 {strides = array<i32>} : memref<1x16x16x128xbf16, #tpu.memory_space<vmem>>, vector<1x16x16x128xbf16>,
    return
  }
  func.func @transform_0(%arg0: i32) -> (i32, i32, i32, i32) {
    %c0_i32 = arith.constant 0 : i32
    %c0_i32_0 = arith.constant 0 : i32
    %c0_i32_1 = arith.constant 0 : i32
    %c0_i32_2 = arith.constant 0 : i32
    return %arg0, %c0_i32, %c0_i32_0, %c0_i32_1 : i32, i32, i32, i32
  }
  func.func @transform_1(%arg0: i32) -> (i32, i32, i32) {
    %c0_i32 = arith.constant 0 : i32
    %c0_i32_0 = arith.constant 0 : i32
    %c0_i32_1 = arith.constant 0 : i32
    %c0_i32_2 = arith.constant 0 : i32
    return %c0_i32, %c0_i32_0, %c0_i32_1 : i32, i32, i32
  }
  func.func @transform_2(%arg0: i32) -> (i32, i32) {
    %c0_i32 = arith.constant 0 : i32
    %c0_i32_0 = arith.constant 0 : i32
    %c0_i32_1 = arith.constant 0 : i32
    return %c0_i32, %c0_i32_0 : i32, i32
  }
  func.func @transform_3(%arg0: i32) -> (i32, i32) {
    %c0_i32 = arith.constant 0 : i32
    %c0_i32_0 = arith.constant 0 : i32
    %c0_i32_1 = arith.constant 0 : i32
    return %c0_i32, %c0_i32_0 : i32, i32
  }
  func.func @transform_4(%arg0: i32) -> (i32, i32) {
    %c0_i32 = arith.constant 0 : i32
    %c0_i32_0 = arith.constant 0 : i32
    %c0_i32_1 = arith.constant 0 : i32
    return %c0_i32, %c0_i32_0 : i32, i32
  }
  func.func @transform_5(%arg0: i32) -> (i32, i32) {
    %c0_i32 = arith.constant 0 : i32
    %c0_i32_0 = arith.constant 0 : i32
    %c0_i32_1 = arith.constant 0 : i32
    return %c0_i32, %c0_i32_0 : i32, i32
  }
  func.func @transform_6(%arg0: i32) -> (i32, i32) {
    %c0_i32 = arith.constant 0 : i32
    %c0_i32_0 = arith.constant 0 : i32
    %c0_i32_1 = arith.constant 0 : i32
    return %c0_i32, %c0_i32_0 : i32, i32
  }
  func.func @transform_7(%arg0: i32) -> (i32, i32) {
    %c0_i32 = arith.constant 0 : i32
    %c0_i32_0 = arith.constant 0 : i32
    %c0_i32_1 = arith.constant 0 : i32
    return %c0_i32, %c0_i32_0 : i32, i32
  }
  func.func @transform_8(%arg0: i32) -> (i32, i32) {
    %c0_i32 = arith.constant 0 : i32
    %c0_i32_0 = arith.constant 0 : i32
    %c0_i32_1 = arith.constant 0 : i32
    return %c0_i32, %c0_i32_0 : i32, i32
  }
  func.func @transform_9(%arg0: i32) -> (i32, i32) {
    %c0_i32 = arith.constant 0 : i32
    %c0_i32_0 = arith.constant 0 : i32
    %c0_i32_1 = arith.constant 0 : i32
    return %c0_i32, %c0_i32_0 : i32, i32
  }
  func.func @transform_10(%arg0: i32) -> (i32, i32) {
    %c0_i32 = arith.constant 0 : i32
    %c0_i32_0 = arith.constant 0 : i32
    %c0_i32_1 = arith.constant 0 : i32
    return %c0_i32, %c0_i32_0 : i32, i32
  }
  func.func @transform_11(%arg0: i32) -> (i32, i32) {
    %c0_i32 = arith.constant 0 : i32
    %c0_i32_0 = arith.constant 0 : i32
    %c0_i32_1 = arith.constant 0 : i32
    return %c0_i32, %c0_i32_0 : i32, i32
  }
  func.func @transform_12(%arg0: i32) -> (i32, i32, i32, i32) {
    %c0_i32 = arith.constant 0 : i32
    %c0_i32_0 = arith.constant 0 : i32
    %c0_i32_1 = arith.constant 0 : i32
    %c0_i32_2 = arith.constant 0 : i32
    return %arg0, %c0_i32, %c0_i32_0, %c0_i32_1 : i32, i32, i32, i32
  }
  func.func @transform_13(%arg0: i32) -> (i32, i32, i32, i32) {
    %c0_i32 = arith.constant 0 : i32
    %c0_i32_0 = arith.constant 0 : i32
    %c0_i32_1 = arith.constant 0 : i32
    %c0_i32_2 = arith.constant 0 : i32
    return %arg0, %c0_i32, %c0_i32_0, %c0_i32_1 : i32, i32, i32, i32
  }
}

</mosaic_0001>

<bundles_post_ra>
// kernel: mobilev3_block_forward.1
= control target key start
LH: loop header
LB: loop body
LE: loop exit
PB: predicated region body
PF: predicated region fallthrough
CT: control target
= control target key end

     0   :  { %s9015_s0 = inlined_call_operand.hbm [shape: bf16[2,24,24,128], index: 0, kind: input, shape index: {}]   ;;  %s9016_s1 = inlined_call_operand.hbm [shape: f32[24,24,1], index: 1, kind: input, shape index: {}]   ;;  %s9017_s2 = inlined_call_operand.hbm [shape: bf16[128,128], index: 2, kind: input, shape index: {}]   ;;  %s9018_s3 = inlined_call_operand.hbm [shape: f32[1,128], index: 3, kind: input, shape index: {}]   ;;  %s9019_s4 = inlined_call_operand.hbm [shape: f32[9,128], index: 4, kind: input, shape index: {}]   ;;  %s9020_s5 = inlined_call_operand.hbm [shape: f32[1,128], index: 5, kind: input, shape index: {}]   ;;  %s9021_s6 = inlined_call_operand.hbm [shape: bf16[128,128], index: 6, kind: input, shape index: {}]   ;;  %s9022_s7 = inlined_call_operand.hbm [shape: f32[1,128], index: 7, kind: input, shape index: {}]   ;;  %s9023_s8 = inlined_call_operand.hbm [shape: bf16[128,128], index: 8, kind: input, shape index: {}]   ;;  %s9024_s9 = inlined_call_operand.hbm [shape: f32[1,128], index: 9, kind: input, shape index: {}]   ;;  %s9025_s10 = inlined_call_operand.hbm [shape: bf16[128,128], index: 10, kind: input, shape index: {}]   ;;  %s9026_s11 = inlined_call_operand.hbm [shape: f32[1,128], index: 11, kind: input, shape index: {}]   ;;  %s9027_s12 = inlined_call_operand.hbm [shape: bf16[2,16,16,128], index: 12, kind: input, shape index: {}]   ;;  %s9028_s13 = inlined_call_operand.hbm [shape: bf16[2,16,16,128], index: 13, kind: output, shape index: {}]  }
   0x1   :  { %9052 = sst [smem:[#allocation38_spill]] %s9015_s0 }
   0x2   :  { %9053 = sst [smem:[#allocation39_spill]] %s9016_s1 }
   0x3   :  { %9054 = sst [smem:[#allocation40_spill]] %s9017_s2 }
   0x4   :  { %9055 = sst [smem:[#allocation41_spill]] %s9018_s3 }
   0x5   :  { %9056 = sst [smem:[#allocation42_spill]] %s9020_s5 }
   0x6   :  { %9057 = sst [smem:[#allocation43_spill]] %s9022_s7 }
   0x7   :  { %9058 = sst [smem:[#allocation44_spill]] %s9024_s9 }
   0x8   :  { %9059 = sst [smem:[#allocation45_spill]] %s9025_s10 }
   0x9   :  { %9060 = sst [smem:[#allocation46_spill]] %s9026_s11 }
   0xa   :  { %9061 = sst [smem:[#allocation47_spill]] %s9027_s12 }
   0xb   :  { %9062 = sst [smem:[#allocation48_spill]] %s9028_s13 }
   0xc   :  { %18 = vsyncpa [#allocation4], 0 }
   0xd   :  { %20 = vsyncpa [#allocation4 + $0x1], 0 }
   0xe   :  { %21 = vsyncpa [#allocation7], 0 }
   0xf   :  { %22 = vsyncpa [#allocation10], 0 }
  0x10   :  { %23 = vsyncpa [#allocation13], 0 }
  0x11   :  { %24 = vsyncpa [#allocation16], 0 }
  0x12   :  { %25 = vsyncpa [#allocation19], 0 }
  0x13   :  { %26 = vsyncpa [#allocation22], 0 }
  0x14   :  { %27 = vsyncpa [#allocation5], 0 }
  0x15   :  { %29 = vsyncpa [#allocation5 + $0x1], 0  ;;  %s6883_s25 = smov 0   ;;  %s6885_s26 = smov 0  }
  0x16   :  { %s6887_s27 = smov 0   ;;  %s6889_s28 = smov 0  }
  0x17 LB: > { %9063 = sst [smem:[#allocation34_spill]] %s6784_s27  ;;  %s6790_s29 = smov [#allocation6]   ;;  %s6788_s28 = sphi %s6889_s28, %s9139_s28   ;;  %s6784_s27 = sphi %s6887_s27, %s9141_s27   ;;  %s6780_s26 = sphi %s6885_s26, %s9143_s26   ;;  %s6776_s25 = sphi %s6883_s25, %s9142_s25  }
  0x18   : > { %s361_s30 = sshll.u32 %s6790_s29, 4  ;;  %s6904_s14 = sadd.s32 4294967295, %s6788_s28   ;;  %s6909_s30 = int_to_ptr.vmem [resolvable:$true] %s361_s30 }
  0x19   : > { %p4754_p0 = scmp.ge.s32.totalorder %s6788_s28, 1  ;;  %p9035_p1 = scmp.eq.s32.totalorder %s6904_s14, 0 }
  0x1a   : > { %p349_p2 = scmp.lt.s32.totalorder %s6788_s28, 3  ;;  %s6791_s16 = smov [#allocation9]  }
  0x1b   : > { %s388_s17 = sshll.u32 %s6791_s16, 4  ;;  %s6792_s19 = smov [#allocation12]   ;;  %s6924_s17 = int_to_ptr.vmem [resolvable:$true] %s388_s17 }
  0x1c   : > { %p6911_p3 = pnand %p4754_p0, %p349_p2  ;;  %s412_s20 = sshll.u32 %s6792_s19, 4  ;;  %s6926_s20 = int_to_ptr.vmem [resolvable:$true] %s412_s20 }
  0x1d   : > { %s9067_s1 = sld [smem:[#allocation39_spill]] }
  0x1e   : > { %s9064_s15 = scalar_select %p6911_p3, 1, 0 }
  0x1f   : > { %p6129_p5 = pneg %p6911_p3 }
  0x20   : > { %9065 = sst [smem:[#allocation35_spill]] %s9064_s15 }
  0x21   : > { %p6920_p6 = pnand %p6129_p5, %p9035_p1 }
  0x23   : > { %s9066_s18 = scalar_select %p6920_p6, 1, 0 }
  0x24   : > { %s6326_s23 = scalar_lea.hbm %s9067_s1, 9216  ;;  %p6936_p8 = pneg %p6920_p6 }
  0x25   : > { %p6327_p7 = scmp.ne.s32.totalorder %s9067_s1, %s6326_s23  ;;  %p6333_p11 = scmp.lt.u32.totalorder %s6326_s23, %s9067_s1 }
  0x27   : > { %p6329_p9 = pnand %p6936_p8, %p6327_p7 }
  0x29   : > { %p6330_p10 = pneg %p6329_p9 }
  0x2b   : > { %p6335_p12 = pnand %p6333_p11, %p6330_p10 }
  0x2d   : > { %6338 = shalt.err (!%p6335_p12)
}
  0x2e   : > { %s6339_s21 = scalar_lea.vmem %s6909_s30, 9216  ;;  %p6347_p5 = scmp.lt.s32.totalorder %s6909_s30, %s6909_s30 }
  0x2f   : > { %p6340_p13 = scmp.ne.s32.totalorder %s6909_s30, %s6339_s21  ;;  %p6348_p4 = scmp.lt.s32.totalorder %s6339_s21, %s6339_s21 }
  0x31   : > { %p6342_p0 = pnand %p6340_p13, %p6936_p8  ;;  %p6349_p7 = por %p6348_p4, %p6347_p5 }
  0x33   : > { %p6343_p2 = pneg %p6342_p0 }
  0x35   : > { %p6350_p9 = pnand %p6349_p7, %p6343_p2 }
  0x37   : > { %6353 = shalt.err (!%p6350_p9)
}
  0x38   : > { %s9034_s22 = smov 128   ;;  %s9037_s13 = smov 8  }
  0x39   : > { %6132 = dma.hbm_to_vmem [thread:$0]  (!%p6920_p6), %s9067_s1, 9216, %s6909_s30, [#allocation7], %s9034_s22, %s9034_s22, %s9037_s13  }
  0x3a   : > { %s9069_s3 = sld [smem:[#allocation41_spill]] }
  0x40   : > { %s6354_s21 = scalar_lea.hbm %s9069_s3, 16 }
  0x41   : > { %p6355_p4 = scmp.ne.s32.totalorder %s9069_s3, %s6354_s21  ;;  %p6361_p12 = scmp.lt.u32.totalorder %s6354_s21, %s9069_s3 }
  0x43   : > { %p6357_p10 = pnand %p6355_p4, %p6936_p8 }
  0x45   : > { %p6358_p11 = pneg %p6357_p10 }
  0x47   : > { %p6363_p13 = pnand %p6361_p12, %p6358_p11 }
  0x49   : > { %6366 = shalt.err (!%p6363_p13)
}
  0x4a   : > { %s6367_s30 = scalar_lea.vmem %s6924_s17, 16  ;;  %s6374_s12 = scalar_lea.vmem %s6924_s17, 32 }
  0x4b   : > { %p6368_p0 = scmp.ne.s32.totalorder %s6924_s17, %s6367_s30  ;;  %p6375_p7 = scmp.lt.s32.totalorder %s6924_s17, %s6924_s17 }
  0x4c   : > { %p6376_p9 = scmp.lt.s32.totalorder %s6374_s12, %s6367_s30 }
  0x4d   : > { %p6370_p2 = pnand %p6368_p0, %p6936_p8 }
  0x4e   : > { %p6377_p4 = por %p6376_p9, %p6375_p7 }
  0x4f   : > { %p6371_p5 = pneg %p6370_p2 }
  0x51   : > { %p6378_p10 = pnand %p6377_p4, %p6371_p5 }
  0x53   : > { %6381 = shalt.err (!%p6378_p10)
}
  0x54   : > { %6138 = dma.hbm_to_vmem [thread:$0]  (!%p6920_p6), %s9069_s3, 16, %s6924_s17, [#allocation10]  }
  0x55   : > { %s9070_s5 = sld [smem:[#allocation42_spill]] }
  0x5b   : > { %s6382_s24 = scalar_lea.hbm %s9070_s5, 16 }
  0x5c   : > { %p6383_p11 = scmp.ne.s32.totalorder %s9070_s5, %s6382_s24  ;;  %p6389_p0 = scmp.lt.u32.totalorder %s6382_s24, %s9070_s5 }
  0x5e   : > { %p6385_p12 = pnand %p6383_p11, %p6936_p8 }
  0x60   : > { %p6386_p13 = pneg %p6385_p12 }
  0x62   : > { %p6391_p2 = pnand %p6389_p0, %p6386_p13 }
  0x64   : > { %6394 = shalt.err (!%p6391_p2)
}
  0x65   : > { %s6395_s17 = scalar_lea.vmem %s6926_s20, 16  ;;  %s6402_s12 = scalar_lea.vmem %s6926_s20, 32 }
  0x66   : > { %p6396_p5 = scmp.ne.s32.totalorder %s6926_s20, %s6395_s17  ;;  %p6403_p4 = scmp.lt.s32.totalorder %s6926_s20, %s6926_s20 }
  0x67   : > { %p6404_p10 = scmp.lt.s32.totalorder %s6402_s12, %s6395_s17 }
  0x68   : > { %p6398_p7 = pnand %p6396_p5, %p6936_p8 }
  0x69   : > { %p6405_p11 = por %p6404_p10, %p6403_p4 }
  0x6a   : > { %p6399_p9 = pneg %p6398_p7 }
  0x6c   : > { %p6406_p12 = pnand %p6405_p11, %p6399_p9 }
  0x6e   : > { %6409 = shalt.err (!%p6406_p12)
}
  0x6f   : > { %6144 = dma.hbm_to_vmem [thread:$0]  (!%p6920_p6), %s9070_s5, 16, %s6926_s20, [#allocation13]  }
  0x70   : > { %s6795_s15 = smov [#allocation15]   ;;  %s6796_s24 = smov [#allocation18]  }
  0x71   : > { %s436_s23 = sshll.u32 %s6795_s15, 4  ;;  %s460_s29 = sshll.u32 %s6796_s24, 4  ;;  %s437_s23 = int_to_ptr.vmem [resolvable:$true] %s436_s23  ;;  %s461_s29 = int_to_ptr.vmem [resolvable:$true] %s460_s29 }
  0x72   : > { %s9071_s7 = sld [smem:[#allocation43_spill]] }
  0x78   : > { %s6410_s30 = scalar_lea.hbm %s9071_s7, 16 }
  0x79   : > { %p6411_p13 = scmp.ne.s32.totalorder %s9071_s7, %s6410_s30  ;;  %p6417_p5 = scmp.lt.u32.totalorder %s6410_s30, %s9071_s7 }
  0x7b   : > { %p6413_p0 = pnand %p6411_p13, %p6936_p8 }
  0x7d   : > { %p6414_p2 = pneg %p6413_p0 }
  0x7f   : > { %p6419_p7 = pnand %p6417_p5, %p6414_p2 }
  0x81   : > { %6422 = shalt.err (!%p6419_p7)
}
  0x82   : > { %s6423_s20 = scalar_lea.vmem %s437_s23, 16  ;;  %s6430_s11 = scalar_lea.vmem %s437_s23, 32 }
  0x83   : > { %p6424_p9 = scmp.ne.s32.totalorder %s437_s23, %s6423_s20  ;;  %p6431_p11 = scmp.lt.s32.totalorder %s437_s23, %s437_s23 }
  0x84   : > { %p6432_p12 = scmp.lt.s32.totalorder %s6430_s11, %s6423_s20 }
  0x85   : > { %p6426_p4 = pnand %p6424_p9, %p6936_p8 }
  0x86   : > { %p6433_p1 = por %p6432_p12, %p6431_p11 }
  0x87   : > { %p6427_p10 = pneg %p6426_p4 }
  0x89   : > { %p6434_p3 = pnand %p6433_p1, %p6427_p10 }
  0x8b   : > { %6437 = shalt.err (!%p6434_p3)
}
  0x8c   : > { %6150 = dma.hbm_to_vmem [thread:$0]  (!%p6920_p6), %s9071_s7, 16, %s437_s23, [#allocation16]  }
  0x8d   : > { %s9072_s9 = sld [smem:[#allocation44_spill]] }
  0x93   : > { %s6438_s21 = scalar_lea.hbm %s9072_s9, 16 }
  0x94   : > { %p6439_p13 = scmp.ne.s32.totalorder %s9072_s9, %s6438_s21  ;;  %p6445_p3 = scmp.lt.u32.totalorder %s6438_s21, %s9072_s9 }
  0x96   : > { %p6441_p0 = pnand %p6439_p13, %p6936_p8 }
  0x98   : > { %p6442_p1 = pneg %p6441_p0 }
  0x9a   : > { %p6447_p2 = pnand %p6445_p3, %p6442_p1 }
  0x9c   : > { %6450 = shalt.err (!%p6447_p2)
}
  0x9d   : > { %s6451_s20 = scalar_lea.vmem %s461_s29, 16  ;;  %s6458_s23 = scalar_lea.vmem %s461_s29, 32 }
  0x9e   : > { %p6452_p5 = scmp.ne.s32.totalorder %s461_s29, %s6451_s20  ;;  %p6459_p4 = scmp.lt.s32.totalorder %s461_s29, %s461_s29 }
  0x9f   : > { %p6460_p10 = scmp.lt.s32.totalorder %s6458_s23, %s6451_s20 }
  0xa0   : > { %p6454_p7 = pnand %p6452_p5, %p6936_p8 }
  0xa1   : > { %p6461_p11 = por %p6460_p10, %p6459_p4 }
  0xa2   : > { %p6455_p9 = pneg %p6454_p7 }
  0xa4   : > { %p6462_p12 = pnand %p6461_p11, %p6455_p9 }
  0xa6   : > { %6465 = shalt.err (!%p6462_p12)
}
  0xa7   : > { %6156 = dma.hbm_to_vmem [thread:$0]  (!%p6920_p6), %s9072_s9, 16, %s461_s29, [#allocation19]  }
  0xa8   : > { %s4753_s24 = sadd.s32 4294967294, %s6788_s28   ;;  %s7046_s22 = sadd.s32 1, %s6788_s28  }
  0xa9   : > { %9073 = sst [smem:[#allocation36_spill]] %s7046_s22  ;;  %s42_s19 = sadd.s32 1, %s6784_s27 }
  0xaa   : > { %s39_s21 = ssub.s32 %s6788_s28, %s7046_s22  ;;  %p49_p13 = scmp.ne.s32.totalorder %s6784_s27, %s6780_s26 }
  0xab   : > { %p40_p0 = scmp.eq.s32.totalorder %s39_s21, 0  ;;  %p50_p1 = scmp.eq.s32.totalorder %s6788_s28, 0 }
  0xac   : > { %p55_p3 = scmp.ne.s32.totalorder %s6780_s26, %s6776_s25  ;;  %p336_p2 = scmp.eq.s32.totalorder %s6904_s14, 1 }
  0xad   : > { %s7058_s30 = scalar_select %p40_p0, %s6784_s27, %s42_s19  }
  0xae   : > { %p51_p5 = por %p50_p1, %p49_p13  ;;  %p9075_p7 = scmp.eq.s32.totalorder %s6904_s14, 0 }
  0xaf   : > { %9074 = sst [smem:[#allocation37_spill]] %s7058_s30  ;;  %p7066_p4 = por %p336_p2, %p49_p13 }
  0xb0   : > { %p7062_p9 = por %p9075_p7, %p55_p3  ;;  %p342_p10 = scmp.eq.s32.totalorder %s4753_s24, 1 }
  0xb1   : > { %s9077_s17 = scalar_select %p7066_p4, 1, 0 }
  0xb2   : > { %s9076_s29 = scalar_select %p7062_p9, 1, 0 }
  0xb3   : > { %p7070_p11 = por %p342_p10, %p55_p3  ;;  %p6185_p12 = scmp.lt.s32.totalorder %s6788_s28, 2 }
  0xb4   : > { %s495_s10 = sand.u32 1, %s6788_s28   ;;  %s497_s20 = sand.u32 1, %s6784_s27  }
  0xb5   : > { %s9078_s12 = scalar_select %p7070_p11, 1, 0 }
  0xb6   : > { %s6076_s23 = smul.u32 288, %s497_s20  ;;  %p7078_p0 = pnand %p6185_p12, %p51_p5 }
  0xb7   : > { %s6077_s11 = smul.u32 4608, %s6788_s28  ;;  %s7082_s19 = sshll.u32 %s497_s20, 7 }
  0xb8   : > { %s9079_s15 = scalar_select %p7078_p0, 1, 0 }
  0xb9   : > { %s9080_s0 = sld [smem:[#allocation38_spill]]  ;;  %s499_s1 = scalar_lea.vmem [#allocation3], %s6076_s23 }
  0xba   : > { %s506_s3 = sshll.u32 %s499_s1, 4  ;;  %s7091_s5 = scalar_lea.sflag [#allocation4], %s495_s10  ;;  %s7089_s3 = int_to_ptr.vmem [resolvable:$true] %s506_s3 }
  0xbb   : > { %p9045_p1 = pneg %p7078_p0 }
  0xbf   : > { %s7087_s24 = scalar_lea.hbm %s9080_s0, %s6077_s11  ;;  %s6471_s11 = scalar_lea.hbm %s9080_s0, 9216 }
  0xc0   : > { %s6466_s7 = scalar_lea.hbm %s7087_s24, 4608  ;;  %p6472_p5 = scmp.lt.u32.totalorder %s7087_s24, %s9080_s0 }
  0xc1   : > { %p6467_p13 = scmp.ne.s32.totalorder %s7087_s24, %s6466_s7  ;;  %p6473_p7 = scmp.lt.u32.totalorder %s6471_s11, %s6466_s7 }
  0xc2   : > { %p6475_p12 = scmp.lt.u32.totalorder %s6466_s7, %s7087_s24 }
  0xc3   : > { %p6469_p3 = pnand %p9045_p1, %p6467_p13  ;;  %p6474_p10 = por %p6473_p7, %p6472_p5 }
  0xc5   : > { %p6470_p2 = pneg %p6469_p3  ;;  %p6476_p11 = por %p6475_p12, %p6474_p10 }
  0xc7   : > { %p6477_p4 = pnand %p6476_p11, %p6470_p2 }
  0xc9   : > { %6480 = shalt.err (!%p6477_p4)
}
  0xca   : > { %s6481_s1 = scalar_lea.vmem %s7089_s3, 4608  ;;  %s6797_s10 = smov [#allocation3]  }
  0xcb   : > { %p6482_p13 = scmp.ne.s32.totalorder %s7089_s3, %s6481_s1  ;;  %s6486_s23 = sshll.u32 %s6797_s10, 4  ;;  %s6487_s23 = int_to_ptr.vmem [resolvable:$false] %s6486_s23 }
  0xcc   : > { %s6488_s9 = scalar_lea.vmem %s6487_s23, 9216  ;;  %p6489_p6 = scmp.lt.s32.totalorder %s7089_s3, %s6487_s23 }
  0xcd   : > { %p6484_p3 = pnand %p6482_p13, %p9045_p1  ;;  %p6490_p5 = scmp.lt.s32.totalorder %s6488_s9, %s6481_s1 }
  0xcf   : > { %p6485_p9 = pneg %p6484_p3  ;;  %p6491_p7 = por %p6490_p5, %p6489_p6 }
  0xd1   : > { %p6492_p10 = pnand %p6491_p7, %p6485_p9 }
  0xd3   : > { %6495 = shalt.err (!%p6492_p10)
}
  0xd4   : > { %s9048_s7 = smov 64   ;;  %s9050_s13 = smov 4  }
  0xd5   : > { %6166 = dma.hbm_to_vmem [thread:$0]  (!%p7078_p0), %s7087_s24, 4608, %s7089_s3, %s7091_s5, %s9048_s7, %s9048_s7, %s9050_s13  }
  0xd6   : > { %s6800_s20 = smov [#allocation8]   ;;  %s6801_s21 = smov [#allocation11]  }
  0xd7   : > { %s374_s11 = sshll.u32 %s6800_s20, 4  ;;  %s398_s1 = sshll.u32 %s6801_s21, 4  ;;  %s375_s11 = int_to_ptr.vmem [resolvable:$true] %s374_s11  ;;  %s399_s1 = int_to_ptr.vmem [resolvable:$true] %s398_s1 }
  0xd8   : > { %s9081_s2 = sld [smem:[#allocation40_spill]] }
  0xde   : > { %s6496_s9 = scalar_lea.hbm %s9081_s2, 1024 }
  0xdf   : > { %p6497_p6 = scmp.ne.s32.totalorder %s9081_s2, %s6496_s9  ;;  %p6503_p11 = scmp.lt.u32.totalorder %s6496_s9, %s9081_s2 }
  0xe1   : > { %p6499_p9 = pnand %p6497_p6, %p6936_p8 }
  0xe3   : > { %p6500_p4 = pneg %p6499_p9 }
  0xe5   : > { %p6505_p2 = pnand %p6503_p11, %p6500_p4 }
  0xe7   : > { %6508 = shalt.err (!%p6505_p2)
}
  0xe8   : > { %s6509_s3 = scalar_lea.vmem %s375_s11, 1024  ;;  %p6517_p5 = scmp.lt.s32.totalorder %s375_s11, %s375_s11 }
  0xe9   : > { %p6510_p12 = scmp.ne.s32.totalorder %s375_s11, %s6509_s3  ;;  %p6518_p7 = scmp.lt.s32.totalorder %s6509_s3, %s6509_s3 }
  0xeb   : > { %p6512_p13 = pnand %p6510_p12, %p6936_p8  ;;  %p6519_p10 = por %p6518_p7, %p6517_p5 }
  0xed   : > { %p6513_p3 = pneg %p6512_p13 }
  0xef   : > { %p6520_p1 = pnand %p6519_p10, %p6513_p3 }
  0xf1   : > { %6523 = shalt.err (!%p6520_p1)
}
  0xf2   : > { %p9082_p6 = scmp.ne.s32.totalorder %s9066_s18, 0  ;;  %s6524_s24 = scalar_lea.hbm %s9019_s4, 256 }
  0xf3   : > { %p6525_p9 = scmp.ne.s32.totalorder %s9019_s4, %s6524_s24  ;;  %p6531_p11 = scmp.lt.u32.totalorder %s6524_s24, %s9019_s4 }
  0xf4   : > { %6135 = dma.hbm_to_vmem [thread:$0]  (!%p9082_p6), %s9081_s2, 1024, %s375_s11, [#allocation7], %s9048_s7, %s9048_s7, %s9050_s13  }
  0xf5   : > { %p6527_p1 = pnand %p6525_p9, %p6936_p8 }
  0xf7   : > { %p6528_p4 = pneg %p6527_p1 }
  0xf9   : > { %p6533_p2 = pnand %p6531_p11, %p6528_p4 }
  0xfb   : > { %6536 = shalt.err (!%p6533_p2)
}
  0xfc   : > { %s6537_s9 = scalar_lea.vmem %s399_s1, 256  ;;  %p6545_p5 = scmp.lt.s32.totalorder %s399_s1, %s399_s1 }
  0xfd   : > { %p6538_p12 = scmp.ne.s32.totalorder %s399_s1, %s6537_s9  ;;  %p6546_p7 = scmp.lt.s32.totalorder %s6537_s9, %s6537_s9 }
  0xff   : > { %p6540_p13 = pnand %p6538_p12, %p6936_p8  ;;  %p6547_p10 = por %p6546_p7, %p6545_p5 }
 0x101   : > { %p6541_p3 = pneg %p6540_p13 }
 0x103   : > { %p6548_p0 = pnand %p6547_p10, %p6541_p3 }
 0x105   : > { %6551 = shalt.err (!%p6548_p0)
}
 0x106   : > { %s9083_s11 = smov 8   ;;  %s9084_s3 = smov 128  }
 0x107   : > { %6141 = dma.hbm_to_vmem [thread:$0]  (!%p9082_p6), %s9019_s4, 256, %s399_s1, [#allocation10], %s9084_s3, %s9084_s3, %s9083_s11  }
 0x108   : > { %s6802_s22 = smov [#allocation14]   ;;  %s6803_s24 = smov [#allocation17]  }
 0x109   : > { %s422_s30 = sshll.u32 %s6802_s22, 4  ;;  %s446_s20 = sshll.u32 %s6803_s24, 4  ;;  %s423_s30 = int_to_ptr.vmem [resolvable:$true] %s422_s30  ;;  %s447_s20 = int_to_ptr.vmem [resolvable:$true] %s446_s20 }
 0x10a   : > { %s6552_s23 = scalar_lea.hbm %s9021_s6, 1024 }
 0x10b   : > { %p6553_p0 = scmp.ne.s32.totalorder %s9021_s6, %s6552_s23  ;;  %p6559_p4 = scmp.lt.u32.totalorder %s6552_s23, %s9021_s6 }
 0x10d   : > { %p6555_p9 = pnand %p6553_p0, %p6936_p8 }
 0x10f   : > { %p6556_p1 = pneg %p6555_p9 }
 0x111   : > { %p6561_p11 = pnand %p6559_p4, %p6556_p1 }
 0x113   : > { %6564 = shalt.err (!%p6561_p11)
}
 0x114   : > { %s6565_s1 = scalar_lea.vmem %s423_s30, 1024  ;;  %p6573_p3 = scmp.lt.s32.totalorder %s423_s30, %s423_s30 }
 0x115   : > { %p6566_p2 = scmp.ne.s32.totalorder %s423_s30, %s6565_s1  ;;  %p6574_p5 = scmp.lt.s32.totalorder %s6565_s1, %s6565_s1 }
 0x117   : > { %p6568_p12 = pnand %p6566_p2, %p6936_p8  ;;  %p6575_p7 = por %p6574_p5, %p6573_p3 }
 0x119   : > { %p6569_p13 = pneg %p6568_p12 }
 0x11b   : > { %p6576_p10 = pnand %p6575_p7, %p6569_p13 }
 0x11d   : > { %6579 = shalt.err (!%p6576_p10)
}
 0x11e   : > { %s9085_s7 = smov 4   ;;  %s9086_s11 = smov 64  }
 0x11f   : > { %6147 = dma.hbm_to_vmem [thread:$0]  (!%p9082_p6), %s9021_s6, 1024, %s423_s30, [#allocation13], %s9086_s11, %s9086_s11, %s9085_s7  }
 0x120   : > { %s6580_s24 = scalar_lea.hbm %s9023_s8, 1024 }
 0x121   : > { %p6581_p0 = scmp.ne.s32.totalorder %s9023_s8, %s6580_s24  ;;  %p6587_p4 = scmp.lt.u32.totalorder %s6580_s24, %s9023_s8 }
 0x123   : > { %p6583_p9 = pnand %p6581_p0, %p6936_p8 }
 0x125   : > { %p6584_p1 = pneg %p6583_p9 }
 0x127   : > { %p6589_p11 = pnand %p6587_p4, %p6584_p1 }
 0x129   : > { %6592 = shalt.err (!%p6589_p11)
}
 0x12a   : > { %s6593_s0 = scalar_lea.vmem %s447_s20, 1024  ;;  %p6601_p3 = scmp.lt.s32.totalorder %s447_s20, %s447_s20 }
 0x12b   : > { %p6594_p2 = scmp.ne.s32.totalorder %s447_s20, %s6593_s0  ;;  %p6602_p5 = scmp.lt.s32.totalorder %s6593_s0, %s6593_s0 }
 0x12d   : > { %p6596_p12 = pnand %p6594_p2, %p6936_p8  ;;  %p6603_p7 = por %p6602_p5, %p6601_p3 }
 0x12f   : > { %p6597_p13 = pneg %p6596_p12 }
 0x131   : > { %p6604_p10 = pnand %p6603_p7, %p6597_p13 }
 0x133   : > { %6607 = shalt.err (!%p6604_p10)
}
 0x134   : > { %6153 = dma.hbm_to_vmem [thread:$0]  (!%p9082_p6), %s9023_s8, 1024, %s447_s20, [#allocation16], %s9086_s11, %s9086_s11, %s9085_s7  }
 0x135   : > { %s6804_s13 = smov [#allocation20]   ;;  %s6805_s27 = smov [#allocation21]  }
 0x136   : > { %s470_s3 = sshll.u32 %s6804_s13, 4  ;;  %s484_s22 = sshll.u32 %s6805_s27, 4  ;;  %s471_s3 = int_to_ptr.vmem [resolvable:$true] %s470_s3  ;;  %s485_s22 = int_to_ptr.vmem [resolvable:$true] %s484_s22 }
 0x137   : > { %s9087_s10 = sld [smem:[#allocation45_spill]] }
 0x13d   : > { %s6608_s23 = scalar_lea.hbm %s9087_s10, 1024 }
 0x13e   : > { %p6609_p0 = scmp.ne.s32.totalorder %s9087_s10, %s6608_s23  ;;  %p6615_p4 = scmp.lt.u32.totalorder %s6608_s23, %s9087_s10 }
 0x140   : > { %p6611_p9 = pnand %p6609_p0, %p6936_p8 }
 0x142   : > { %p6612_p1 = pneg %p6611_p9 }
 0x144   : > { %p6617_p11 = pnand %p6615_p4, %p6612_p1 }
 0x146   : > { %6620 = shalt.err (!%p6617_p11)
}
 0x147   : > { %s6621_s20 = scalar_lea.vmem %s471_s3, 1024  ;;  %p6629_p3 = scmp.lt.s32.totalorder %s471_s3, %s471_s3 }
 0x148   : > { %p6622_p2 = scmp.ne.s32.totalorder %s471_s3, %s6621_s20  ;;  %p6630_p5 = scmp.lt.s32.totalorder %s6621_s20, %s6621_s20 }
 0x14a   : > { %p6624_p12 = pnand %p6622_p2, %p6936_p8  ;;  %p6631_p7 = por %p6630_p5, %p6629_p3 }
 0x14c   : > { %p6625_p13 = pneg %p6624_p12 }
 0x14e   : > { %p6632_p10 = pnand %p6631_p7, %p6625_p13 }
 0x150   : > { %6635 = shalt.err (!%p6632_p10)
}
 0x151   : > { %6159 = dma.hbm_to_vmem [thread:$0]  (!%p9082_p6), %s9087_s10, 1024, %s471_s3, [#allocation19], %s9086_s11, %s9086_s11, %s9085_s7  }
 0x152   : > { %s4966_s13 = sshll.u32 %s6788_s28, 11  ;;  %s9088_s21 = sld [smem:[#allocation46_spill]] }
 0x158   : > { %s6636_s23 = scalar_lea.hbm %s9088_s21, 16 }
 0x159   : > { %p6637_p0 = scmp.ne.s32.totalorder %s9088_s21, %s6636_s23  ;;  %p6643_p4 = scmp.lt.u32.totalorder %s6636_s23, %s9088_s21 }
 0x15b   : > { %p6639_p9 = pnand %p6637_p0, %p6936_p8 }
 0x15d   : > { %p6640_p1 = pneg %p6639_p9 }
 0x15f   : > { %p6645_p11 = pnand %p6643_p4, %p6640_p1 }
 0x161   : > { %6648 = shalt.err (!%p6645_p11)
}
 0x162   : > { %s6649_s3 = scalar_lea.vmem %s485_s22, 16  ;;  %s6656_s2 = scalar_lea.vmem %s485_s22, 32 }
 0x163   : > { %p6650_p2 = scmp.ne.s32.totalorder %s485_s22, %s6649_s3  ;;  %p6657_p3 = scmp.lt.s32.totalorder %s485_s22, %s485_s22 }
 0x164   : > { %p6658_p5 = scmp.lt.s32.totalorder %s6656_s2, %s6649_s3 }
 0x165   : > { %p6652_p12 = pnand %p6650_p2, %p6936_p8 }
 0x166   : > { %p6659_p7 = por %p6658_p5, %p6657_p3 }
 0x167   : > { %p6653_p13 = pneg %p6652_p12 }
 0x169   : > { %p6660_p10 = pnand %p6659_p7, %p6653_p13 }
 0x16b   : > { %6663 = shalt.err (!%p6660_p10)
}
 0x16c   : > { %6162 = dma.hbm_to_vmem [thread:$0]  (!%p9082_p6), %s9088_s21, 16, %s485_s22, [#allocation22]  }
 0x16d   : > { %s9089_s9 = sld [smem:[#allocation47_spill]]  ;;  %s520_s0 = scalar_lea.vmem [#allocation23], %s7082_s19 }
 0x16e   : > { %s527_s30 = sshll.u32 %s520_s0, 4  ;;  %p9090_p0 = scmp.ne.s32.totalorder %s9079_s15, 0  ;;  %s7252_s30 = int_to_ptr.vmem [resolvable:$true] %s527_s30 }
 0x170   : > { %p9091_p9 = pneg %p9090_p0 }
 0x173   : > { %s7249_s16 = scalar_lea.hbm %s9089_s9, %s4966_s13  ;;  %s6669_s3 = scalar_lea.hbm %s9089_s9, 4096 }
 0x174   : > { %s6664_s18 = scalar_lea.hbm %s7249_s16, 2048  ;;  %p6670_p6 = scmp.lt.u32.totalorder %s7249_s16, %s9089_s9 }
 0x175   : > { %p6665_p8 = scmp.ne.s32.totalorder %s7249_s16, %s6664_s18  ;;  %p6671_p11 = scmp.lt.u32.totalorder %s6669_s3, %s6664_s18 }
 0x176   : > { %p6673_p12 = scmp.lt.u32.totalorder %s6664_s18, %s7249_s16 }
 0x177   : > { %p6667_p1 = pnand %p6665_p8, %p9091_p9  ;;  %p6672_p2 = por %p6671_p11, %p6670_p6 }
 0x179   : > { %p6668_p4 = pneg %p6667_p1  ;;  %p6674_p13 = por %p6673_p12, %p6672_p2 }
 0x17b   : > { %p6675_p3 = pnand %p6674_p13, %p6668_p4 }
 0x17d   : > { %6678 = shalt.err (!%p6675_p3)
}
 0x17e   : > { %s6679_s19 = scalar_lea.vmem %s7252_s30, 2048  ;;  %p9092_p7 = pmov %p9091_p9 }
 0x17f   : > { %p6680_p5 = scmp.ne.s32.totalorder %s7252_s30, %s6679_s19  ;;  %s6806_s1 = smov [#allocation23]  }
 0x180   : > { %s6684_s27 = sshll.u32 %s6806_s1, 4  ;;  %s6685_s27 = int_to_ptr.vmem [resolvable:$false] %s6684_s27 }
 0x181   : > { %p6682_p10 = pnand %p6680_p5, %p9092_p7  ;;  %s6686_s24 = scalar_lea.vmem %s6685_s27, 4096 }
 0x182   : > { %p6687_p9 = scmp.lt.s32.totalorder %s7252_s30, %s6685_s27  ;;  %p6688_p1 = scmp.lt.s32.totalorder %s6686_s24, %s6679_s19 }
 0x183   : > { %p6683_p8 = pneg %p6682_p10 }
 0x184   : > { %p6689_p6 = por %p6688_p1, %p6687_p9 }
 0x186   : > { %p6690_p11 = pnand %p6689_p6, %p6683_p8 }
 0x188   : > { %6693 = shalt.err (!%p6690_p11)
}
 0x189   : > { %6169 = dma.hbm_to_vmem [thread:$0]  (!%p9090_p0), %s7249_s16, 2048, %s7252_s30, %s7091_s5, %s9086_s11, %s9086_s11, %s9085_s7  }
 0x18a   : > { %s9093_s23 = sld [smem:[#allocation35_spill]] }
 0x190   : > { %p9094_p4 = scmp.ne.s32.totalorder %s9093_s23, 0 }
 0x191   : > { %s541_s0 = sand.u32 (!%p9094_p4), 1, %s6904_s14   ;;  %s7285_s18 = sand.u32 (!%p9094_p4), 1, %s6780_s26  }
 0x192   : > { %539 = sbr.rel (%p9094_p4) target bundleno = 1691 (0x69b), region = 72  ;;  %s542_s20 = scalar_lea.sflag (!%p9094_p4), [#allocation4], %s541_s0 }
 0x193   : > { %s6078_s22 = smul.u32 (!%p9094_p4), 288, %s7285_s18  ;;  %p9095_p2 = scmp.ne.s32.totalorder (!%p9094_p4), %s9076_s29, 0 }
 0x195   : > { %s7288_s15 = scalar_lea.vmem (!%p9094_p4), [#allocation3], %s6078_s22 }
 0x199   : > { %6739 = dma.done.wait (%p9095_p2), %s542_s20, 4608  }
 0x19a   : > { %6741 = vsyncadd (%p9095_p2), %s542_s20, 4294962688  ;;  %p9096_p0 = scmp.eq.s32.totalorder %s6904_s14, 0 }
 0x19c   : > { %6743 = dma.done.wait (%p9096_p0), [#allocation7], 10240   ;;  %p9097_p12 = pmov %p9096_p0 }
 0x19d   : > { %p9098_p13 = pmov %p9096_p0 }
 0x19e   : > { %6745 = vsyncadd (%p9097_p12), [#allocation7], 4294957056 }
 0x19f   : > { %6747 = dma.done.wait (%p9098_p13), [#allocation10], 272   ;;  %p9099_p3 = pmov %p9096_p0 }
 0x1a0   : > { %p9100_p5 = pmov %p9096_p0 }
 0x1a1   : > { %6749 = vsyncadd (%p9099_p3), [#allocation10], 4294967024 }
 0x1a2   : > { %6751 = dma.done.wait (%p9100_p5), [#allocation13], 1040   ;;  %p9101_p7 = pmov %p9096_p0 }
 0x1a3   : > { %p9102_p10 = pmov %p9096_p0 }
 0x1a4   : > { %6753 = vsyncadd (%p9101_p7), [#allocation13], 4294966256 }
 0x1a5   : > { %6755 = dma.done.wait (%p9102_p10), [#allocation16], 1040   ;;  %p9103_p8 = pmov %p9096_p0 }
 0x1a6   : > { %p9104_p9 = pmov %p9096_p0 }
 0x1a7   : > { %6757 = vsyncadd (%p9103_p8), [#allocation16], 4294966256 }
 0x1a8   : > { %6759 = dma.done.wait (%p9104_p9), [#allocation19], 1040   ;;  %p9105_p1 = pmov %p9096_p0 }
 0x1a9   : > { %p9106_p6 = pmov %p9096_p0 }
 0x1aa   : > { %6761 = vsyncadd (%p9105_p1), [#allocation19], 4294966256 }
 0x1ab   : > { %6763 = dma.done.wait (%p9106_p6), [#allocation22], 16   ;;  %p9107_p11 = pmov %p9096_p0 }
 0x1ac   : > { %s4783_s5 = sshll.u32 %s7285_s18, 7 }
 0x1ad   : > { %6765 = vsyncadd (%p9107_p11), [#allocation22], 4294967280  ;;  %s7321_s7 = scalar_lea.vmem [#allocation23], %s4783_s5 }
 0x1ae   : > { %6767 = dma.done.wait (%p9095_p2), %s542_s20, 2048  }
 0x1af   : > { %6769 = vsyncadd (%p9095_p2), %s542_s20, 4294965248  ;;  %v6807_v0 = vmov 0   ;;  %v1401_v1 = vld [vmem:[#allocation6 + $0x10] sm:$0xff]  ;;  %v1399_v2 = vld [vmem:[#allocation6] sm:$0xff]  ;;  %vm6809_vm2 = vmmov 0   ;;  %s5071_s29 = sshll.u32 %s6904_s14, 11 }
 0x1b0   : > { %6251 = vset.pattern.permute.xlu1 %v6807_v0  ;;  %6250 = vset.pattern.permute.xlu0 %v6807_v0  ;;  %v6252_v3 = vld [vmem:[#allocation8] sm:$0xff]   ;;  %v1402_v4 = vld [vmem:[#allocation6 + $0x18] sm:$0xff]  ;;  %v1400_v5 = vld [vmem:[#allocation6 + $0x8] sm:$0xff]  ;;  %s8947_s11 = scalar_lea.vmem [#allocation24], %s4783_s5  ;;  %s9135_s3 = sld [smem:[#allocation48_spill]] }
 0x1b1   : > { %1483 = vperm.xlu1 %6251, %v1401_v1   ;;  %1473 = vperm.xlu0 %6250, %v1399_v2   ;;  %v6253_v6 = vld [vmem:[#allocation8 + $0x8] sm:$0xff]   ;;  %v1403_v8 = vld [vmem:[#allocation6 + $0x20] sm:$0xff]  ;;  %v6254_v9 = vld [vmem:[#allocation8 + $0x10] sm:$0xff]   ;;  %s4555_s16 = sshll.u32 %s8947_s11, 4  ;;  %s4542_s2 = scalar_lea.sflag [#allocation5], %s7285_s18  ;;  %s8959_s16 = int_to_ptr.vmem [resolvable:$true] %s4555_s16 }
 0x1b2   : > { %5900 = vmatprep.subr.bf16.mxu0 %v6252_v3  ;;  %v1404_v7 = vld [vmem:[#allocation6 + $0x28] sm:$0xff]  ;;  %v1406_v10 = vld [vmem:[#allocation6 + $0x38] sm:$0xff]  ;;  %v1405_v11 = vld [vmem:[#allocation6 + $0x30] sm:$0xff]  ;;  %s6694_s19 = scalar_lea.vmem %s8959_s16, 2048  ;;  %p9136_p2 = scmp.ne.s32.totalorder %s9077_s17, 0 }
 0x1b3   : > { %5901 = vmatpush3.bf16.msra.mxu0 %v6252_v3  ;;  %v6255_v12 = vld [vmem:[#allocation8 + $0x18] sm:$0xff]   ;;  %v1408_v13 = vld [vmem:[#allocation6 + $0x48] sm:$0xff]  ;;  %v1407_v14 = vld [vmem:[#allocation6 + $0x40] sm:$0xff]  ;;  %p6695_p4 = scmp.ne.s32.totalorder %s8959_s16, %s6694_s19  ;;  %s6810_s1 = smov [#allocation24]  }
 0x1b4   : > { %5902 = vmatprep.subr.bf16.mxu0 %v6253_v6  ;;  %v6256_v15 = vld [vmem:[#allocation8 + $0x20] sm:$0xff]   ;;  %v1410_v17 = vld [vmem:[#allocation6 + $0x58] sm:$0xff]  ;;  %v1409_v18 = vld [vmem:[#allocation6 + $0x50] sm:$0xff]  ;;  %s6698_s27 = sshll.u32 %s6810_s1, 4  ;;  %s6699_s27 = int_to_ptr.vmem [resolvable:$false] %s6698_s27 }
 0x1b5   : > { %1488 = vperm.xlu1 %6251, %v1402_v4   ;;  %1478 = vperm.xlu0 %6250, %v1400_v5   ;;  %v6260_v16 = vld [vmem:[%s7288_s15] sm:$0xff]   ;;  %v6257_v19 = vld [vmem:[#allocation8 + $0x28] sm:$0xff]   ;;  %v6258_v22 = vld [vmem:[#allocation8 + $0x30] sm:$0xff]   ;;  %p6696_p0 = pnand %p6695_p4, %p9136_p2  ;;  %s6700_s24 = scalar_lea.vmem %s6699_s27, 4096 }
 0x1b6   : > { %5916 = vmatprep.mubr.bf16.mxu0 %v6260_v16  ;;  %v1412_v20 = vld [vmem:[#allocation6 + $0x68] sm:$0xff]  ;;  %v1411_v21 = vld [vmem:[#allocation6 + $0x60] sm:$0xff]  ;;  %v1414_v23 = vld [vmem:[#allocation6 + $0x78] sm:$0xff]  ;;  %s8957_s13 = scalar_lea.hbm %s9135_s3, %s5071_s29  ;;  %p6701_p13 = scmp.lt.s32.totalorder %s8959_s16, %s6699_s27 }
 0x1b7   : > { %5903 = vmatpush3.bf16.msra.mxu0 %v6253_v6  ;;  %v1413_v24 = vld [vmem:[#allocation6 + $0x70] sm:$0xff]  ;;  %v6259_v25 = vld [vmem:[#allocation8 + $0x38] sm:$0xff]   ;;  %v1416_v26 = vld [vmem:[#allocation6 + $0x88] sm:$0xff]  ;;  %p6697_p12 = pneg %p6696_p0  ;;  %p6702_p3 = scmp.lt.s32.totalorder %s6700_s24, %s6694_s19 }
 0x1b8   : > { %5904 = vmatprep.subr.bf16.mxu0 %v6254_v9  ;;  %v1415_v27 = vld [vmem:[#allocation6 + $0x80] sm:$0xff]  ;;  %v6261_v28 = vld [vmem:[%s7288_s15 + $0x8] sm:$0xff]   ;;  %v6262_v29 = vld [vmem:[%s7288_s15 + $0x10] sm:$0xff]  }
 0x1b9   : > { %1498 = vperm.xlu1 %6251, %v1404_v7   ;;  %1493 = vperm.xlu0 %6250, %v1403_v8   ;;  %v1418_v30 = vld [vmem:[#allocation6 + $0x98] sm:$0xff]  ;;  %v1417_v31 = vld [vmem:[#allocation6 + $0x90] sm:$0xff]  ;;  %v1420_v32 = vld [vmem:[#allocation6 + $0xa8] sm:$0xff]  ;;  %p6703_p5 = por %p6702_p3, %p6701_p13 }
 0x1ba   : > { %v1419_v33 = vld [vmem:[#allocation6 + $0xa0] sm:$0xff]  ;;  %v6263_v34 = vld [vmem:[%s7288_s15 + $0x18] sm:$0xff]   ;;  %v1421_v37 = vld [vmem:[#allocation6 + $0xb0] sm:$0xff] }
 0x1bb   : > { %5905 = vmatpush3.bf16.msra.mxu0 %v6254_v9  ;;  %v6264_v35 = vld [vmem:[%s7288_s15 + $0x20] sm:$0xff]   ;;  %v1422_v36 = vld [vmem:[#allocation6 + $0xb8] sm:$0xff]  ;;  %v1424_v38 = vld [vmem:[#allocation6 + $0xc8] sm:$0xff]  ;;  %p6704_p7 = pnand %p6703_p5, %p6697_p12 }
 0x1bc   : > { %5906 = vmatprep.subr.bf16.mxu0 %v6255_v12  ;;  %v1423_v39 = vld [vmem:[#allocation6 + $0xc0] sm:$0xff]  ;;  %v6265_v40 = vld [vmem:[%s7288_s15 + $0x28] sm:$0xff]   ;;  %v6266_v41 = vld [vmem:[%s7288_s15 + $0x30] sm:$0xff]  }
 0x1bd   : > { %1508 = vperm.xlu1 %6251, %v1406_v10   ;;  %1503 = vperm.xlu0 %6250, %v1405_v11   ;;  %v1426_v42 = vld [vmem:[#allocation6 + $0xd8] sm:$0xff]  ;;  %v1425_v43 = vld [vmem:[#allocation6 + $0xd0] sm:$0xff]  ;;  %v1428_v44 = vld [vmem:[#allocation6 + $0xe8] sm:$0xff] }
 0x1be   : > { %v1427_v45 = vld [vmem:[#allocation6 + $0xe0] sm:$0xff]  ;;  %v6267_v46 = vld [vmem:[%s7288_s15 + $0x38] sm:$0xff]   ;;  %v1429_v49 = vld [vmem:[#allocation6 + $0xf0] sm:$0xff] }
 0x1bf   : > { %5907 = vmatpush3.bf16.msra.mxu0 %v6255_v12  ;;  %v6268_v47 = vld [vmem:[%s7288_s15 + $0x40] sm:$0xff]   ;;  %v1430_v48 = vld [vmem:[#allocation6 + $0xf8] sm:$0xff]  ;;  %v1432_v50 = vld [vmem:[#allocation6 + $0x108] sm:$0xff] }
 0x1c0   : > { %5908 = vmatprep.subr.bf16.mxu0 %v6256_v15  ;;  %v1431_v51 = vld [vmem:[#allocation6 + $0x100] sm:$0xff]  ;;  %v6269_v52 = vld [vmem:[%s7288_s15 + $0x48] sm:$0xff]   ;;  %v6270_v53 = vld [vmem:[%s7288_s15 + $0x50] sm:$0xff]  }
 0x1c1   : > { %1518 = vperm.xlu1 %6251, %v1408_v13   ;;  %1513 = vperm.xlu0 %6250, %v1407_v14   ;;  %v1434_v54 = vld [vmem:[#allocation6 + $0x118] sm:$0xff]  ;;  %v1433_v55 = vld [vmem:[#allocation6 + $0x110] sm:$0xff]  ;;  %v1436_v56 = vld [vmem:[#allocation6 + $0x128] sm:$0xff] }
 0x1c2   : > { %v1435_v57 = vld [vmem:[#allocation6 + $0x120] sm:$0xff]  ;;  %v6271_v58 = vld [vmem:[%s7288_s15 + $0x58] sm:$0xff]   ;;  %v1437_v61 = vld [vmem:[#allocation6 + $0x130] sm:$0xff] }
 0x1c3   : > { %5909 = vmatpush3.bf16.msra.mxu0 %v6256_v15  ;;  %v6272_v59 = vld [vmem:[%s7288_s15 + $0x60] sm:$0xff]   ;;  %v1438_v60 = vld [vmem:[#allocation6 + $0x138] sm:$0xff]  ;;  %v1440_v62 = vld [vmem:[#allocation6 + $0x148] sm:$0xff] }
 0x1c4   : > { %5910 = vmatprep.subr.bf16.mxu0 %v6257_v19  ;;  %v1439_v63 = vld [vmem:[#allocation6 + $0x140] sm:$0xff]  ;;  %v6273_v0 = vld [vmem:[%s7288_s15 + $0x68] sm:$0xff]   ;;  %v6274_v1 = vld [vmem:[%s7288_s15 + $0x70] sm:$0xff]  }
 0x1c5   : > { %1528 = vperm.xlu1 %6251, %v1410_v17   ;;  %1523 = vperm.xlu0 %6250, %v1409_v18   ;;  %v1442_v2 = vld [vmem:[#allocation6 + $0x158] sm:$0xff]  ;;  %v1441_v3 = vld [vmem:[#allocation6 + $0x150] sm:$0xff]  ;;  %v1444_v4 = vld [vmem:[#allocation6 + $0x168] sm:$0xff] }
 0x1c6   : > { %v1443_v5 = vld [vmem:[#allocation6 + $0x160] sm:$0xff]  ;;  %v6275_v6 = vld [vmem:[%s7288_s15 + $0x78] sm:$0xff]   ;;  %v1445_v9 = vld [vmem:[#allocation6 + $0x170] sm:$0xff] }
 0x1c7   : > { %5911 = vmatpush3.bf16.msra.mxu0 %v6257_v19  ;;  %v6276_v7 = vld [vmem:[%s7288_s15 + $0x80] sm:$0xff]   ;;  %v1446_v8 = vld [vmem:[#allocation6 + $0x178] sm:$0xff]  ;;  %v1448_v10 = vld [vmem:[#allocation6 + $0x188] sm:$0xff] }
 0x1c8   : > { %5912 = vmatprep.subr.bf16.mxu0 %v6258_v22  ;;  %v1447_v11 = vld [vmem:[#allocation6 + $0x180] sm:$0xff]  ;;  %v6277_v12 = vld [vmem:[%s7288_s15 + $0x88] sm:$0xff]   ;;  %v6278_v13 = vld [vmem:[%s7288_s15 + $0x90] sm:$0xff]  }
 0x1c9   : > { %1538 = vperm.xlu1 %6251, %v1412_v20   ;;  %1533 = vperm.xlu0 %6250, %v1411_v21   ;;  %v1450_v14 = vld [vmem:[#allocation6 + $0x198] sm:$0xff]  ;;  %v1449_v15 = vld [vmem:[#allocation6 + $0x190] sm:$0xff]  ;;  %v1452_v16 = vld [vmem:[#allocation6 + $0x1a8] sm:$0xff] }
 0x1ca   : > { %v1451_v17 = vld [vmem:[#allocation6 + $0x1a0] sm:$0xff]  ;;  %v6279_v18 = vld [vmem:[%s7288_s15 + $0x98] sm:$0xff]   ;;  %v1453_v21 = vld [vmem:[#allocation6 + $0x1b0] sm:$0xff] }
 0x1cb   : > { %5913 = vmatpush3.bf16.msra.mxu0 %v6258_v22  ;;  %v6280_v19 = vld [vmem:[%s7288_s15 + $0xa0] sm:$0xff]   ;;  %v1454_v20 = vld [vmem:[#allocation6 + $0x1b8] sm:$0xff]  ;;  %v1456_v22 = vld [vmem:[#allocation6 + $0x1c8] sm:$0xff] }
 0x1cc   : > { %5914 = vmatprep.subr.bf16.mxu0 %v6259_v25 }
 0x1cd   : > { %1548 = vperm.xlu1 %6251, %v1414_v23   ;;  %1543 = vperm.xlu0 %6250, %v1413_v24   ;;  %v1455_v23 = vld [vmem:[#allocation6 + $0x1c0] sm:$0xff]  ;;  %v6281_v24 = vld [vmem:[%s7288_s15 + $0xa8] sm:$0xff]  }
 0x1cf   : > { %5915 = vmatpush3.bf16.msra.mxu0 %v6259_v25  ;;  %v6282_v25 = vld [vmem:[%s7288_s15 + $0xb0] sm:$0xff]  }
 0x1d1   : > { %1558 = vperm.xlu1 %6251, %v1416_v26   ;;  %1553 = vperm.xlu0 %6250, %v1415_v27   ;;  %v1458_v26 = vld [vmem:[#allocation6 + $0x1d8] sm:$0xff]  ;;  %v1457_v27 = vld [vmem:[#allocation6 + $0x1d0] sm:$0xff] }
 0x1d2   : > { %5917 = vmatmul.mubr.bf16.vlgmr.msra.gmra.mrb[0].mxu0 %v6261_v28  ;;  %v1460_v28 = vld [vmem:[#allocation6 + $0x1e8] sm:$0xff] }
 0x1d3   : > { %5920 = vmatprep.mubr.bf16.mxu0 %v6262_v29  ;;  %v1459_v29 = vld [vmem:[#allocation6 + $0x1e0] sm:$0xff] }
 0x1d5   : > { %1568 = vperm.xlu1 %6251, %v1418_v30   ;;  %1563 = vperm.xlu0 %6250, %v1417_v31   ;;  %v6283_v30 = vld [vmem:[%s7288_s15 + $0xb8] sm:$0xff]   ;;  %v6284_v31 = vld [vmem:[%s7288_s15 + $0xc0] sm:$0xff]  }
 0x1d9   : > { %1578 = vperm.xlu1 %6251, %v1420_v32   ;;  %1573 = vperm.xlu0 %6250, %v1419_v33   ;;  %v1462_v32 = vld [vmem:[#allocation6 + $0x1f8] sm:$0xff]  ;;  %v1461_v33 = vld [vmem:[#allocation6 + $0x1f0] sm:$0xff] }
 0x1da   : > { %5921 = vmatmul.mubr.bf16.gmra.mrb[4].mxu0 %v6263_v34  ;;  %v1464_v34 = vld [vmem:[#allocation6 + $0x208] sm:$0xff] }
 0x1db   : > { %5924 = vmatprep.mubr.bf16.mxu0 %v6264_v35  ;;  %v1463_v35 = vld [vmem:[#allocation6 + $0x200] sm:$0xff] }
 0x1dd   : > { %1588 = vperm.xlu1 %6251, %v1422_v36   ;;  %1583 = vperm.xlu0 %6250, %v1421_v37   ;;  %v6285_v36 = vld [vmem:[%s7288_s15 + $0xc8] sm:$0xff]   ;;  %v6286_v37 = vld [vmem:[%s7288_s15 + $0xd0] sm:$0xff]  }
 0x1e1   : > { %1598 = vperm.xlu1 %6251, %v1424_v38   ;;  %1593 = vperm.xlu0 %6250, %v1423_v39   ;;  %v1466_v38 = vld [vmem:[#allocation6 + $0x218] sm:$0xff]  ;;  %v1465_v39 = vld [vmem:[#allocation6 + $0x210] sm:$0xff] }
 0x1e2   : > { %5925 = vmatmul.mubr.bf16.gmra.mrb[8].mxu0 %v6265_v40  ;;  %v1468_v40 = vld [vmem:[#allocation6 + $0x228] sm:$0xff] }
 0x1e3   : > { %5928 = vmatprep.mubr.bf16.mxu0 %v6266_v41  ;;  %v1467_v41 = vld [vmem:[#allocation6 + $0x220] sm:$0xff] }
 0x1e5   : > { %1608 = vperm.xlu1 %6251, %v1426_v42   ;;  %1603 = vperm.xlu0 %6250, %v1425_v43   ;;  %v6287_v42 = vld [vmem:[%s7288_s15 + $0xd8] sm:$0xff]   ;;  %v6288_v43 = vld [vmem:[%s7288_s15 + $0xe0] sm:$0xff]  }
 0x1e9   : > { %1618 = vperm.xlu1 %6251, %v1428_v44   ;;  %1613 = vperm.xlu0 %6250, %v1427_v45   ;;  %v6296_v44 = vld [vmem:[#allocation14] sm:$0xff]  }
 0x1ea   : > { %5929 = vmatmul.mubr.bf16.gmra.mrb[12].mxu0 %v6267_v46  ;;  %v1470_v45 = vld [vmem:[#allocation6 + $0x238] sm:$0xff]  ;;  %v1469_v46 = vld [vmem:[#allocation6 + $0x230] sm:$0xff]  ;;  %5988 = vmatprep.subr.bf16.mxu1 %v6296_v44 }
 0x1eb   : > { %5932 = vmatprep.mubr.bf16.mxu0 %v6268_v47  ;;  %5989 = vmatpush3.bf16.msra.mxu1 %v6296_v44  ;;  %v6297_v47 = vld [vmem:[#allocation14 + $0x8] sm:$0xff]  }
 0x1ec   : > { %5990 = vmatprep.subr.bf16.mxu1 %v6297_v47 }
 0x1ed   : > { %1628 = vperm.xlu1 %6251, %v1430_v48   ;;  %1623 = vperm.xlu0 %6250, %v1429_v49   ;;  %v6289_v48 = vld [vmem:[%s7288_s15 + $0xe8] sm:$0xff]   ;;  %v6290_v49 = vld [vmem:[%s7288_s15 + $0xf0] sm:$0xff]  }
 0x1ef   : > { %5991 = vmatpush3.bf16.msra.mxu1 %v6297_v47 }
 0x1f1   : > { %1638 = vperm.xlu1 %6251, %v1432_v50   ;;  %1633 = vperm.xlu0 %6250, %v1431_v51   ;;  %v6298_v50 = vld [vmem:[#allocation14 + $0x10] sm:$0xff]   ;;  %v6299_v51 = vld [vmem:[#allocation14 + $0x18] sm:$0xff]  }
 0x1f2   : > { %5933 = vmatmul.mubr.bf16.gmra.mrb[16].mxu0 %v6269_v52  ;;  %5992 = vmatprep.subr.bf16.mxu1 %v6298_v50  ;;  %v6291_v52 = vld [vmem:[%s7288_s15 + $0xf8] sm:$0xff]  }
 0x1f3   : > { %5936 = vmatprep.mubr.bf16.mxu0 %v6270_v53  ;;  %5993 = vmatpush3.bf16.msra.mxu1 %v6298_v50  ;;  %v6292_v53 = vld [vmem:[%s7288_s15 + $0x100] sm:$0xff]  }
 0x1f4   : > { %5994 = vmatprep.subr.bf16.mxu1 %v6299_v51 }
 0x1f5   : > { %1648 = vperm.xlu1 %6251, %v1434_v54   ;;  %1643 = vperm.xlu0 %6250, %v1433_v55   ;;  %v6300_v54 = vld [vmem:[#allocation14 + $0x20] sm:$0xff]   ;;  %v6301_v55 = vld [vmem:[#allocation14 + $0x28] sm:$0xff]  }
 0x1f7   : > { %5995 = vmatpush3.bf16.msra.mxu1 %v6299_v51 }
 0x1f8   : > { %5996 = vmatprep.subr.bf16.mxu1 %v6300_v54 }
 0x1f9   : > { %1658 = vperm.xlu1 %6251, %v1436_v56   ;;  %1653 = vperm.xlu0 %6250, %v1435_v57   ;;  %v6293_v56 = vld [vmem:[%s7288_s15 + $0x108] sm:$0xff]   ;;  %v6294_v57 = vld [vmem:[%s7288_s15 + $0x110] sm:$0xff]  }
 0x1fa   : > { %5937 = vmatmul.mubr.bf16.gmra.mrb[20].mxu0 %v6271_v58  ;;  %v6302_v58 = vld [vmem:[#allocation14 + $0x30] sm:$0xff]  }
 0x1fb   : > { %5940 = vmatprep.mubr.bf16.mxu0 %v6272_v59  ;;  %5997 = vmatpush3.bf16.msra.mxu1 %v6300_v54  ;;  %v6295_v59 = vld [vmem:[%s7288_s15 + $0x118] sm:$0xff]  }
 0x1fc   : > { %5998 = vmatprep.subr.bf16.mxu1 %v6301_v55 }
 0x1fd   : > { %1668 = vperm.xlu1 %6251, %v1438_v60   ;;  %1663 = vperm.xlu0 %6250, %v1437_v61   ;;  %v6303_v60 = vld [vmem:[#allocation14 + $0x38] sm:$0xff]  }
 0x1ff   : > { %5999 = vmatpush3.bf16.msra.mxu1 %v6301_v55 }
 0x200   : > { %6000 = vmatprep.subr.bf16.mxu1 %v6302_v58 }
 0x201   : > { %1678 = vperm.xlu1 %6251, %v1440_v62   ;;  %1673 = vperm.xlu0 %6250, %v1439_v63  }
 0x202   : > { %5941 = vmatmul.mubr.bf16.gmra.mrb[24].mxu0 %v6273_v0 }
 0x203   : > { %5944 = vmatprep.mubr.bf16.mxu0 %v6274_v1  ;;  %6001 = vmatpush3.bf16.msra.mxu1 %v6302_v58 }
 0x204   : > { %6002 = vmatprep.subr.bf16.mxu1 %v6303_v60 }
 0x205   : > { %1688 = vperm.xlu1 %6251, %v1442_v2   ;;  %1683 = vperm.xlu0 %6250, %v1441_v3  }
 0x207   : > { %6003 = vmatpush3.bf16.msra.mxu1 %v6303_v60 }
 0x209   : > { %1698 = vperm.xlu1 %6251, %v1444_v4   ;;  %1693 = vperm.xlu0 %6250, %v1443_v5  }
 0x20a   : > { %5945 = vmatmul.mubr.bf16.gmra.mrb[28].mxu0 %v6275_v6  ;;  %v2385_v6 = vlaneseq }
 0x20b   : > { %5948 = vmatprep.mubr.bf16.mxu0 %v6276_v7 }
 0x20d   : > { %1708 = vperm.xlu1 %6251, %v1446_v8   ;;  %1703 = vperm.xlu0 %6250, %v1445_v9   ;;  %v7375_v9 = vld [vmem:[#allocation9] ss:$0 sm:$0xff] }
 0x211   : > { %1718 = vperm.xlu1 %6251, %v1448_v10   ;;  %1713 = vperm.xlu0 %6250, %v1447_v11   ;;  %v7377_v10 = vshrl.u32 %v2385_v6, 7 }
 0x212   : > { %5949 = vmatmul.mubr.bf16.gmra.mrb[32].mxu0 %v6277_v12 }
 0x213   : > { %5952 = vmatprep.mubr.bf16.mxu0 %v6278_v13  ;;  %vm2503_vm0 = vcmp.lt.s32.totalorder %v7377_v10, 7  ;;  %vm2652_vm1 = vcmp.lt.s32.totalorder %v7377_v10, 6 }
 0x215   : > { %1728 = vperm.xlu1 %6251, %v1450_v14   ;;  %1723 = vperm.xlu0 %6250, %v1449_v15  }
 0x219   : > { %1738 = vperm.xlu1 %6251, %v1452_v16   ;;  %1733 = vperm.xlu0 %6250, %v1451_v17   ;;  %v2387_v17 = vsub.s32 0, %v7377_v10 }
 0x21a   : > { %5953 = vmatmul.mubr.bf16.gmra.mrb[36].mxu0 %v6279_v18 }
 0x21b   : > { %5956 = vmatprep.mubr.bf16.mxu0 %v6280_v19  ;;  %v2287_v19 = vld [vmem:[#allocation11] sm:$0xff] }
 0x21d   : > { %1748 = vperm.xlu1 %6251, %v1454_v20   ;;  %1743 = vperm.xlu0 %6250, %v1453_v21  }
 0x221   : > { %1758 = vperm.xlu1 %6251, %v1456_v22   ;;  %1753 = vperm.xlu0 %6250, %v1455_v23   ;;  %v2538_v23 = vsub.s32 1, %v7377_v10 }
 0x222   : > { %5957 = vmatmul.mubr.bf16.gmra.mrb[40].mxu0 %v6281_v24  ;;  %v2687_v24 = vsub.s32 2, %v7377_v10 }
 0x223   : > { %5960 = vmatprep.mubr.bf16.mxu0 %v6282_v25 }
 0x225   : > { %1768 = vperm.xlu1 %6251, %v1458_v26   ;;  %1763 = vperm.xlu0 %6250, %v1457_v27   ;;  %v2852_v27 = vsub.s32 3, %v7377_v10 }
 0x229   : > { %1778 = vperm.xlu1 %6251, %v1460_v28   ;;  %1773 = vperm.xlu0 %6250, %v1459_v29   ;;  %v7393_v29 = vrot.slane %v2287_v19, %v2387_v17 }
 0x22a   : > { %5961 = vmatmul.mubr.bf16.gmra.mrb[44].mxu0 %v6283_v30  ;;  %v3000_v30 = vsub.s32 4, %v7377_v10 }
 0x22b   : > { %5964 = vmatprep.mubr.bf16.mxu0 %v6284_v31  ;;  %v3148_v31 = vsub.s32 5, %v7377_v10 }
 0x22d   : > { %1788 = vperm.xlu1 %6251, %v1462_v32   ;;  %1783 = vperm.xlu0 %6250, %v1461_v33   ;;  %v7415_v50 = vrot.slane %v2287_v19, %v3148_v31 }
 0x230   : > { %v1474_v61 = vpop.permute.xlu0 %1473  ;;  %v1484_v62 = vpop.permute.xlu1 %1483 }
 0x231   : > { %1798 = vperm.xlu1 %6251, %v1464_v34   ;;  %1793 = vperm.xlu0 %6250, %v1463_v35   ;;  %v3313_v34 = vsub.s32 6, %v7377_v10  ;;  %v3461_v35 = vsub.s32 7, %v7377_v10 }
 0x232   : > { %5965 = vmatmul.mubr.bf16.gmra.mrb[48].mxu0 %v6285_v36 }
 0x233   : > { %5968 = vmatprep.mubr.bf16.mxu0 %v6286_v37  ;;  %v7417_v54 = vrot.slane %v2287_v19, %v3313_v34  ;;  %v7419_v55 = vrot.slane %v2287_v19, %v3461_v35 }
 0x234   : > { %v1479_v63 = vpop.permute.xlu0 %1478  ;;  %v1489_v0 = vpop.permute.xlu1 %1488 }
 0x235   : > { %1808 = vperm.xlu1 %6251, %v1466_v38   ;;  %1803 = vperm.xlu0 %6250, %v1465_v39  }
 0x238   : > { %v7363_v1 = vpop.permute.xlu0 %1493  ;;  %v7365_v2 = vpop.permute.xlu1 %1498 }
 0x239   : > { %1818 = vperm.xlu1 %6251, %v1468_v40   ;;  %1813 = vperm.xlu0 %6250, %v1467_v41   ;;  %v7404_v40 = vrot.slane %v2287_v19, %v2538_v23  ;;  %v7406_v41 = vrot.slane %v2287_v19, %v2687_v24 }
 0x23a   : > { %5969 = vmatmul.mubr.bf16.gmra.mrb[52].mxu0 %v6287_v42 }
 0x23b   : > { %5972 = vmatprep.mubr.bf16.mxu0 %v6288_v43 }
 0x23c   : > { %v1504_v3 = vpop.permute.xlu0 %1503  ;;  %v7367_v4 = vpop.permute.xlu1 %1508 }
 0x23d   : > { %1828 = vperm.xlu1 %6251, %v1470_v45   ;;  %1823 = vperm.xlu0 %6250, %v1469_v46   ;;  %v7410_v46 = vrot.slane %v2287_v19, %v2852_v27 }
 0x240   : > { %v7369_v5 = vpop.permute.xlu0 %1513  ;;  %v7371_v7 = vpop.permute.xlu1 %1518 }
 0x242   : > { %5973 = vmatmul.mubr.bf16.gmra.mrb[56].mxu0 %v6289_v48 }
 0x243   : > { %5976 = vmatprep.mubr.bf16.mxu0 %v6290_v49  ;;  %v7413_v49 = vrot.slane %v2287_v19, %v3000_v30 }
 0x244   : > { %v7373_v8 = vpop.permute.xlu0 %1523  ;;  %v7379_v12 = vpop.permute.xlu1 %1528 }
 0x248   : > { %v7382_v15 = vpop.permute.xlu0 %1533  ;;  %v7397_v32 = vpop.permute.xlu1 %1538 }
 0x24a   : > { %5977 = vmatmul.mubr.bf16.gmra.mrb[60].mxu0 %v6291_v52 }
 0x24b   : > { %5980 = vmatprep.mubr.bf16.mxu0 %v6292_v53 }
 0x24c   : > { %v7402_v36 = vpop.permute.xlu0 %1543 }
 0x252   : > { %5981 = vmatmul.mubr.bf16.gmra.mrb[64].mxu0 %v6293_v56 }
 0x253   : > { %5984 = vmatprep.mubr.bf16.mxu0 %v6294_v57 }
 0x25a   : > { %5985 = vmatmul.mubr.bf16.gmra.mrb[68].mxu0 %v6295_v59 }
 0x2a5   : > { %v5918_v11 = vpop.f32.mrb[0].mxu0 }
 0x2a6   : > { %v1049_v13 = vadd.f32 %v5918_v11, %v7375_v9  ;;  %v1040_v14 = vpop.f32.mrb[1].mxu0  ;;  %v7427_v11 = vpop.permute.xlu0 %1553 }
 0x2a7   : > { %v1041_v16 = vadd.f32 %v7375_v9, %v1040_v14  ;;  %v5919_v18 = vpop.f32.mrb[2].mxu0 }
 0x2a8   : > { %v1329_v20 = vmax.f32 %v1049_v13, 0.0  ;;  %v1052_v21 = vadd.f32 %v5919_v18, %v7375_v9  ;;  %v1043_v22 = vpop.f32.mrb[3].mxu0 }
 0x2a9   : > { %v1327_v25 = vmax.f32 %v1041_v16, 0.0  ;;  %v1044_v26 = vadd.f32 %v7375_v9, %v1043_v22 }
 0x2aa   : > { %v1330_v28 = vmax.f32 %v1052_v21, 0.0  ;;  %v1833_v37 = vmul.f32 %v1484_v62, %v1329_v20 }
 0x2ab   : > { %v1328_v33 = vmax.f32 %v1044_v26, 0.0  ;;  %v1831_v42 = vmul.f32 %v1474_v61, %v1327_v25  ;;  %v7424_v61 = vpop.permute.xlu1 %1548 }
 0x2ac   : > { %v1834_v38 = vmul.f32 %v1489_v0, %v1330_v28 }
 0x2ad   : > { %v5922_v39 = vpop.f32.mrb[4].mxu0  ;;  %v1832_v43 = vmul.f32 %v1479_v63, %v1328_v33 }
 0x2ae   : > { %v1065_v44 = vadd.f32 %v5922_v39, %v7375_v9  ;;  %v1056_v45 = vpop.f32.mrb[5].mxu0  ;;  %v5080_v47 = vpack.c.bf16 %v1834_v38, %v1833_v37 }
 0x2af   : > { %v1057_v48 = vadd.f32 %v7375_v9, %v1056_v45  ;;  %v5075_v51 = vpack.c.bf16 %v1832_v43, %v1831_v42  ;;  %v5923_v53 = vpop.f32.mrb[6].mxu0 }
 0x2b0   : > { %v1333_v52 = vmax.f32 %v1065_v44, 0.0  ;;  %5680 = vst [vmem:[#allocation2 + $0x8] sm:$0xff] %v5080_v47   ;;  %v1068_v57 = vadd.f32 %v5923_v53, %v7375_v9  ;;  %v1059_v58 = vpop.f32.mrb[7].mxu0  ;;  %v5258_v59 = vunpack.c.l.bf16 %v5080_v47  ;;  %v7422_v60 = vunpack.c.h.bf16 %v5080_v47  ;;  %v7451_v44 = vpop.permute.xlu0 %1563 }
 0x2b1   : > { %v1331_v56 = vmax.f32 %v1057_v48, 0.0  ;;  %v1060_v63 = vadd.f32 %v7375_v9, %v1059_v58  ;;  %v5254_v0 = vunpack.c.l.bf16 %v5075_v51  ;;  %v5255_v6 = vunpack.c.h.bf16 %v5075_v51 }
 0x2b2   : > { %v1837_v62 = vmul.f32 %v1504_v3, %v1333_v52  ;;  %v1334_v14 = vmax.f32 %v1068_v57, 0.0  ;;  %v2455_v16 = vrot.slane %v5258_v59, 1  ;;  %v2606_v18 = vrot.slane %v5258_v59, 2 }
 0x2b3   : > { %v1835_v13 = vmul.f32 %v7363_v1, %v1331_v56  ;;  %v1332_v19 = vmax.f32 %v1060_v63, 0.0  ;;  %v2389_v20 = vmul.f32 %v5254_v0, %v7393_v29  ;;  %v2390_v21 = vmul.f32 %v5255_v6, %v7393_v29 }
 0x2b4   : > { %v2453_v22 = vrot.slane %v5254_v0, 1  ;;  %v1838_v23 = vmul.f32 %v7367_v4, %v1334_v14  ;;  %v2454_v24 = vrot.slane %v5255_v6, 1  ;;  %v2604_v25 = vrot.slane %v5254_v0, 2 }
 0x2b5   : > { %v5926_v3 = vpop.f32.mrb[8].mxu0  ;;  %v2605_v26 = vrot.slane %v5255_v6, 2  ;;  %v1836_v27 = vmul.f32 %v7365_v2, %v1332_v19  ;;  %v7437_v30 = vmul.f32 %v7422_v60, %v7393_v29  ;;  %v2456_v31 = vrot.slane %v7422_v60, 1  ;;  %v7447_v2 = vpop.permute.xlu1 %1558 }
 0x2b6   : > { %v1081_v28 = vadd.f32 %v5926_v3, %v7375_v9  ;;  %v1072_v1 = vpop.f32.mrb[9].mxu0  ;;  %v7440_v33 = vpack.c.bf16 %v1838_v23, %v1837_v62  ;;  %v2534_v4 = vsel %vm2503_vm0, %v2454_v24, %v2455_v16  ;;  %v2535_v35 = vsel %vm2503_vm0, %v2453_v22, %v2454_v24 }
 0x2b7   : > { %v1073_v34 = vadd.f32 %v7375_v9, %v1072_v1  ;;  %v5085_v37 = vpack.c.bf16 %v1836_v27, %v1835_v13  ;;  %v5927_v39 = vpop.f32.mrb[10].mxu0  ;;  %v2540_v42 = vmul.f32 %v7404_v40, %v2535_v35  ;;  %v2541_v43 = vmul.f32 %v7404_v40, %v2534_v4  ;;  %v2754_v53 = vld [vmem:[#allocation2 + $0xc] sm:$0xf]  ;;  %v7476_v27 = vpop.permute.xlu0 %1573 }
 0x2b8   : > { %v1337_v38 = vmax.f32 %v1081_v28, 0.0  ;;  %v1084_v47 = vadd.f32 %v5927_v39, %v7375_v9  ;;  %v1075_v48 = vpop.f32.mrb[11].mxu0  ;;  %v2683_v51 = vsel %vm2652_vm1, %v2605_v26, %v2606_v18  ;;  %v2684_v52 = vsel %vm2652_vm1, %v2604_v25, %v2605_v26 }
 0x2b9   : > { %v1335_v45 = vmax.f32 %v1073_v34, 0.0  ;;  %v1076_v57 = vadd.f32 %v7375_v9, %v1075_v48  ;;  %v2572_v58 = vadd.f32 %v2540_v42, %v2389_v20  ;;  %v2573_v59 = vadd.f32 %v2541_v43, %v2390_v21  ;;  %v7469_v21 = vpop.permute.xlu1 %1568 }
 0x2ba   : > { %v1841_v56 = vmul.f32 %v7373_v8, %v1337_v38  ;;  %v1338_v63 = vmax.f32 %v1084_v47, 0.0  ;;  %v2689_v0 = vmul.f32 %v7406_v41, %v2684_v52  ;;  %v2690_v6 = vmul.f32 %v7406_v41, %v2683_v51 }
 0x2bb   : > { %v1839_v62 = vmul.f32 %v7369_v5, %v1335_v45  ;;  %v1336_v13 = vmax.f32 %v1076_v57, 0.0  ;;  %v7463_v14 = vunpack.c.l.bf16 %v5085_v37  ;;  %v5351_v16 = vunpack.c.h.bf16 %v5085_v37 }
 0x2bc   : > { %v2802_v18 = vunpack.c.l.bf16 %v2754_v53  ;;  %v1842_v19 = vmul.f32 %v7379_v12, %v1338_v63  ;;  %v2721_v8 = vadd.f32 %v2689_v0, %v2572_v58  ;;  %v2722_v23 = vadd.f32 %v2690_v6, %v2573_v59 }
 0x2bd   : > { %v5930_v22 = vpop.f32.mrb[12].mxu0  ;;  %v7467_v20 = vunpack.c.l.bf16 %v7440_v33  ;;  %v1840_v5 = vmul.f32 %v7371_v7, %v1336_v13  ;;  %v2855_v26 = vmul.f32 %v7463_v14, %v7410_v46  ;;  %v7482_v4 = vrot.slane %v7463_v14, 1 }
 0x2be   : > { %v1097_v3 = vadd.f32 %v5930_v22, %v7375_v9  ;;  %v1088_v24 = vpop.f32.mrb[13].mxu0  ;;  %v2854_v25 = vmul.f32 %v7410_v46, %v2802_v18  ;;  %v7478_v12 = vpack.c.bf16 %v1842_v19, %v1841_v56  ;;  %v2918_v34 = vrot.slane %v2802_v18, 1 }
 0x2bf   : > { %v1089_v28 = vadd.f32 %v7375_v9, %v1088_v24  ;;  %v5931_v1 = vpop.f32.mrb[14].mxu0  ;;  %v7484_v7 = vpack.c.bf16 %v1840_v5, %v1839_v62  ;;  %v2887_v45 = vadd.f32 %v2855_v26, %v2722_v23  ;;  %v2920_v47 = vrot.slane %v5351_v16, 1  ;;  %v7499_v62 = vpop.permute.xlu1 %1578 }
 0x2c0   : > { %v1341_v35 = vmax.f32 %v1097_v3, 0.0  ;;  %v1100_v37 = vadd.f32 %v5931_v1, %v7375_v9  ;;  %v1091_v38 = vpop.f32.mrb[15].mxu0  ;;  %v2886_v39 = vadd.f32 %v2854_v25, %v2721_v8  ;;  %v2997_v52 = vsel %vm2503_vm0, %v2918_v34, %v7482_v4 }
 0x2c1   : > { %v1339_v42 = vmax.f32 %v1089_v28, 0.0  ;;  %v1092_v43 = vadd.f32 %v7375_v9, %v1091_v38  ;;  %v3066_v53 = vrot.slane %v2802_v18, 2  ;;  %v7496_v58 = vsel %vm2503_vm0, %v7482_v4, %v2920_v47 }
 0x2c2   : > { %v1845_v48 = vmul.f32 %v7402_v36, %v1341_v35  ;;  %v1342_v51 = vmax.f32 %v1100_v37, 0.0  ;;  %v3002_v59 = vmul.f32 %v7413_v49, %v2997_v52  ;;  %v3003_v63 = vmul.f32 %v7413_v49, %v7496_v58 }
 0x2c3   : > { %v1843_v56 = vmul.f32 %v7382_v15, %v1339_v42  ;;  %v1340_v57 = vmax.f32 %v1092_v43, 0.0  ;;  %v7505_v0 = vrot.slane %v7463_v14, 2  ;;  %v3068_v6 = vrot.slane %v5351_v16, 2  ;;  %v7507_v15 = vpop.permute.xlu0 %1583 }
 0x2c4   : > { %v1846_v36 = vmul.f32 %v7424_v61, %v1342_v51  ;;  %v3034_v19 = vadd.f32 %v3002_v59, %v2886_v39  ;;  %v7511_v22 = vunpack.c.h.bf16 %v7440_v33  ;;  %v5446_v8 = vunpack.c.l.bf16 %v7484_v7 }
 0x2c5   : > { %v1844_v13 = vmul.f32 %v7397_v32, %v1340_v57  ;;  %v5934_v18 = vpop.f32.mrb[16].mxu0  ;;  %v3035_v3 = vadd.f32 %v3003_v63, %v2887_v45  ;;  %v7520_v16 = vsel %vm2652_vm1, %v7505_v0, %v3068_v6  ;;  %v3145_v33 = vsel %vm2652_vm1, %v3066_v53, %v7505_v0  ;;  %v1589_v45 = vpop.permute.xlu1 %1588 }
 0x2c6   : > { %v7514_v23 = vpack.c.bf16 %v1846_v36, %v1845_v48  ;;  %v1113_v61 = vadd.f32 %v5934_v18, %v7375_v9  ;;  %v1104_v5 = vpop.f32.mrb[17].mxu0  ;;  %v3151_v26 = vmul.f32 %v7415_v50, %v7520_v16  ;;  %v3150_v35 = vmul.f32 %v7415_v50, %v3145_v33 }
 0x2c7   : > { %v7522_v24 = vpack.c.bf16 %v1844_v13, %v1843_v56  ;;  %v1105_v32 = vadd.f32 %v7375_v9, %v1104_v5  ;;  %v5935_v25 = vpop.f32.mrb[18].mxu0  ;;  %v7534_v37 = vunpack.c.h.bf16 %v7484_v7  ;;  %v3315_v43 = vmul.f32 %v7467_v20, %v7417_v54  ;;  %v7543_v53 = vpop.permute.xlu0 %1593 }
 0x2c8   : > { %5686 = vst [vmem:[#allocation2 + $0x38] sm:$0xff] %v7514_v23   ;;  %v1345_v28 = vmax.f32 %v1113_v61, 0.0  ;;  %v1116_v1 = vadd.f32 %v5935_v25, %v7375_v9  ;;  %v1107_v34 = vpop.f32.mrb[19].mxu0  ;;  %v3183_v42 = vadd.f32 %v3151_v26, %v3035_v3  ;;  %v3182_v51 = vadd.f32 %v3150_v35, %v3034_v19 }
 0x2c9   : > { %5685 = vst [vmem:[#allocation2 + $0x30] sm:$0xff] %v7522_v24   ;;  %v1343_v38 = vmax.f32 %v1105_v32, 0.0  ;;  %v1108_v39 = vadd.f32 %v7375_v9, %v1107_v34  ;;  %v3316_v52 = vmul.f32 %v7511_v22, %v7417_v54  ;;  %v3379_v57 = vrot.slane %v7467_v20, 1  ;;  %v7570_v35 = vpop.permute.xlu1 %1598 }
 0x2ca   : > { %v1849_v47 = vmul.f32 %v7451_v44, %v1345_v28  ;;  %v1346_v48 = vmax.f32 %v1116_v1, 0.0  ;;  %v3380_v59 = vrot.slane %v7511_v22, 1  ;;  %v3347_v63 = vadd.f32 %v3315_v43, %v3182_v51  ;;  %v7566_v28 = vld [vmem:[#allocation11 + $0x8] ss:$0 sm:$0xff] }
 0x2cb   : > { %v1847_v7 = vmul.f32 %v7427_v11, %v1343_v38  ;;  %v1344_v56 = vmax.f32 %v1108_v39, 0.0  ;;  %v3348_v6 = vadd.f32 %v3316_v52, %v3183_v42  ;;  %v3381_v13 = vrot.slane %v5446_v8, 1 }
 0x2cc   : > { %v1850_v36 = vmul.f32 %v7469_v21, %v1346_v48  ;;  %v7552_v19 = vsel %vm2503_vm0, %v3379_v57, %v3380_v59  ;;  %v3527_v61 = vrot.slane %v7467_v20, 2  ;;  %v3528_v11 = vrot.slane %v7511_v22, 2  ;;  %v1604_v48 = vpop.permute.xlu0 %1603 }
 0x2cd   : > { %v1848_v44 = vmul.f32 %v7447_v2, %v1344_v56  ;;  %v5938_v18 = vpop.f32.mrb[20].mxu0  ;;  %v7559_v21 = vsel %vm2503_vm0, %v3380_v59, %v3381_v13  ;;  %v3463_v2 = vmul.f32 %v7419_v55, %v7552_v19  ;;  %v3529_v34 = vrot.slane %v5446_v8, 2 }
 0x2ce   : > { %v5120_v5 = vpack.c.bf16 %v1850_v36, %v1849_v47  ;;  %v1129_v3 = vadd.f32 %v5938_v18, %v7375_v9  ;;  %v1120_v32 = vpop.f32.mrb[21].mxu0  ;;  %v3464_v1 = vmul.f32 %v7419_v55, %v7559_v21  ;;  %v7575_v47 = vsel %vm2652_vm1, %v3527_v61, %v3528_v11 }
 0x2cf   : > { %v7563_v25 = vpack.c.bf16 %v1848_v44, %v1847_v7  ;;  %v1121_v33 = vadd.f32 %v7375_v9, %v1120_v32  ;;  %v5939_v26 = vpop.f32.mrb[22].mxu0  ;;  %v3495_v43 = vadd.f32 %v3463_v2, %v3347_v63  ;;  %v7581_v8 = vsel %vm2652_vm1, %v3528_v11, %v3529_v34  ;;  %v7589_v44 = vld [vmem:[#allocation12] ss:$0 sm:$0xff] }
 0x2d0   : > { %5688 = vst [vmem:[#allocation2 + $0x48] sm:$0xff] %v5120_v5   ;;  %v1349_v38 = vmax.f32 %v1129_v3, 0.0  ;;  %v1132_v39 = vadd.f32 %v5939_v26, %v7375_v9  ;;  %v1123_v42 = vpop.f32.mrb[23].mxu0  ;;  %v3496_v7 = vadd.f32 %v3464_v1, %v3348_v6  ;;  %v3611_v59 = vmul.f32 %v7566_v28, %v7575_v47  ;;  %v7608_v34 = vpop.permute.xlu0 %1613 }
 0x2d1   : > { %5687 = vst [vmem:[#allocation2 + $0x40] sm:$0xff] %v7563_v25   ;;  %v1347_v51 = vmax.f32 %v1121_v33, 0.0  ;;  %v1124_v52 = vadd.f32 %v7375_v9, %v1123_v42  ;;  %v3612_v36 = vmul.f32 %v7566_v28, %v7581_v8  ;;  %v2392_v6 = vmul.f32 %v7463_v14, %v7393_v29  ;;  %v1609_v33 = vpop.permute.xlu1 %1608 }
 0x2d2   : > { %v1853_v56 = vmul.f32 %v7507_v15, %v1349_v38  ;;  %v1350_v57 = vmax.f32 %v1132_v39, 0.0  ;;  %v2533_v15 = vsel %vm2503_vm0, %v2456_v31, %v7482_v4  ;;  %v3643_v61 = vadd.f32 %v3611_v59, %v3495_v43 }
 0x2d3   : > { %v1851_v63 = vmul.f32 %v7476_v27, %v1347_v51  ;;  %v1348_v13 = vmax.f32 %v1124_v52, 0.0  ;;  %v3644_v11 = vadd.f32 %v3612_v36, %v3496_v7  ;;  %v2542_v5 = vmul.f32 %v7404_v40, %v2533_v15 }
 0x2d4   : > { %v1854_v18 = vmul.f32 %v1589_v45, %v1350_v57  ;;  %v2543_v32 = vmul.f32 %v7496_v58, %v7404_v40  ;;  %v2607_v2 = vrot.slane %v7422_v60, 2  ;;  %v2692_v14 = vmul.f32 %v7520_v16, %v7406_v41 }
 0x2d5   : > { %v1852_v3 = vmul.f32 %v7499_v62, %v1348_v13  ;;  %v5942_v27 = vpop.f32.mrb[24].mxu0  ;;  %v3682_v45 = vadd.f32 %v7589_v44, %v3643_v61  ;;  %v3683_v1 = vadd.f32 %v7589_v44, %v3644_v11  ;;  %v2574_v60 = vadd.f32 %v2542_v5, %v7437_v30  ;;  %v1619_v11 = vpop.permute.xlu1 %1618 }
 0x2d6   : > { %v5130_v26 = vpack.c.bf16 %v1854_v18, %v1853_v56  ;;  %v1145_v31 = vadd.f32 %v5942_v27, %v7375_v9  ;;  %v1136_v4 = vpop.f32.mrb[25].mxu0  ;;  %v2575_v39 = vadd.f32 %v2543_v32, %v2392_v6  ;;  %v2682_v57 = vsel %vm2652_vm1, %v2607_v2, %v7505_v0  ;;  %v1624_v27 = vpop.permute.xlu0 %1623 }
 0x2d7   : > { %v5125_v62 = vpack.c.bf16 %v1852_v3, %v1851_v63  ;;  %v1137_v38 = vadd.f32 %v7375_v9, %v1136_v4  ;;  %v5943_v58 = vpop.f32.mrb[26].mxu0  ;;  %v3714_v51 = vmax.f32 %v3682_v45, 0.0  ;;  %v3715_v52 = vmax.f32 %v3683_v1, 0.0 }
 0x2d8   : > { %5690 = vst [vmem:[#allocation2 + $0x58] sm:$0xff] %v5130_v26   ;;  %v1353_v16 = vmax.f32 %v1145_v31, 0.0  ;;  %v1148_v42 = vadd.f32 %v5943_v58, %v7375_v9  ;;  %v1139_v43 = vpop.f32.mrb[27].mxu0  ;;  %v2724_v59 = vadd.f32 %v2692_v14, %v2575_v39  ;;  %v2691_v13 = vmul.f32 %v7406_v41, %v2682_v57 }
 0x2d9   : > { %5689 = vst [vmem:[#allocation2 + $0x50] sm:$0xff] %v5125_v62   ;;  %v1351_v7 = vmax.f32 %v1137_v38, 0.0  ;;  %v1140_v56 = vadd.f32 %v7375_v9, %v1139_v43  ;;  %v3746_v30 = vpack.c.bf16 %v3715_v52, %v3714_v51  ;;  %v2856_v18 = vmul.f32 %v7467_v20, %v7410_v46 }
 0x2da   : > { %v1857_v36 = vmul.f32 %v1604_v48, %v1353_v16  ;;  %v1354_v63 = vmax.f32 %v1148_v42, 0.0  ;;  %v2857_v61 = vmul.f32 %v7511_v22, %v7410_v46  ;;  %v2723_v3 = vadd.f32 %v2691_v13, %v2574_v60  ;;  %v1634_v13 = vpop.permute.xlu0 %1633 }
 0x2db   : > { %v1855_v6 = vmul.f32 %v7543_v53, %v1351_v7  ;;  %v1352_v15 = vmax.f32 %v1140_v56, 0.0  ;;  %6004 = vmatprep.mubr.bf16.mxu1 %v3746_v30  ;;  %v3004_v0 = vmul.f32 %v7552_v19, %v7413_v49  ;;  %v3005_v48 = vmul.f32 %v7559_v21, %v7413_v49  ;;  %v1629_v30 = vpop.permute.xlu1 %1628 }
 0x2dc   : > { %v1858_v5 = vmul.f32 %v1609_v33, %v1354_v63  ;;  %v2889_v2 = vadd.f32 %v2857_v61, %v2724_v59  ;;  %v3152_v14 = vmul.f32 %v7575_v47, %v7415_v50  ;;  %v3153_v26 = vmul.f32 %v7581_v8, %v7415_v50 }
 0x2dd   : > { %v1856_v53 = vmul.f32 %v7570_v35, %v1352_v15  ;;  %v5946_v32 = vpop.f32.mrb[28].mxu0  ;;  %v2888_v45 = vadd.f32 %v2856_v18, %v2723_v3  ;;  %v7634_v1 = vunpack.c.l.bf16 %v7478_v12  ;;  %v5451_v60 = vunpack.c.h.bf16 %v7478_v12 }
 0x2de   : > { %v5140_v33 = vpack.c.bf16 %v1858_v5, %v1857_v36  ;;  %v1161_v31 = vadd.f32 %v5946_v32, %v7375_v9  ;;  %v1152_v4 = vpop.f32.mrb[29].mxu0  ;;  %v3037_v58 = vadd.f32 %v3005_v48, %v2889_v2  ;;  %v3317_v51 = vmul.f32 %v7534_v37, %v7417_v54 }
 0x2df   : > { %v5135_v62 = vpack.c.bf16 %v1856_v53, %v1855_v6  ;;  %v1153_v38 = vadd.f32 %v7375_v9, %v1152_v4  ;;  %v5947_v35 = vpop.f32.mrb[30].mxu0  ;;  %v3036_v43 = vadd.f32 %v3004_v0, %v2888_v45  ;;  %v3318_v57 = vmul.f32 %v7634_v1, %v7417_v54 }
 0x2e0   : > { %5692 = vst [vmem:[#allocation2 + $0x68] sm:$0xff] %v5140_v33   ;;  %v1357_v39 = vmax.f32 %v1161_v31, 0.0  ;;  %v1164_v16 = vadd.f32 %v5947_v35, %v7375_v9  ;;  %v1155_v42 = vpop.f32.mrb[31].mxu0  ;;  %v3185_v56 = vadd.f32 %v3153_v26, %v3037_v58  ;;  %v3382_v63 = vrot.slane %v7534_v37, 1 }
 0x2e1   : > { %5691 = vst [vmem:[#allocation2 + $0x60] sm:$0xff] %v5135_v62   ;;  %v1355_v52 = vmax.f32 %v1153_v38, 0.0  ;;  %v1156_v7 = vadd.f32 %v7375_v9, %v1155_v42  ;;  %v3184_v12 = vadd.f32 %v3152_v14, %v3036_v43  ;;  %v3383_v61 = vrot.slane %v7634_v1, 1  ;;  %v1644_v43 = vpop.permute.xlu0 %1643 }
 0x2e2   : > { %v1861_v59 = vmul.f32 %v1624_v27, %v1357_v39  ;;  %v1358_v36 = vmax.f32 %v1164_v16, 0.0  ;;  %v3350_v18 = vadd.f32 %v3318_v57, %v3185_v56  ;;  %v3384_v0 = vrot.slane %v5451_v60, 1 }
 0x2e3   : > { %v1859_v6 = vmul.f32 %v7608_v34, %v1355_v52  ;;  %v1356_v15 = vmax.f32 %v1156_v7, 0.0  ;;  %v3349_v3 = vadd.f32 %v3317_v51, %v3184_v12  ;;  %v3530_v48 = vrot.slane %v7534_v37, 2 }
 0x2e4   : > { %v1862_v5 = vmul.f32 %v1629_v30, %v1358_v36  ;;  %v7650_v27 = vsel %vm2503_vm0, %v3382_v63, %v3383_v61  ;;  %v3531_v32 = vrot.slane %v7634_v1, 2  ;;  %v3532_v2 = vrot.slane %v5451_v60, 2 }
 0x2e5   : > { %v1860_v53 = vmul.f32 %v1619_v11, %v1356_v15  ;;  %v5950_v14 = vpop.f32.mrb[32].mxu0  ;;  %v7655_v34 = vsel %vm2503_vm0, %v3383_v61, %v3384_v0  ;;  %v3465_v33 = vmul.f32 %v7419_v55, %v7650_v27  ;;  %v2393_v7 = vmul.f32 %v7467_v20, %v7393_v29 }
 0x2e6   : > { %v5150_v26 = vpack.c.bf16 %v1862_v5, %v1861_v59  ;;  %v1177_v31 = vadd.f32 %v5950_v14, %v7375_v9  ;;  %v1168_v4 = vpop.f32.mrb[33].mxu0  ;;  %v3466_v45 = vmul.f32 %v7419_v55, %v7655_v34  ;;  %v7664_v62 = vsel %vm2652_vm1, %v3531_v32, %v3532_v2 }
 0x2e7   : > { %v5145_v11 = vpack.c.bf16 %v1860_v53, %v1859_v6  ;;  %v7668_v38 = vsel %vm2652_vm1, %v3530_v48, %v3531_v32  ;;  %v5951_v35 = vpop.f32.mrb[34].mxu0  ;;  %v3497_v58 = vadd.f32 %v3465_v33, %v3349_v3  ;;  %v3614_v39 = vmul.f32 %v7566_v28, %v7664_v62 }
 0x2e8   : > { %5694 = vst [vmem:[#allocation2 + $0x78] sm:$0xff] %v5150_v26   ;;  %v3613_v60 = vmul.f32 %v7566_v28, %v7668_v38  ;;  %v1361_v16 = vmax.f32 %v1177_v31, 0.0  ;;  %v1171_v42 = vpop.f32.mrb[35].mxu0  ;;  %v3498_v51 = vadd.f32 %v3466_v45, %v3350_v18  ;;  %v1169_v52 = vadd.f32 %v7375_v9, %v1168_v4 }
 0x2e9   : > { %5693 = vst [vmem:[#allocation2 + $0x70] sm:$0xff] %v5145_v11   ;;  %v2394_v56 = vmul.f32 %v7511_v22, %v7393_v29  ;;  %v2544_v36 = vmul.f32 %v7552_v19, %v7404_v40  ;;  %v2545_v12 = vmul.f32 %v7559_v21, %v7404_v40  ;;  %v2693_v6 = vmul.f32 %v7575_v47, %v7406_v41 }
 0x2ea   : > { %v3645_v57 = vadd.f32 %v3613_v60, %v3497_v58  ;;  %v7679_v59 = vmul.f32 %v1644_v43, %v1361_v16  ;;  %v3646_v63 = vadd.f32 %v3614_v39, %v3498_v51  ;;  %v1359_v30 = vmax.f32 %v1169_v52, 0.0  ;;  %v1639_v51 = vpop.permute.xlu1 %1638 }
 0x2eb   : > { %v2694_v20 = vmul.f32 %v7581_v8, %v7406_v41  ;;  %v2576_v22 = vadd.f32 %v2544_v36, %v2393_v7  ;;  %v2577_v18 = vadd.f32 %v2545_v12, %v2394_v56  ;;  %v2858_v61 = vmul.f32 %v7534_v37, %v7410_v46 }
 0x2ec   : > { %v3684_v15 = vadd.f32 %v7589_v44, %v3645_v57  ;;  %v3685_v19 = vadd.f32 %v7589_v44, %v3646_v63  ;;  %v7693_v5 = vmul.f32 %v1634_v13, %v1359_v30  ;;  %v2859_v21 = vmul.f32 %v7634_v1, %v7410_v46 }
 0x2ed   : > { %v3006_v47 = vmul.f32 %v7650_v27, %v7413_v49  ;;  %v7699_v3 = vpop.f32.mrb[36].mxu0  ;;  %v2725_v0 = vadd.f32 %v2693_v6, %v2576_v22  ;;  %v2726_v48 = vadd.f32 %v2694_v20, %v2577_v18  ;;  %v3007_v53 = vmul.f32 %v7655_v34, %v7413_v49 }
 0x2ee   : > { %v3716_v8 = vmax.f32 %v3684_v15, 0.0  ;;  %v7703_v32 = vpop.f32.mrb[37].mxu0  ;;  %v3717_v2 = vmax.f32 %v3685_v19, 0.0  ;;  %v3154_v13 = vmul.f32 %v7668_v38, %v7415_v50  ;;  %v3155_v14 = vmul.f32 %v7664_v62, %v7415_v50 }
 0x2ef   : > { %v5454_v26 = vunpack.c.l.bf16 %v7522_v24  ;;  %v7710_v33 = vpop.f32.mrb[38].mxu0  ;;  %v2890_v31 = vadd.f32 %v2858_v61, %v2725_v0  ;;  %v2891_v4 = vadd.f32 %v2859_v21, %v2726_v48  ;;  %v5455_v11 = vunpack.c.h.bf16 %v7522_v24 }
 0x2f0   : > { %v5458_v45 = vunpack.c.l.bf16 %v7514_v23  ;;  %v7714_v58 = vpop.f32.mrb[39].mxu0  ;;  %v3747_v60 = vpack.c.bf16 %v3717_v2, %v3716_v8  ;;  %v1180_v24 = vadd.f32 %v5951_v35, %v7375_v9  ;;  %v1172_v15 = vadd.f32 %v7375_v9, %v1171_v42 }
 0x2f1   : > { %v3319_v39 = vmul.f32 %v5454_v26, %v7417_v54  ;;  %v3385_v16 = vrot.slane %v5454_v26, 1  ;;  %v3533_v43 = vrot.slane %v5454_v26, 2  ;;  %v3038_v52 = vadd.f32 %v3006_v47, %v2890_v31  ;;  %v1649_v31 = vpop.permute.xlu1 %1648 }
 0x2f2   : > { %v3039_v7 = vadd.f32 %v3007_v53, %v2891_v4  ;;  %v3320_v56 = vmul.f32 %v5455_v11, %v7417_v54  ;;  %v3386_v57 = vrot.slane %v5455_v11, 1  ;;  %6005 = vmatmul.mubr.bf16.vlgmr.msra.gmra.mrb[0].mxu1 %v3747_v60  ;;  %v3387_v36 = vrot.slane %v5458_v45, 1 }
 0x2f3   : > { %v3534_v12 = vrot.slane %v5455_v11, 2  ;;  %v3535_v63 = vrot.slane %v5458_v45, 2  ;;  %v3186_v30 = vadd.f32 %v3154_v13, %v3038_v52  ;;  %v1362_v53 = vmax.f32 %v1180_v24, 0.0 }
 0x2f4   : > { %v3187_v6 = vadd.f32 %v3155_v14, %v3039_v7  ;;  %v3454_v20 = vsel %vm2503_vm0, %v3385_v16, %v3386_v57  ;;  %v3453_v22 = vsel %vm2503_vm0, %v3386_v57, %v3387_v36  ;;  %v1360_v2 = vmax.f32 %v1172_v15, 0.0 }
 0x2f5   : > { %v3467_v18 = vmul.f32 %v7419_v55, %v3454_v20  ;;  %v3601_v61 = vsel %vm2652_vm1, %v3534_v12, %v3535_v63  ;;  %v3602_v19 = vsel %vm2652_vm1, %v3533_v43, %v3534_v12  ;;  %v7729_v21 = vpop.f32.mrb[40].mxu0  ;;  %v3351_v35 = vadd.f32 %v3319_v39, %v3186_v30 }
 0x2f6   : > { %v3352_v47 = vadd.f32 %v3320_v56, %v3187_v6  ;;  %v3468_v8 = vmul.f32 %v7419_v55, %v3453_v22  ;;  %v3615_v0 = vmul.f32 %v7566_v28, %v3602_v19  ;;  %v7733_v42 = vpop.f32.mrb[41].mxu0  ;;  %v3616_v48 = vmul.f32 %v7566_v28, %v3601_v61 }
 0x2f7   : > { %v2395_v13 = vmul.f32 %v7534_v37, %v7393_v29  ;;  %v7738_v14 = vpop.f32.mrb[42].mxu0  ;;  %v3499_v4 = vadd.f32 %v3467_v18, %v3351_v35  ;;  %v2396_v60 = vmul.f32 %v7634_v1, %v7393_v29  ;;  %v2546_v39 = vmul.f32 %v7650_v27, %v7404_v40 }
 0x2f8   : > { %v3500_v45 = vadd.f32 %v3468_v8, %v3352_v47  ;;  %v7744_v16 = vpop.f32.mrb[43].mxu0  ;;  %v1866_v43 = vmul.f32 %v1649_v31, %v1362_v53  ;;  %v1864_v52 = vmul.f32 %v1639_v51, %v1360_v2  ;;  %v2547_v7 = vmul.f32 %v7655_v34, %v7404_v40 }
 0x2f9   : > { %v2695_v37 = vmul.f32 %v7668_v38, %v7406_v41  ;;  %v3647_v56 = vadd.f32 %v3615_v0, %v3499_v4  ;;  %v2578_v36 = vadd.f32 %v2546_v39, %v2395_v13  ;;  %v2696_v12 = vmul.f32 %v7664_v62, %v7406_v41  ;;  %v1654_v0 = vpop.permute.xlu0 %1653 }
 0x2fa   : > { %v3648_v57 = vadd.f32 %v3616_v48, %v3500_v45  ;;  %v5160_v1 = vpack.c.bf16 %v1866_v43, %v7679_v59  ;;  %v5155_v27 = vpack.c.bf16 %v1864_v52, %v7693_v5  ;;  %v2579_v63 = vadd.f32 %v2547_v7, %v2396_v60 }
 0x2fb   : > { %v2860_v24 = vmul.f32 %v5454_v26, %v7410_v46  ;;  %v3686_v51 = vadd.f32 %v7589_v44, %v3647_v56  ;;  %v2727_v30 = vadd.f32 %v2695_v37, %v2578_v36  ;;  %v2861_v38 = vmul.f32 %v5455_v11, %v7410_v46  ;;  %v1659_v56 = vpop.permute.xlu1 %1658 }
 0x2fc   : > { %v3687_v34 = vadd.f32 %v7589_v44, %v3648_v57  ;;  %5696 = vst [vmem:[#allocation2 + $0x88] sm:$0xff] %v5160_v1   ;;  %5695 = vst [vmem:[#allocation2 + $0x80] sm:$0xff] %v5155_v27   ;;  %v2728_v6 = vadd.f32 %v2696_v12, %v2579_v63  ;;  %v3008_v15 = vmul.f32 %v3454_v20, %v7413_v49  ;;  %v7767_v48 = vunpack.c.h.bf16 %v7514_v23 }
 0x2fd   : > { %v3009_v62 = vmul.f32 %v3453_v22, %v7413_v49  ;;  %v3156_v59 = vmul.f32 %v3602_v19, %v7415_v50  ;;  %v7761_v5 = vpop.f32.mrb[44].mxu0  ;;  %v3718_v18 = vmax.f32 %v3686_v51, 0.0  ;;  %v2892_v35 = vadd.f32 %v2860_v24, %v2727_v30  ;;  %v1664_v27 = vpop.permute.xlu0 %1663  ;;  %v5720_v30 = vld [vmem:[#allocation2 + $0x30] sm:$0xff]  }
 0x2fe   : > { %v3719_v26 = vmax.f32 %v3687_v34, 0.0  ;;  %v3157_v47 = vmul.f32 %v3601_v61, %v7415_v50  ;;  %v7764_v8 = vpop.f32.mrb[45].mxu0  ;;  %v2893_v11 = vadd.f32 %v2861_v38, %v2728_v6  ;;  %v5462_v20 = vunpack.c.l.bf16 %v7563_v25  ;;  %v7794_v38 = vld [vmem:[#allocation2 + $0x38] sm:$0xff]  }
 0x2ff   : > { %v5463_v22 = vunpack.c.h.bf16 %v7563_v25  ;;  %v7771_v53 = vpop.f32.mrb[46].mxu0  ;;  %v3040_v2 = vadd.f32 %v3008_v15, %v2892_v35  ;;  %v1193_v13 = vadd.f32 %v7699_v3, %v7375_v9  ;;  %v1185_v61 = vadd.f32 %v7375_v9, %v7703_v32 }
 0x300   : > { %v3748_v19 = vpack.c.bf16 %v3719_v26, %v3718_v18  ;;  %v7777_v31 = vpop.f32.mrb[47].mxu0  ;;  %v3041_v4 = vadd.f32 %v3009_v62, %v2893_v11  ;;  %v3321_v23 = vmul.f32 %v7767_v48, %v7417_v54  ;;  %v3322_v45 = vmul.f32 %v5462_v20, %v7417_v54  ;;  %v5744_v26 = vld [vmem:[#allocation2 + $0x40] sm:$0xff]  }
 0x301   : > { %v3388_v25 = vrot.slane %v7767_v48, 1  ;;  %v3188_v60 = vadd.f32 %v3156_v59, %v3040_v2  ;;  %v3389_v39 = vrot.slane %v5462_v20, 1  ;;  %v3390_v43 = vrot.slane %v5463_v22, 1 }
 0x302   : > { %6008 = vmatprep.mubr.bf16.mxu1 %v3748_v19  ;;  %v3536_v52 = vrot.slane %v7767_v48, 2  ;;  %v3189_v3 = vadd.f32 %v3157_v47, %v3041_v4  ;;  %v3537_v7 = vrot.slane %v5462_v20, 2  ;;  %v3538_v37 = vrot.slane %v5463_v22, 2 }
 0x303   : > { %v1365_v32 = vmax.f32 %v1193_v13, 0.0  ;;  %v3353_v57 = vadd.f32 %v3321_v23, %v3188_v60  ;;  %v3451_v36 = vsel %vm2503_vm0, %v3389_v39, %v3390_v43  ;;  %v3452_v12 = vsel %vm2503_vm0, %v3388_v25, %v3389_v39  ;;  %v1669_v43 = vpop.permute.xlu1 %1668 }
 0x304   : > { %v1363_v1 = vmax.f32 %v1185_v61, 0.0  ;;  %v3354_v63 = vadd.f32 %v3322_v45, %v3189_v3  ;;  %v3469_v24 = vmul.f32 %v7419_v55, %v3452_v12  ;;  %v3470_v51 = vmul.f32 %v7419_v55, %v3451_v36 }
 0x305   : > { %v3599_v34 = vsel %vm2652_vm1, %v3537_v7, %v3538_v37  ;;  %v7796_v6 = vpop.f32.mrb[48].mxu0  ;;  %v3600_v15 = vsel %vm2652_vm1, %v3536_v52, %v3537_v7  ;;  %v1869_v59 = vmul.f32 %v1664_v27, %v1365_v32  ;;  %v1196_v22 = vadd.f32 %v7710_v33, %v7375_v9 }
 0x306   : > { %v3618_v62 = vmul.f32 %v7566_v28, %v3599_v34  ;;  %v1867_v18 = vmul.f32 %v1654_v0, %v1363_v1  ;;  %v7803_v35 = vpop.f32.mrb[49].mxu0  ;;  %v3501_v47 = vadd.f32 %v3469_v24, %v3353_v57  ;;  %v3502_v11 = vadd.f32 %v3470_v51, %v3354_v63 }
 0x307   : > { %v3617_v20 = vmul.f32 %v7566_v28, %v3600_v15  ;;  %v7808_v19 = vpop.f32.mrb[50].mxu0  ;;  %v1188_v2 = vadd.f32 %v7375_v9, %v7714_v58  ;;  %v5278_v13 = vunpack.c.l.bf16 %v5720_v30  ;;  %v5279_v61 = vunpack.c.h.bf16 %v5720_v30 }
 0x308   : > { %v5282_v4 = vunpack.c.l.bf16 %v7794_v38  ;;  %v7813_v0 = vpop.f32.mrb[51].mxu0  ;;  %v3650_v45 = vadd.f32 %v3618_v62, %v3502_v11  ;;  %v1366_v60 = vmax.f32 %v1196_v22, 0.0  ;;  %v7815_v39 = vunpack.c.l.bf16 %v5744_v26 }
 0x309   : > { %v3649_v23 = vadd.f32 %v3617_v20, %v3501_v47  ;;  %v1364_v3 = vmax.f32 %v1188_v2, 0.0  ;;  %v2397_v33 = vmul.f32 %v5278_v13, %v7393_v29  ;;  %v2398_v7 = vmul.f32 %v5279_v61, %v7393_v29 }
 0x30a   : > { %v2465_v37 = vrot.slane %v5278_v13, 1  ;;  %v3689_v58 = vadd.f32 %v7589_v44, %v3650_v45  ;;  %v1870_v32 = vmul.f32 %v1669_v43, %v1366_v60  ;;  %v2466_v57 = vrot.slane %v5279_v61, 1  ;;  %v5766_v45 = vld [vmem:[#allocation2 + $0x48] sm:$0xff]  }
 0x30b   : > { %v3688_v9 = vadd.f32 %v7589_v44, %v3649_v23  ;;  %v1868_v36 = vmul.f32 %v1659_v56, %v1364_v3  ;;  %v2467_v12 = vrot.slane %v5282_v4, 1  ;;  %v2616_v1 = vrot.slane %v5278_v13, 2 }
 0x30c   : > { %v2617_v27 = vrot.slane %v5279_v61, 2  ;;  %v3721_v24 = vmax.f32 %v3689_v58, 0.0  ;;  %v5170_v51 = vpack.c.bf16 %v1870_v32, %v1869_v59  ;;  %v2527_v34 = vsel %vm2503_vm0, %v2465_v37, %v2466_v57 }
 0x30d   : > { %v3720_v63 = vmax.f32 %v3688_v9, 0.0  ;;  %v5970_v30 = vpop.f32.mrb[52].mxu0  ;;  %v5165_v15 = vpack.c.bf16 %v1868_v36, %v1867_v18  ;;  %v2526_v62 = vsel %vm2503_vm0, %v2466_v57, %v2467_v12  ;;  %v2548_v47 = vmul.f32 %v7404_v40, %v2527_v34 }
 0x30e   : > { %v2618_v11 = vrot.slane %v5282_v4, 2  ;;  %v7826_v20 = vpop.f32.mrb[53].mxu0  ;;  %5698 = vst [vmem:[#allocation2 + $0x98] sm:$0xff] %v5170_v51   ;;  %v2549_v22 = vmul.f32 %v7404_v40, %v2526_v62  ;;  %v2676_v59 = vsel %vm2652_vm1, %v2616_v1, %v2617_v27  ;;  %v5375_v2 = vunpack.c.h.bf16 %v5744_v26  ;;  %v7856_v1 = vld [vmem:[#allocation2 + $0x50] sm:$0xff]  }
 0x30f   : > { %v3749_v56 = vpack.c.bf16 %v3721_v24, %v3720_v63  ;;  %v5971_v13 = vpop.f32.mrb[54].mxu0  ;;  %5697 = vst [vmem:[#allocation2 + $0x90] sm:$0xff] %v5165_v15   ;;  %v2580_v61 = vadd.f32 %v2548_v47, %v2397_v33  ;;  %v2697_v23 = vmul.f32 %v7406_v41, %v2676_v59  ;;  %v2862_v4 = vmul.f32 %v7767_v48, %v7410_v46 }
 0x310   : > { %v2675_v18 = vsel %vm2652_vm1, %v2617_v27, %v2618_v11  ;;  %v7836_v60 = vpop.f32.mrb[55].mxu0  ;;  %v2581_v43 = vadd.f32 %v2549_v22, %v2398_v7  ;;  %v2863_v26 = vmul.f32 %v7815_v39, %v7410_v46  ;;  %v7842_v33 = vrot.slane %v7815_v39, 1 }
 0x311   : > { %6009 = vmatmul.mubr.bf16.gmra.mrb[4].mxu1 %v3749_v56  ;;  %v2698_v3 = vmul.f32 %v7406_v41, %v2675_v18  ;;  %v2729_v37 = vadd.f32 %v2697_v23, %v2580_v61  ;;  %v2932_v9 = vrot.slane %v5375_v2, 1  ;;  %v7845_v58 = vrot.slane %v7815_v39, 2 }
 0x312   : > { %v3080_v32 = vrot.slane %v5375_v2, 2  ;;  %v2989_v7 = vsel %vm2503_vm0, %v3388_v25, %v7842_v33  ;;  %v7852_v36 = vunpack.c.l.bf16 %v5766_v45  ;;  %v7854_v12 = vunpack.c.h.bf16 %v5766_v45  ;;  %v1674_v2 = vpop.permute.xlu0 %1673 }
 0x313   : > { %v2730_v57 = vadd.f32 %v2698_v3, %v2581_v43  ;;  %v2894_v27 = vadd.f32 %v2862_v4, %v2729_v37  ;;  %v2988_v63 = vsel %vm2503_vm0, %v7842_v33, %v2932_v9  ;;  %v3010_v24 = vmul.f32 %v7413_v49, %v2989_v7  ;;  %v1679_v7 = vpop.permute.xlu1 %1678 }
 0x314   : > { %v7865_v51 = vsel %vm2652_vm1, %v7845_v58, %v3080_v32  ;;  %v3011_v25 = vmul.f32 %v7413_v49, %v2988_v63  ;;  %v3137_v30 = vsel %vm2652_vm1, %v3536_v52, %v7845_v58  ;;  %v5470_v56 = vunpack.c.l.bf16 %v7856_v1  ;;  %v7889_v32 = vld [vmem:[#allocation9] ss:$0 sm:$0xff] }
 0x315   : > { %v2895_v34 = vadd.f32 %v2863_v26, %v2730_v57  ;;  %v3159_v15 = vmul.f32 %v7415_v50, %v7865_v51  ;;  %v5974_v62 = vpop.f32.mrb[56].mxu0  ;;  %v3042_v47 = vadd.f32 %v3010_v24, %v2894_v27  ;;  %v3158_v11 = vmul.f32 %v7415_v50, %v3137_v30 }
 0x316   : > { %v3323_v22 = vmul.f32 %v7852_v36, %v7417_v54  ;;  %v1264_v59 = vpop.f32.mrb[57].mxu0  ;;  %v3324_v48 = vmul.f32 %v7854_v12, %v7417_v54  ;;  %v3391_v52 = vrot.slane %v7852_v36, 1  ;;  %v3392_v61 = vrot.slane %v7854_v12, 1 }
 0x317   : > { %v3043_v13 = vadd.f32 %v3011_v25, %v2895_v34  ;;  %v5975_v18 = vpop.f32.mrb[58].mxu0  ;;  %v3190_v23 = vadd.f32 %v3158_v11, %v3042_v47  ;;  %v3393_v4 = vrot.slane %v5470_v56, 1  ;;  %v3539_v45 = vrot.slane %v7852_v36, 2  ;;  %v1684_v59 = vpop.permute.xlu0 %1683 }
 0x318   : > { %v3540_v43 = vrot.slane %v7854_v12, 2  ;;  %v1267_v3 = vpop.f32.mrb[59].mxu0  ;;  %v7887_v37 = vsel %vm2503_vm0, %v3391_v52, %v3392_v61  ;;  %v3541_v9 = vrot.slane %v5470_v56, 2  ;;  %v1209_v57 = vadd.f32 %v7889_v32, %v7729_v21 }
 0x319   : > { %v3191_v26 = vadd.f32 %v3159_v15, %v3043_v13  ;;  %v3355_v27 = vadd.f32 %v3323_v22, %v3190_v23  ;;  %v7895_v24 = vsel %vm2503_vm0, %v3392_v61, %v3393_v4  ;;  %v3471_v34 = vmul.f32 %v7419_v55, %v7887_v37 }
 0x31a   : > { %v7901_v25 = vsel %vm2652_vm1, %v3539_v45, %v3540_v43  ;;  %v3472_v15 = vmul.f32 %v7419_v55, %v7895_v24  ;;  %v7907_v21 = vsel %vm2652_vm1, %v3540_v43, %v3541_v9  ;;  %v1369_v56 = vmax.f32 %v1209_v57, 0.0 }
 0x31b   : > { %v3356_v30 = vadd.f32 %v3324_v48, %v3191_v26  ;;  %v3619_v62 = vmul.f32 %v7566_v28, %v7901_v25  ;;  %v3503_v47 = vadd.f32 %v3471_v34, %v3355_v27  ;;  %v3620_v11 = vmul.f32 %v7566_v28, %v7907_v21 }
 0x31c   : > { %v1201_v22 = vadd.f32 %v7889_v32, %v7733_v42  ;;  %v1212_v48 = vadd.f32 %v7889_v32, %v7738_v14  ;;  %v1204_v52 = vadd.f32 %v7889_v32, %v7744_v16  ;;  %v5283_v61 = vunpack.c.h.bf16 %v7794_v38  ;;  %v1689_v14 = vpop.permute.xlu1 %1688 }
 0x31d   : > { %v3504_v13 = vadd.f32 %v3472_v15, %v3356_v30  ;;  %v5978_v18 = vpop.f32.mrb[60].mxu0  ;;  %v3651_v23 = vadd.f32 %v3619_v62, %v3503_v47  ;;  %v1873_v4 = vmul.f32 %v1684_v59, %v1369_v56  ;;  %v2400_v43 = vmul.f32 %v7815_v39, %v7393_v29 }
 0x31e   : > { %v1367_v45 = vmax.f32 %v1201_v22, 0.0  ;;  %v1280_v3 = vpop.f32.mrb[61].mxu0  ;;  %v1370_v42 = vmax.f32 %v1212_v48, 0.0  ;;  %v1368_v9 = vmax.f32 %v1204_v52, 0.0  ;;  %v2399_v57 = vmul.f32 %v5283_v61, %v7393_v29 }
 0x31f   : > { %v3652_v26 = vadd.f32 %v3620_v11, %v3504_v13  ;;  %v5979_v27 = vpop.f32.mrb[62].mxu0  ;;  %v3690_v34 = vadd.f32 %v7589_v44, %v3651_v23  ;;  %v2468_v30 = vrot.slane %v5283_v61, 1  ;;  %v2551_v38 = vmul.f32 %v2988_v63, %v7404_v40  ;;  %v5768_v23 = vld [vmem:[#allocation2 + $0x58] sm:$0xff]  }
 0x320   : > { %v1871_v16 = vmul.f32 %v1674_v2, %v1367_v45  ;;  %v1283_v15 = vpop.f32.mrb[63].mxu0  ;;  %v1874_v47 = vmul.f32 %v1689_v14, %v1370_v42  ;;  %v1872_v56 = vmul.f32 %v1679_v7, %v1368_v9  ;;  %v2619_v39 = vrot.slane %v5283_v61, 2  ;;  %v1694_v27 = vpop.permute.xlu0 %1693 }
 0x321   : > { %v3691_v62 = vadd.f32 %v7589_v44, %v3652_v26  ;;  %v3722_v22 = vmax.f32 %v3690_v34, 0.0  ;;  %v2525_v11 = vsel %vm2503_vm0, %v2468_v30, %v7842_v33  ;;  %v2583_v59 = vadd.f32 %v2551_v38, %v2400_v43 }
 0x322   : > { %v2700_v13 = vmul.f32 %v7865_v51, %v7406_v41  ;;  %v5180_v2 = vpack.c.bf16 %v1874_v47, %v1873_v4  ;;  %v5175_v52 = vpack.c.bf16 %v1872_v56, %v1871_v16  ;;  %v2550_v63 = vmul.f32 %v7404_v40, %v2525_v11 }
 0x323   : > { %v3723_v48 = vmax.f32 %v3691_v62, 0.0  ;;  %v2674_v18 = vsel %vm2652_vm1, %v2619_v39, %v7845_v58  ;;  %v2864_v61 = vmul.f32 %v7852_v36, %v7410_v46  ;;  %v2865_v33 = vmul.f32 %v7854_v12, %v7410_v46 }
 0x324   : > { %v2732_v7 = vadd.f32 %v2700_v13, %v2583_v59  ;;  %5700 = vst [vmem:[#allocation2 + $0xa8] sm:$0xff] %v5180_v2   ;;  %5699 = vst [vmem:[#allocation2 + $0xa0] sm:$0xff] %v5175_v52   ;;  %v2582_v51 = vadd.f32 %v2550_v63, %v2399_v57  ;;  %v2699_v4 = vmul.f32 %v7406_v41, %v2674_v18  ;;  %v7949_v57 = vunpack.c.h.bf16 %v7856_v1 }
 0x325   : > { %v3750_v45 = vpack.c.bf16 %v3723_v48, %v3722_v22  ;;  %v3012_v43 = vmul.f32 %v7887_v37, %v7413_v49  ;;  %v3013_v58 = vmul.f32 %v7895_v24, %v7413_v49  ;;  %v3160_v26 = vmul.f32 %v7901_v25, %v7415_v50  ;;  %v5982_v9 = vpop.f32.mrb[64].mxu0 }
 0x326   : > { %v2897_v3 = vadd.f32 %v2865_v33, %v2732_v7  ;;  %v3161_v42 = vmul.f32 %v7907_v21, %v7415_v50  ;;  %v2731_v14 = vadd.f32 %v2699_v4, %v2582_v51  ;;  %v7951_v34 = vunpack.c.l.bf16 %v5768_v23  ;;  %v1296_v30 = vpop.f32.mrb[65].mxu0 }
 0x327   : > { %6012 = vmatprep.mubr.bf16.mxu1 %v3750_v45  ;;  %v5475_v16 = vunpack.c.h.bf16 %v5768_v23  ;;  %v1225_v15 = vadd.f32 %v7889_v32, %v7761_v5  ;;  %v1217_v62 = vadd.f32 %v7889_v32, %v7764_v8  ;;  %v2401_v47 = vmul.f32 %v7852_v36, %v7393_v29  ;;  %v5983_v56 = vpop.f32.mrb[66].mxu0  ;;  %v1704_v23 = vpop.permute.xlu0 %1703 }
 0x328   : > { %v3045_v38 = vadd.f32 %v3013_v58, %v2897_v3  ;;  %v2896_v39 = vadd.f32 %v2864_v61, %v2731_v14  ;;  %v3325_v1 = vmul.f32 %v7949_v57, %v7417_v54  ;;  %v3326_v22 = vmul.f32 %v7951_v34, %v7417_v54  ;;  %v1299_v59 = vpop.f32.mrb[67].mxu0 }
 0x329   : > { %v3394_v11 = vrot.slane %v7949_v57, 1  ;;  %v3395_v5 = vrot.slane %v7951_v34, 1  ;;  %v3396_v48 = vrot.slane %v5475_v16, 1  ;;  %v3542_v8 = vrot.slane %v7949_v57, 2 }
 0x32a   : > { %v3193_v13 = vadd.f32 %v3161_v42, %v3045_v38  ;;  %v3044_v2 = vadd.f32 %v3012_v43, %v2896_v39  ;;  %v3543_v36 = vrot.slane %v7951_v34, 2  ;;  %v3544_v52 = vrot.slane %v5475_v16, 2 }
 0x32b   : > { %v1373_v63 = vmax.f32 %v1225_v15, 0.0  ;;  %v7969_v7 = vsel %vm2503_vm0, %v3395_v5, %v3396_v48  ;;  %v7973_v61 = vsel %vm2503_vm0, %v3394_v11, %v3395_v5  ;;  %v1371_v33 = vmax.f32 %v1217_v62, 0.0  ;;  %v8013_v11 = vld [vmem:[#allocation2 + $0x68] sm:$0xff]  }
 0x32c   : > { %v3358_v18 = vadd.f32 %v3326_v22, %v3193_v13  ;;  %v3192_v45 = vadd.f32 %v3160_v26, %v3044_v2  ;;  %v3473_v51 = vmul.f32 %v7419_v55, %v7973_v61  ;;  %v3474_v4 = vmul.f32 %v7419_v55, %v7969_v7 }
 0x32d   : > { %v7981_v43 = vsel %vm2652_vm1, %v3543_v36, %v3544_v52  ;;  %v7985_v3 = vsel %vm2652_vm1, %v3542_v8, %v3543_v36  ;;  %v7989_v42 = vmul.f32 %v1704_v23, %v1373_v63  ;;  %v7991_v26 = vmul.f32 %v1694_v27, %v1371_v33  ;;  %v1699_v33 = vpop.permute.xlu1 %1698 }
 0x32e   : > { %v3622_v58 = vmul.f32 %v7566_v28, %v7981_v43  ;;  %v3357_v9 = vadd.f32 %v3325_v1, %v3192_v45  ;;  %v3506_v14 = vadd.f32 %v3474_v4, %v3358_v18  ;;  %v3621_v16 = vmul.f32 %v7566_v28, %v7985_v3  ;;  %v5769_v1 = vld [vmem:[#allocation2 + $0x60] sm:$0xff]  }
 0x32f   : > { %v2402_v30 = vmul.f32 %v7854_v12, %v7393_v29  ;;  %v2552_v38 = vmul.f32 %v7887_v37, %v7404_v40  ;;  %v2553_v15 = vmul.f32 %v7895_v24, %v7404_v40  ;;  %v2701_v62 = vmul.f32 %v7901_v25, %v7406_v41 }
 0x330   : > { %v2702_v27 = vmul.f32 %v7907_v21, %v7406_v41  ;;  %v3505_v56 = vadd.f32 %v3473_v51, %v3357_v9  ;;  %v3654_v39 = vadd.f32 %v3622_v58, %v3506_v14  ;;  %v2866_v28 = vmul.f32 %v7949_v57, %v7410_v46  ;;  %v5986_v58 = vpop.f32.mrb[68].mxu0 }
 0x331   : > { %v2867_v12 = vmul.f32 %v7951_v34, %v7410_v46  ;;  %v2584_v22 = vadd.f32 %v2552_v38, %v2401_v47  ;;  %v2585_v37 = vadd.f32 %v2553_v15, %v2402_v30  ;;  %v3014_v24 = vmul.f32 %v7973_v61, %v7413_v49  ;;  %v1312_v30 = vpop.f32.mrb[69].mxu0 }
 0x332   : > { %v3015_v25 = vmul.f32 %v7969_v7, %v7413_v49  ;;  %v3653_v21 = vadd.f32 %v3621_v16, %v3505_v56  ;;  %v3693_v59 = vadd.f32 %v7589_v44, %v3654_v39  ;;  %v3162_v13 = vmul.f32 %v7985_v3, %v7415_v50 }
 0x333   : > { %v3163_v5 = vmul.f32 %v7981_v43, %v7415_v50  ;;  %v2733_v48 = vadd.f32 %v2701_v62, %v2584_v22  ;;  %v2734_v47 = vadd.f32 %v2702_v27, %v2585_v37  ;;  %v8020_v8 = vunpack.c.l.bf16 %v5769_v1 }
 0x334   : > { %v8022_v2 = vunpack.c.h.bf16 %v5769_v1  ;;  %v3692_v36 = vadd.f32 %v7589_v44, %v3653_v21  ;;  %v3725_v52 = vmax.f32 %v3693_v59, 0.0  ;;  %v5482_v63 = vunpack.c.l.bf16 %v8013_v11 }
 0x335   : > { %v1228_v18 = vadd.f32 %v7889_v32, %v7771_v53  ;;  %v2898_v23 = vadd.f32 %v2866_v28, %v2733_v48  ;;  %v2899_v45 = vadd.f32 %v2867_v12, %v2734_v47  ;;  %v3327_v51 = vmul.f32 %v8020_v8, %v7417_v54  ;;  %v8058_v47 = vld [vmem:[#allocation11 + $0x8] ss:$0 sm:$0xff] }
 0x336   : > { %v3328_v4 = vmul.f32 %v8022_v2, %v7417_v54  ;;  %v3724_v9 = vmax.f32 %v3692_v36, 0.0  ;;  %v3397_v14 = vrot.slane %v8020_v8, 1  ;;  %v3398_v44 = vrot.slane %v8022_v2, 1 }
 0x337   : > { %v3399_v16 = vrot.slane %v5482_v63, 1  ;;  %v3046_v38 = vadd.f32 %v3014_v24, %v2898_v23  ;;  %v3047_v15 = vadd.f32 %v3015_v25, %v2899_v45  ;;  %v3545_v53 = vrot.slane %v8020_v8, 2 }
 0x338   : > { %v3546_v62 = vrot.slane %v8022_v2, 2  ;;  %v3751_v27 = vpack.c.bf16 %v3725_v52, %v3724_v9  ;;  %v8042_v39 = vsel %vm2503_vm0, %v3397_v14, %v3398_v44  ;;  %v3547_v28 = vrot.slane %v5482_v63, 2 }
 0x339   : > { %v8038_v56 = vsel %vm2503_vm0, %v3398_v44, %v3399_v16  ;;  %v3194_v12 = vadd.f32 %v3162_v13, %v3046_v38  ;;  %v3195_v1 = vadd.f32 %v3163_v5, %v3047_v15  ;;  %v3475_v22 = vmul.f32 %v7419_v55, %v8042_v39  ;;  %v1709_v13 = vpop.permute.xlu1 %1708 }
 0x33a   : > { %v3476_v37 = vmul.f32 %v7419_v55, %v8038_v56  ;;  %6013 = vmatmul.mubr.bf16.gmra.mrb[8].mxu1 %v3751_v27  ;;  %v8050_v24 = vsel %vm2652_vm1, %v3546_v62, %v3547_v28  ;;  %v8054_v25 = vsel %vm2652_vm1, %v3545_v53, %v3546_v62  ;;  %v1374_v21 = vmax.f32 %v1228_v18, 0.0  ;;  %v5771_v27 = vld [vmem:[#allocation2 + $0x70] sm:$0xff]  }
 0x33b   : > { %v1220_v59 = vadd.f32 %v7889_v32, %v7777_v31  ;;  %v3359_v5 = vadd.f32 %v3327_v51, %v3194_v12  ;;  %v3360_v48 = vadd.f32 %v3328_v4, %v3195_v1  ;;  %v3623_v36 = vmul.f32 %v8058_v47, %v8054_v25 }
 0x33c   : > { %v3624_v52 = vmul.f32 %v8058_v47, %v8050_v24  ;;  %v1878_v63 = vmul.f32 %v1709_v13, %v1374_v21  ;;  %v2403_v45 = vmul.f32 %v7949_v57, %v7393_v29  ;;  %v2404_v18 = vmul.f32 %v7951_v34, %v7393_v29 }
 0x33d   : > { %v1372_v23 = vmax.f32 %v1220_v59, 0.0  ;;  %v3507_v31 = vadd.f32 %v3475_v22, %v3359_v5  ;;  %v3508_v58 = vadd.f32 %v3476_v37, %v3360_v48  ;;  %v2554_v51 = vmul.f32 %v7973_v61, %v7404_v40 }
 0x33e   : > { %v2555_v4 = vmul.f32 %v7969_v7, %v7404_v40  ;;  %v5190_v9 = vpack.c.bf16 %v1878_v63, %v7989_v42  ;;  %v2703_v44 = vmul.f32 %v7985_v3, %v7406_v41  ;;  %v2704_v57 = vmul.f32 %v7981_v43, %v7406_v41  ;;  %v8084_v3 = vld [vmem:[#allocation12] ss:$0 sm:$0xff]  ;;  %v1714_v63 = vpop.permute.xlu0 %1713 }
 0x33f   : > { %v1876_v14 = vmul.f32 %v1699_v33, %v1372_v23  ;;  %v3655_v16 = vadd.f32 %v3623_v36, %v3507_v31  ;;  %v3656_v30 = vadd.f32 %v3624_v52, %v3508_v58  ;;  %v2586_v34 = vadd.f32 %v2554_v51, %v2403_v45  ;;  %v5987_v52 = vpop.f32.mrb[70].mxu0 }
 0x340   : > { %v2587_v38 = vadd.f32 %v2555_v4, %v2404_v18  ;;  %5702 = vst [vmem:[#allocation2 + $0xb8] sm:$0xff] %v5190_v9   ;;  %v2868_v61 = vmul.f32 %v8020_v8, %v7410_v46  ;;  %v2869_v7 = vmul.f32 %v8022_v2, %v7410_v46  ;;  %v3016_v42 = vmul.f32 %v8042_v39, %v7413_v49  ;;  %v1315_v31 = vpop.f32.mrb[71].mxu0 }
 0x341   : > { %v5185_v15 = vpack.c.bf16 %v1876_v14, %v7991_v26  ;;  %v3694_v43 = vadd.f32 %v8084_v3, %v3655_v16  ;;  %v3695_v33 = vadd.f32 %v8084_v3, %v3656_v30  ;;  %v2735_v53 = vadd.f32 %v2703_v44, %v2586_v34  ;;  %v1719_v30 = vpop.permute.xlu1 %1718 }
 0x342   : > { %v2736_v62 = vadd.f32 %v2704_v57, %v2587_v38  ;;  %v3017_v26 = vmul.f32 %v8038_v56, %v7413_v49  ;;  %v3164_v28 = vmul.f32 %v8054_v25, %v7415_v50  ;;  %v3165_v12 = vmul.f32 %v8050_v24, %v7415_v50 }
 0x343   : > { %5701 = vst [vmem:[#allocation2 + $0xb0] sm:$0xff] %v5185_v15   ;;  %v8095_v1 = vunpack.c.h.bf16 %v8013_v11  ;;  %v3726_v22 = vmax.f32 %v3694_v43, 0.0  ;;  %v3727_v37 = vmax.f32 %v3695_v33, 0.0  ;;  %v2900_v21 = vadd.f32 %v2868_v61, %v2735_v53 }
 0x344   : > { %v2901_v59 = vadd.f32 %v2869_v7, %v2736_v62  ;;  %v8097_v13 = vunpack.c.l.bf16 %v5771_v27  ;;  %v5487_v5 = vunpack.c.h.bf16 %v5771_v27  ;;  %v1241_v16 = vadd.f32 %v7889_v32, %v7796_v6 }
 0x345   : > { %v3329_v48 = vmul.f32 %v8095_v1, %v7417_v54  ;;  %v3400_v36 = vrot.slane %v8095_v1, 1  ;;  %v3752_v23 = vpack.c.bf16 %v3727_v37, %v3726_v22  ;;  %v3048_v45 = vadd.f32 %v3016_v42, %v2900_v21 }
 0x346   : > { %v3049_v18 = vadd.f32 %v3017_v26, %v2901_v59  ;;  %v3548_v11 = vrot.slane %v8095_v1, 2  ;;  %v3330_v58 = vmul.f32 %v8097_v13, %v7417_v54  ;;  %v3401_v51 = vrot.slane %v8097_v13, 1  ;;  %v1724_v26 = vpop.permute.xlu0 %1723 }
 0x347   : > { %v3402_v4 = vrot.slane %v5487_v5, 1  ;;  %v3549_v9 = vrot.slane %v8097_v13, 2  ;;  %6016 = vmatprep.mubr.bf16.mxu1 %v3752_v23  ;;  %v3196_v14 = vadd.f32 %v3164_v28, %v3048_v45  ;;  %v3550_v57 = vrot.slane %v5487_v5, 2  ;;  %v1729_v45 = vpop.permute.xlu1 %1728 }
 0x348   : > { %v3197_v44 = vadd.f32 %v3165_v12, %v3049_v18  ;;  %v8115_v38 = vsel %vm2503_vm0, %v3400_v36, %v3401_v51  ;;  %v1233_v61 = vadd.f32 %v7889_v32, %v7803_v35  ;;  %v1377_v62 = vmax.f32 %v1241_v16, 0.0 }
 0x349   : > { %v8111_v34 = vsel %vm2503_vm0, %v3401_v51, %v3402_v4  ;;  %v8119_v15 = vsel %vm2652_vm1, %v3548_v11, %v3549_v9  ;;  %v3361_v7 = vadd.f32 %v3329_v48, %v3196_v14  ;;  %v3477_v6 = vmul.f32 %v7419_v55, %v8115_v38 }
 0x34a   : > { %v3362_v42 = vadd.f32 %v3330_v58, %v3197_v44  ;;  %v3478_v43 = vmul.f32 %v7419_v55, %v8111_v34  ;;  %v8129_v33 = vsel %vm2652_vm1, %v3549_v9, %v3550_v57  ;;  %v3625_v53 = vmul.f32 %v8058_v47, %v8119_v15  ;;  %v5772_v44 = vld [vmem:[#allocation2 + $0x78] sm:$0xff]  }
 0x34b   : > { %v1375_v27 = vmax.f32 %v1233_v61, 0.0  ;;  %v3509_v28 = vadd.f32 %v3477_v6, %v3361_v7  ;;  %v3626_v12 = vmul.f32 %v8058_v47, %v8129_v33  ;;  %v1244_v22 = vadd.f32 %v7889_v32, %v7808_v19 }
 0x34c   : > { %v3510_v35 = vadd.f32 %v3478_v43, %v3362_v42  ;;  %v1881_v37 = vmul.f32 %v1724_v26, %v1377_v62  ;;  %v1236_v59 = vadd.f32 %v7889_v32, %v7813_v0  ;;  %v2405_v5 = vmul.f32 %v8020_v8, %v7393_v29 }
 0x34d   : > { %v1879_v21 = vmul.f32 %v1714_v63, %v1375_v27  ;;  %v3657_v48 = vadd.f32 %v3625_v53, %v3509_v28  ;;  %v1378_v52 = vmax.f32 %v1244_v22, 0.0  ;;  %v2406_v23 = vmul.f32 %v8022_v2, %v7393_v29  ;;  %v1734_v53 = vpop.permute.xlu0 %1733 }
 0x34e   : > { %v3658_v36 = vadd.f32 %v3626_v12, %v3510_v35  ;;  %v1376_v18 = vmax.f32 %v1236_v59, 0.0  ;;  %v2556_v11 = vmul.f32 %v8042_v39, %v7404_v40  ;;  %v2557_v19 = vmul.f32 %v8038_v56, %v7404_v40 }
 0x34f   : > { %v2705_v0 = vmul.f32 %v8054_v25, %v7406_v41  ;;  %v3696_v63 = vadd.f32 %v8084_v3, %v3657_v48  ;;  %v1882_v31 = vmul.f32 %v1729_v45, %v1378_v52  ;;  %v2706_v58 = vmul.f32 %v8050_v24, %v7406_v41  ;;  %v8159_v24 = vld [vmem:[#allocation2 + $0x80] sm:$0xff]  }
 0x350   : > { %v3697_v8 = vadd.f32 %v8084_v3, %v3658_v36  ;;  %v1880_v2 = vmul.f32 %v1719_v30, %v1376_v18  ;;  %v2588_v51 = vadd.f32 %v2556_v11, %v2405_v5  ;;  %v2589_v4 = vadd.f32 %v2557_v19, %v2406_v23  ;;  %v1739_v23 = vpop.permute.xlu1 %1738 }
 0x351   : > { %v2870_v39 = vmul.f32 %v8095_v1, %v7410_v46  ;;  %v3728_v9 = vmax.f32 %v3696_v63, 0.0  ;;  %v5200_v56 = vpack.c.bf16 %v1882_v31, %v1881_v37  ;;  %v2871_v25 = vmul.f32 %v8097_v13, %v7410_v46 }
 0x352   : > { %v3729_v14 = vmax.f32 %v3697_v8, 0.0  ;;  %v5195_v57 = vpack.c.bf16 %v1880_v2, %v1879_v21  ;;  %v2737_v16 = vadd.f32 %v2705_v0, %v2588_v51  ;;  %v2738_v61 = vadd.f32 %v2706_v58, %v2589_v4  ;;  %v1744_v8 = vpop.permute.xlu0 %1743 }
 0x353   : > { %v3018_v7 = vmul.f32 %v8115_v38, %v7413_v49  ;;  %5704 = vst [vmem:[#allocation2 + $0xc8] sm:$0xff] %v5200_v56   ;;  %v3019_v42 = vmul.f32 %v8111_v34, %v7413_v49  ;;  %v3166_v6 = vmul.f32 %v8119_v15, %v7415_v50  ;;  %v3167_v43 = vmul.f32 %v8129_v33, %v7415_v50 }
 0x354   : > { %v3753_v30 = vpack.c.bf16 %v3729_v14, %v3728_v9  ;;  %5703 = vst [vmem:[#allocation2 + $0xc0] sm:$0xff] %v5195_v57   ;;  %v2902_v62 = vadd.f32 %v2870_v39, %v2737_v16  ;;  %v2903_v27 = vadd.f32 %v2871_v25, %v2738_v61  ;;  %v8167_v26 = vunpack.c.l.bf16 %v5772_v44 }
 0x355   : > { %v8169_v28 = vunpack.c.h.bf16 %v5772_v44  ;;  %v5494_v35 = vunpack.c.l.bf16 %v8159_v24  ;;  %v1249_v12 = vadd.f32 %v7889_v32, %v7826_v20  ;;  %v1252_v57 = vadd.f32 %v7889_v32, %v7836_v60 }
 0x356   : > { %6017 = vmatmul.mubr.bf16.gmra.mrb[12].mxu1 %v3753_v30  ;;  %v3050_v22 = vadd.f32 %v3018_v7, %v2902_v62  ;;  %v3051_v37 = vadd.f32 %v3019_v42, %v2903_v27  ;;  %v3331_v21 = vmul.f32 %v8167_v26, %v7417_v54  ;;  %v3403_v5 = vrot.slane %v8167_v26, 1  ;;  %v1749_v7 = vpop.permute.xlu1 %1748 }
 0x357   : > { %v3332_v59 = vmul.f32 %v8169_v28, %v7417_v54  ;;  %v3404_v48 = vrot.slane %v8169_v28, 1  ;;  %v3405_v36 = vrot.slane %v5494_v35, 1  ;;  %v3551_v52 = vrot.slane %v8167_v26, 2 }
 0x358   : > { %v3198_v45 = vadd.f32 %v3166_v6, %v3050_v22  ;;  %v3199_v18 = vadd.f32 %v3167_v43, %v3051_v37  ;;  %v3552_v20 = vrot.slane %v8169_v28, 2  ;;  %v3553_v11 = vrot.slane %v5494_v35, 2 }
 0x359   : > { %v8184_v19 = vsel %vm2503_vm0, %v3404_v48, %v3405_v36  ;;  %v8188_v0 = vsel %vm2503_vm0, %v3403_v5, %v3404_v48  ;;  %v1379_v63 = vmax.f32 %v1249_v12, 0.0  ;;  %v2407_v16 = vmul.f32 %v8095_v1, %v7393_v29  ;;  %v1754_v36 = vpop.permute.xlu0 %1753 }
 0x35a   : > { %v3363_v31 = vadd.f32 %v3331_v21, %v3198_v45  ;;  %v3364_v58 = vadd.f32 %v3332_v59, %v3199_v18  ;;  %v3479_v2 = vmul.f32 %v7419_v55, %v8188_v0  ;;  %v3480_v51 = vmul.f32 %v7419_v55, %v8184_v19  ;;  %v5774_v21 = vld [vmem:[#allocation2 + $0x88] sm:$0xff]  }
 0x35b   : > { %v8196_v4 = vsel %vm2652_vm1, %v3552_v20, %v3553_v11  ;;  %v8200_v39 = vsel %vm2652_vm1, %v3551_v52, %v3552_v20  ;;  %v1883_v9 = vmul.f32 %v1734_v53, %v1379_v63  ;;  %v2408_v61 = vmul.f32 %v8097_v13, %v7393_v29 }
 0x35c   : > { %v3511_v14 = vadd.f32 %v3479_v2, %v3363_v31  ;;  %v3512_v56 = vadd.f32 %v3480_v51, %v3364_v58  ;;  %v3627_v25 = vmul.f32 %v8058_v47, %v8200_v39  ;;  %v3628_v44 = vmul.f32 %v8058_v47, %v8196_v4 }
 0x35d   : > { %v2558_v6 = vmul.f32 %v8115_v38, %v7404_v40  ;;  %v2559_v43 = vmul.f32 %v8111_v34, %v7404_v40  ;;  %v1380_v53 = vmax.f32 %v1252_v57, 0.0  ;;  %v2707_v62 = vmul.f32 %v8119_v15, %v7406_v41 }
 0x35e   : > { %v3659_v30 = vadd.f32 %v3627_v25, %v3511_v14  ;;  %v3660_v42 = vadd.f32 %v3628_v44, %v3512_v56  ;;  %v2708_v60 = vmul.f32 %v8129_v33, %v7406_v41  ;;  %v2872_v38 = vmul.f32 %v8167_v26, %v7410_v46 }
 0x35f   : > { %v2590_v13 = vadd.f32 %v2558_v6, %v2407_v16  ;;  %v2591_v27 = vadd.f32 %v2559_v43, %v2408_v61  ;;  %v1884_v35 = vmul.f32 %v1739_v23, %v1380_v53  ;;  %v2873_v34 = vmul.f32 %v8169_v28, %v7410_v46  ;;  %v1764_v61 = vpop.permute.xlu0 %1763 }
 0x360   : > { %v3698_v32 = vadd.f32 %v8084_v3, %v3659_v30  ;;  %v3699_v1 = vadd.f32 %v8084_v3, %v3660_v42  ;;  %v3020_v33 = vmul.f32 %v8188_v0, %v7413_v49  ;;  %v3021_v5 = vmul.f32 %v8184_v19, %v7413_v49 }
 0x361   : > { %v2739_v37 = vadd.f32 %v2707_v62, %v2590_v13  ;;  %v2740_v15 = vadd.f32 %v2708_v60, %v2591_v27  ;;  %v5205_v59 = vpack.c.bf16 %v1884_v35, %v1883_v9  ;;  %v3168_v48 = vmul.f32 %v8200_v39, %v7415_v50 }
 0x362   : > { %v3730_v12 = vmax.f32 %v3698_v32, 0.0  ;;  %v3731_v22 = vmax.f32 %v3699_v1, 0.0  ;;  %v3169_v18 = vmul.f32 %v8196_v4, %v7415_v50  ;;  %v8235_v20 = vunpack.c.h.bf16 %v8159_v24 }
 0x363   : > { %v2904_v23 = vadd.f32 %v2872_v38, %v2739_v37  ;;  %v2905_v45 = vadd.f32 %v2873_v34, %v2740_v15  ;;  %5705 = vst [vmem:[#allocation2 + $0xd0] sm:$0xff] %v5205_v59   ;;  %v8237_v11 = vunpack.c.l.bf16 %v5774_v21  ;;  %v5499_v63 = vunpack.c.h.bf16 %v5774_v21 }
 0x364   : > { %v3754_v52 = vpack.c.bf16 %v3731_v22, %v3730_v12  ;;  %v2409_v58 = vmul.f32 %v8167_v26, %v7393_v29  ;;  %v3333_v2 = vmul.f32 %v8235_v20, %v7417_v54  ;;  %v3406_v9 = vrot.slane %v8235_v20, 1 }
 0x365   : > { %v3052_v8 = vadd.f32 %v3020_v33, %v2904_v23  ;;  %v3053_v31 = vadd.f32 %v3021_v5, %v2905_v45  ;;  %v3334_v51 = vmul.f32 %v8237_v11, %v7417_v54  ;;  %v3407_v24 = vrot.slane %v8237_v11, 1  ;;  %v8292_v5 = vld [vmem:[#allocation2 + $0x98] sm:$0xff]  }
 0x366   : > { %6020 = vmatprep.mubr.bf16.mxu1 %v3754_v52  ;;  %v3408_v25 = vrot.slane %v5499_v63, 1  ;;  %v3554_v44 = vrot.slane %v8235_v20, 2  ;;  %v3555_v26 = vrot.slane %v8237_v11, 2  ;;  %v3556_v16 = vrot.slane %v5499_v63, 2 }
 0x367   : > { %v3200_v14 = vadd.f32 %v3168_v48, %v3052_v8  ;;  %v3201_v56 = vadd.f32 %v3169_v18, %v3053_v31  ;;  %v8250_v57 = vsel %vm2503_vm0, %v3406_v9, %v3407_v24  ;;  %v2410_v27 = vmul.f32 %v8169_v28, %v7393_v29  ;;  %v5775_v28 = vld [vmem:[#allocation2 + $0x90] sm:$0xff]  }
 0x368   : > { %v8255_v42 = vsel %vm2503_vm0, %v3407_v24, %v3408_v25  ;;  %v3481_v6 = vmul.f32 %v7419_v55, %v8250_v57  ;;  %v8263_v53 = vsel %vm2652_vm1, %v3555_v26, %v3556_v16  ;;  %v8267_v62 = vsel %vm2652_vm1, %v3554_v44, %v3555_v26 }
 0x369   : > { %v3365_v7 = vadd.f32 %v3333_v2, %v3200_v14  ;;  %v3366_v30 = vadd.f32 %v3334_v51, %v3201_v56  ;;  %v3482_v43 = vmul.f32 %v7419_v55, %v8255_v42  ;;  %v3629_v32 = vmul.f32 %v8058_v47, %v8267_v62  ;;  %v1759_v56 = vpop.permute.xlu1 %1758 }
 0x36a   : > { %v3630_v1 = vmul.f32 %v8058_v47, %v8263_v53  ;;  %v2560_v35 = vmul.f32 %v8188_v0, %v7404_v40  ;;  %v2561_v38 = vmul.f32 %v8184_v19, %v7404_v40  ;;  %v2709_v12 = vmul.f32 %v8200_v39, %v7406_v41 }
 0x36b   : > { %v3513_v60 = vadd.f32 %v3481_v6, %v3365_v7  ;;  %v3514_v13 = vadd.f32 %v3482_v43, %v3366_v30  ;;  %v2710_v22 = vmul.f32 %v8196_v4, %v7406_v41  ;;  %v2874_v59 = vmul.f32 %v8235_v20, %v7410_v46 }
 0x36c   : > { %v2592_v15 = vadd.f32 %v2560_v35, %v2409_v58  ;;  %v2593_v21 = vadd.f32 %v2561_v38, %v2410_v27  ;;  %v2875_v0 = vmul.f32 %v8237_v11, %v7410_v46  ;;  %v3022_v19 = vmul.f32 %v8250_v57, %v7413_v49 }
 0x36d   : > { %v3661_v34 = vadd.f32 %v3629_v32, %v3513_v60  ;;  %v3662_v37 = vadd.f32 %v3630_v1, %v3514_v13  ;;  %v3023_v39 = vmul.f32 %v8255_v42, %v7413_v49  ;;  %v3170_v52 = vmul.f32 %v8267_v62, %v7415_v50 }
 0x36e   : > { %v2741_v48 = vadd.f32 %v2709_v12, %v2592_v15  ;;  %v2742_v36 = vadd.f32 %v2710_v22, %v2593_v21  ;;  %v3171_v45 = vmul.f32 %v8263_v53, %v7415_v50  ;;  %v8299_v18 = vunpack.c.l.bf16 %v5775_v28  ;;  %v1769_v21 = vpop.permute.xlu1 %1768 }
 0x36f   : > { %v3700_v33 = vadd.f32 %v8084_v3, %v3661_v34  ;;  %v3701_v4 = vadd.f32 %v8084_v3, %v3662_v37  ;;  %v8301_v63 = vunpack.c.h.bf16 %v5775_v28  ;;  %v5506_v2 = vunpack.c.l.bf16 %v8292_v5 }
 0x370   : > { %v2906_v31 = vadd.f32 %v2874_v59, %v2741_v48  ;;  %v2907_v58 = vadd.f32 %v2875_v0, %v2742_v36  ;;  %v3335_v51 = vmul.f32 %v8299_v18, %v7417_v54  ;;  %v3409_v24 = vrot.slane %v8299_v18, 1 }
 0x371   : > { %v3732_v23 = vmax.f32 %v3700_v33, 0.0  ;;  %v3733_v8 = vmax.f32 %v3701_v4, 0.0  ;;  %v3336_v9 = vmul.f32 %v8301_v63, %v7417_v54  ;;  %v3410_v14 = vrot.slane %v8301_v63, 1 }
 0x372   : > { %v3054_v44 = vadd.f32 %v3022_v19, %v2906_v31  ;;  %v3055_v26 = vadd.f32 %v3023_v39, %v2907_v58  ;;  %v3411_v16 = vrot.slane %v5506_v2, 1  ;;  %v3557_v7 = vrot.slane %v8299_v18, 2  ;;  %v1774_v58 = vpop.permute.xlu0 %1773 }
 0x373   : > { %v3755_v25 = vpack.c.bf16 %v3733_v8, %v3732_v23  ;;  %v8312_v61 = vsel %vm2503_vm0, %v3409_v24, %v3410_v14  ;;  %v3558_v30 = vrot.slane %v8301_v63, 2  ;;  %v3559_v6 = vrot.slane %v5506_v2, 2 }
 0x374   : > { %v3202_v43 = vadd.f32 %v3170_v52, %v3054_v44  ;;  %v3203_v60 = vadd.f32 %v3171_v45, %v3055_v26  ;;  %v8318_v32 = vsel %vm2503_vm0, %v3410_v14, %v3411_v16  ;;  %v3483_v1 = vmul.f32 %v7419_v55, %v8312_v61 }
 0x375   : > { %6021 = vmatmul.mubr.bf16.gmra.mrb[16].mxu1 %v3755_v25  ;;  %v3484_v13 = vmul.f32 %v7419_v55, %v8318_v32  ;;  %v8326_v27 = vsel %vm2652_vm1, %v3558_v30, %v3559_v6  ;;  %v8330_v35 = vsel %vm2652_vm1, %v3557_v7, %v3558_v30  ;;  %v2411_v37 = vmul.f32 %v8235_v20, %v7393_v29 }
 0x376   : > { %v3367_v38 = vadd.f32 %v3335_v51, %v3202_v43  ;;  %v3368_v34 = vadd.f32 %v3336_v9, %v3203_v60  ;;  %v3631_v12 = vmul.f32 %v8058_v47, %v8330_v35  ;;  %v3632_v22 = vmul.f32 %v8058_v47, %v8326_v27 }
 0x377   : > { %v2412_v15 = vmul.f32 %v8237_v11, %v7393_v29  ;;  %v2562_v33 = vmul.f32 %v8250_v57, %v7404_v40  ;;  %v2563_v0 = vmul.f32 %v8255_v42, %v7404_v40  ;;  %v2711_v19 = vmul.f32 %v8267_v62, %v7406_v41  ;;  %v5777_v62 = vld [vmem:[#allocation2 + $0xa0] sm:$0xff]  }
 0x378   : > { %v3515_v59 = vadd.f32 %v3483_v1, %v3367_v38  ;;  %v3516_v28 = vadd.f32 %v3484_v13, %v3368_v34  ;;  %v2712_v39 = vmul.f32 %v8263_v53, %v7406_v41  ;;  %v2876_v11 = vmul.f32 %v8299_v18, %v7410_v46 }
 0x379   : > { %v2594_v48 = vadd.f32 %v2562_v33, %v2411_v37  ;;  %v2595_v36 = vadd.f32 %v2563_v0, %v2412_v15  ;;  %v2877_v52 = vmul.f32 %v8301_v63, %v7410_v46  ;;  %v3024_v53 = vmul.f32 %v8312_v61, %v7413_v49  ;;  %v1779_v37 = vpop.permute.xlu1 %1778  ;;  %v1784_v15 = vpop.permute.xlu0 %1783 }
 0x37a   : > { %v3663_v4 = vadd.f32 %v3631_v12, %v3515_v59  ;;  %v3664_v20 = vadd.f32 %v3632_v22, %v3516_v28  ;;  %v3025_v8 = vmul.f32 %v8318_v32, %v7413_v49  ;;  %v3172_v31 = vmul.f32 %v8330_v35, %v7415_v50 }
 0x37b   : > { %v2743_v23 = vadd.f32 %v2711_v19, %v2594_v48  ;;  %v2744_v45 = vadd.f32 %v2712_v39, %v2595_v36  ;;  %v3173_v14 = vmul.f32 %v8326_v27, %v7415_v50  ;;  %v8363_v56 = vunpack.c.h.bf16 %v8292_v5 }
 0x37c   : > { %v3702_v57 = vadd.f32 %v8084_v3, %v3663_v4  ;;  %v3703_v42 = vadd.f32 %v8084_v3, %v3664_v20  ;;  %v8365_v25 = vunpack.c.l.bf16 %v5777_v62  ;;  %v5511_v44 = vunpack.c.h.bf16 %v5777_v62 }
 0x37d   : > { %v2908_v9 = vadd.f32 %v2876_v11, %v2743_v23  ;;  %v2909_v24 = vadd.f32 %v2877_v52, %v2744_v45  ;;  %v3337_v30 = vmul.f32 %v8363_v56, %v7417_v54  ;;  %v3412_v43 = vrot.slane %v8363_v56, 1  ;;  %v1789_v62 = vpop.permute.xlu1 %1788 }
 0x37e   : > { %v3734_v2 = vmax.f32 %v3702_v57, 0.0  ;;  %v3735_v51 = vmax.f32 %v3703_v42, 0.0  ;;  %v3338_v6 = vmul.f32 %v8365_v25, %v7417_v54  ;;  %v3413_v60 = vrot.slane %v8365_v25, 1 }
 0x37f   : > { %v3056_v16 = vadd.f32 %v3024_v53, %v2908_v9  ;;  %v3057_v7 = vadd.f32 %v3025_v8, %v2909_v24  ;;  %v3414_v13 = vrot.slane %v5511_v44, 1  ;;  %v3560_v38 = vrot.slane %v8363_v56, 2  ;;  %v5778_v9 = vld [vmem:[#allocation2 + $0xa8] sm:$0xff]  }
 0x380   : > { %v3756_v26 = vpack.c.bf16 %v3735_v51, %v3734_v2  ;;  %v8376_v34 = vsel %vm2503_vm0, %v3412_v43, %v3413_v60  ;;  %v3561_v12 = vrot.slane %v8365_v25, 2  ;;  %v3562_v22 = vrot.slane %v5511_v44, 2  ;;  %v1794_v43 = vpop.permute.xlu0 %1793 }
 0x381   : > { %v3204_v1 = vadd.f32 %v3172_v31, %v3056_v16  ;;  %v3205_v5 = vadd.f32 %v3173_v14, %v3057_v7  ;;  %v8381_v28 = vsel %vm2503_vm0, %v3413_v60, %v3414_v13  ;;  %v3485_v33 = vmul.f32 %v7419_v55, %v8376_v34  ;;  %v8417_v14 = vld [vmem:[#allocation2 + $0xb0] sm:$0xff]  }
 0x382   : > { %6024 = vmatprep.mubr.bf16.mxu1 %v3756_v26  ;;  %v3486_v0 = vmul.f32 %v7419_v55, %v8381_v28  ;;  %v8389_v19 = vsel %vm2652_vm1, %v3561_v12, %v3562_v22  ;;  %v8393_v39 = vsel %vm2652_vm1, %v3560_v38, %v3561_v12  ;;  %v2413_v11 = vmul.f32 %v8299_v18, %v7393_v29 }
 0x383   : > { %v3369_v21 = vadd.f32 %v3337_v30, %v3204_v1  ;;  %v3370_v59 = vadd.f32 %v3338_v6, %v3205_v5  ;;  %v3633_v20 = vmul.f32 %v8058_v47, %v8393_v39  ;;  %v3634_v48 = vmul.f32 %v8058_v47, %v8389_v19 }
 0x384   : > { %v2414_v57 = vmul.f32 %v8301_v63, %v7393_v29  ;;  %v2564_v42 = vmul.f32 %v8312_v61, %v7404_v40  ;;  %v2565_v45 = vmul.f32 %v8318_v32, %v7404_v40  ;;  %v2713_v31 = vmul.f32 %v8330_v35, %v7406_v41 }
 0x385   : > { %v3517_v4 = vadd.f32 %v3485_v33, %v3369_v21  ;;  %v3518_v36 = vadd.f32 %v3486_v0, %v3370_v59  ;;  %v2714_v63 = vmul.f32 %v8326_v27, %v7406_v41  ;;  %v2878_v61 = vmul.f32 %v8363_v56, %v7410_v46 }
 0x386   : > { %v2596_v8 = vadd.f32 %v2564_v42, %v2413_v11  ;;  %v2597_v58 = vadd.f32 %v2565_v45, %v2414_v57  ;;  %v2879_v24 = vmul.f32 %v8365_v25, %v7410_v46  ;;  %v3026_v26 = vmul.f32 %v8376_v34, %v7413_v49  ;;  %v1804_v45 = vpop.permute.xlu0 %1803 }
 0x387   : > { %v3665_v52 = vadd.f32 %v3633_v20, %v3517_v4  ;;  %v3666_v23 = vadd.f32 %v3634_v48, %v3518_v36  ;;  %v3027_v16 = vmul.f32 %v8381_v28, %v7413_v49  ;;  %v3174_v7 = vmul.f32 %v8393_v39, %v7415_v50  ;;  %v1799_v20 = vpop.permute.xlu1 %1798 }
 0x388   : > { %v2745_v51 = vadd.f32 %v2713_v31, %v2596_v8  ;;  %v2746_v44 = vadd.f32 %v2714_v63, %v2597_v58  ;;  %v3175_v30 = vmul.f32 %v8389_v19, %v7415_v50  ;;  %v8427_v6 = vunpack.c.l.bf16 %v5778_v9 }
 0x389   : > { %v3704_v53 = vadd.f32 %v8084_v3, %v3665_v52  ;;  %v3705_v18 = vadd.f32 %v8084_v3, %v3666_v23  ;;  %v8429_v5 = vunpack.c.h.bf16 %v5778_v9  ;;  %v5518_v13 = vunpack.c.l.bf16 %v8417_v14 }
 0x38a   : > { %v2910_v35 = vadd.f32 %v2878_v61, %v2745_v51  ;;  %v2911_v60 = vadd.f32 %v2879_v24, %v2746_v44  ;;  %v3339_v38 = vmul.f32 %v8427_v6, %v7417_v54  ;;  %v3415_v12 = vrot.slane %v8427_v6, 1 }
 0x38b   : > { %v3736_v2 = vmax.f32 %v3704_v53, 0.0  ;;  %v3737_v32 = vmax.f32 %v3705_v18, 0.0  ;;  %v3563_v22 = vrot.slane %v8427_v6, 2  ;;  %v3340_v21 = vmul.f32 %v8429_v5, %v7417_v54  ;;  %v1809_v9 = vpop.permute.xlu1 %1808 }
 0x38c   : > { %v3058_v1 = vadd.f32 %v3026_v26, %v2910_v35  ;;  %v3059_v37 = vadd.f32 %v3027_v16, %v2911_v60  ;;  %v3416_v59 = vrot.slane %v8429_v5, 1  ;;  %v3417_v33 = vrot.slane %v5518_v13, 1 }
 0x38d   : > { %v3757_v27 = vpack.c.bf16 %v3737_v32, %v3736_v2  ;;  %v3564_v0 = vrot.slane %v8429_v5, 2  ;;  %v3565_v4 = vrot.slane %v5518_v13, 2  ;;  %v2415_v2 = vmul.f32 %v8363_v56, %v7393_v29 }
 0x38e   : > { %v3206_v15 = vadd.f32 %v3174_v7, %v3058_v1  ;;  %v3207_v48 = vadd.f32 %v3175_v30, %v3059_v37  ;;  %v8442_v11 = vsel %vm2503_vm0, %v3415_v12, %v3416_v59  ;;  %v8446_v52 = vsel %vm2503_vm0, %v3416_v59, %v3417_v33  ;;  %v5780_v30 = vld [vmem:[#allocation2 + $0xb8] sm:$0xff]   ;;  %v1814_v12 = vpop.permute.xlu0 %1813 }
 0x38f   : > { %6025 = vmatmul.mubr.bf16.gmra.mrb[20].mxu1 %v3757_v27  ;;  %v3487_v57 = vmul.f32 %v7419_v55, %v8442_v11  ;;  %v8452_v42 = vsel %vm2652_vm1, %v3564_v0, %v3565_v4  ;;  %v8456_v23 = vsel %vm2652_vm1, %v3563_v22, %v3564_v0  ;;  %v3488_v53 = vmul.f32 %v7419_v55, %v8446_v52 }
 0x390   : > { %v3371_v36 = vadd.f32 %v3339_v38, %v3206_v15  ;;  %v3372_v62 = vadd.f32 %v3340_v21, %v3207_v48  ;;  %v3635_v8 = vmul.f32 %v8058_v47, %v8456_v23  ;;  %v3636_v31 = vmul.f32 %v8058_v47, %v8452_v42 }
 0x391   : > { %v2416_v63 = vmul.f32 %v8365_v25, %v7393_v29  ;;  %v2566_v61 = vmul.f32 %v8376_v34, %v7404_v40  ;;  %v2567_v24 = vmul.f32 %v8381_v28, %v7404_v40  ;;  %v2715_v44 = vmul.f32 %v8393_v39, %v7406_v41 }
 0x392   : > { %v3519_v18 = vadd.f32 %v3487_v57, %v3371_v36  ;;  %v3520_v58 = vadd.f32 %v3488_v53, %v3372_v62  ;;  %v2716_v56 = vmul.f32 %v8389_v19, %v7406_v41  ;;  %v2880_v34 = vmul.f32 %v8427_v6, %v7410_v46 }
 0x393   : > { %v2598_v26 = vadd.f32 %v2566_v61, %v2415_v2  ;;  %v2599_v16 = vadd.f32 %v2567_v24, %v2416_v63  ;;  %v2881_v28 = vmul.f32 %v8429_v5, %v7410_v46  ;;  %v3028_v60 = vmul.f32 %v8442_v11, %v7413_v49  ;;  %v1824_v2 = vpop.permute.xlu0 %1823 }
 0x394   : > { %v3667_v51 = vadd.f32 %v3635_v8, %v3519_v18  ;;  %v3668_v32 = vadd.f32 %v3636_v31, %v3520_v58  ;;  %v3029_v19 = vmul.f32 %v8446_v52, %v7413_v49  ;;  %v3176_v13 = vmul.f32 %v8456_v23, %v7415_v50 }
 0x395   : > { %v2747_v7 = vadd.f32 %v2715_v44, %v2598_v26  ;;  %v2748_v39 = vadd.f32 %v2716_v56, %v2599_v16  ;;  %v3177_v38 = vmul.f32 %v8452_v42, %v7415_v50  ;;  %v8491_v15 = vunpack.c.h.bf16 %v8417_v14 }
 0x396   : > { %v3706_v35 = vadd.f32 %v8084_v3, %v3667_v51  ;;  %v3707_v25 = vadd.f32 %v8084_v3, %v3668_v32  ;;  %v8493_v21 = vunpack.c.l.bf16 %v5780_v30  ;;  %v5523_v33 = vunpack.c.h.bf16 %v5780_v30  ;;  %v5781_v30 = vld [vmem:[#allocation2 + $0xc0] sm:$0xff]  }
 0x397   : > { %v2912_v1 = vadd.f32 %v2880_v34, %v2747_v7  ;;  %v2913_v37 = vadd.f32 %v2881_v28, %v2748_v39  ;;  %v3341_v4 = vmul.f32 %v8491_v15, %v7417_v54  ;;  %v3418_v48 = vrot.slane %v8491_v15, 1  ;;  %v8545_v39 = vld [vmem:[#allocation2 + $0xc8] sm:$0xff]  }
 0x398   : > { %v3738_v27 = vmax.f32 %v3706_v35, 0.0  ;;  %v3739_v43 = vmax.f32 %v3707_v25, 0.0  ;;  %v3342_v20 = vmul.f32 %v8493_v21, %v7417_v54  ;;  %v3419_v57 = vrot.slane %v8493_v21, 1 }
 0x399   : > { %v3060_v59 = vadd.f32 %v3028_v60, %v2912_v1  ;;  %v3061_v0 = vadd.f32 %v3029_v19, %v2913_v37  ;;  %v3420_v45 = vrot.slane %v5523_v33, 1  ;;  %v3566_v14 = vrot.slane %v8491_v15, 2 }
 0x39a   : > { %v3758_v22 = vpack.c.bf16 %v3739_v43, %v3738_v27  ;;  %v3567_v53 = vrot.slane %v8493_v21, 2  ;;  %v3568_v8 = vrot.slane %v5523_v33, 2  ;;  %v8509_v58 = vsel %vm2503_vm0, %v3418_v48, %v3419_v57 }
 0x39b   : > { %v3208_v36 = vadd.f32 %v3176_v13, %v3060_v59  ;;  %v3209_v62 = vadd.f32 %v3177_v38, %v3061_v0  ;;  %v8505_v18 = vsel %vm2503_vm0, %v3419_v57, %v3420_v45  ;;  %v3489_v51 = vmul.f32 %v7419_v55, %v8509_v58  ;;  %v1819_v0 = vpop.permute.xlu1 %1818 }
 0x39c   : > { %6028 = vmatprep.mubr.bf16.mxu1 %v3758_v22  ;;  %v3490_v61 = vmul.f32 %v7419_v55, %v8505_v18  ;;  %v8517_v9 = vsel %vm2652_vm1, %v3567_v53, %v3568_v8  ;;  %v8521_v32 = vsel %vm2652_vm1, %v3566_v14, %v3567_v53  ;;  %v2417_v56 = vmul.f32 %v8427_v6, %v7393_v29 }
 0x39d   : > { %v3373_v31 = vadd.f32 %v3341_v4, %v3208_v36  ;;  %v3374_v63 = vadd.f32 %v3342_v20, %v3209_v62  ;;  %v3638_v24 = vmul.f32 %v8058_v47, %v8517_v9  ;;  %v3637_v26 = vmul.f32 %v8058_v47, %v8521_v32 }
 0x39e   : > { %v2418_v25 = vmul.f32 %v8429_v5, %v7393_v29  ;;  %v2568_v16 = vmul.f32 %v8442_v11, %v7404_v40  ;;  %v2569_v34 = vmul.f32 %v8446_v52, %v7404_v40  ;;  %v2717_v27 = vmul.f32 %v8456_v23, %v7406_v41 }
 0x39f   : > { %v3521_v44 = vadd.f32 %v3489_v51, %v3373_v31  ;;  %v3522_v35 = vadd.f32 %v3490_v61, %v3374_v63  ;;  %v2718_v47 = vmul.f32 %v8452_v42, %v7406_v41  ;;  %v2882_v6 = vmul.f32 %v8491_v15, %v7410_v46 }
 0x3a0   : > { %v2600_v43 = vadd.f32 %v2568_v16, %v2417_v56  ;;  %v2601_v5 = vadd.f32 %v2569_v34, %v2418_v25  ;;  %v2883_v11 = vmul.f32 %v8493_v21, %v7410_v46  ;;  %v3030_v52 = vmul.f32 %v8509_v58, %v7413_v49  ;;  %v1829_v25 = vpop.permute.xlu1 %1828 }
 0x3a1   : > { %v3669_v7 = vadd.f32 %v3637_v26, %v3521_v44  ;;  %v3670_v28 = vadd.f32 %v3638_v24, %v3522_v35  ;;  %v3031_v42 = vmul.f32 %v8505_v18, %v7413_v49  ;;  %v3178_v1 = vmul.f32 %v8521_v32, %v7415_v50 }
 0x3a2   : > { %v2749_v19 = vadd.f32 %v2717_v27, %v2600_v43  ;;  %v2750_v13 = vadd.f32 %v2718_v47, %v2601_v5  ;;  %v3179_v38 = vmul.f32 %v8517_v9, %v7415_v50  ;;  %v5526_v12 = vunpack.c.l.bf16 %v5781_v30  ;;  %v8568_v27 = vld [vmem:[#allocation11 + $0x8] ss:$0 sm:$0xff] }
 0x3a3   : > { %v3708_v23 = vadd.f32 %v8084_v3, %v3669_v7  ;;  %v3709_v60 = vadd.f32 %v8084_v3, %v3670_v28  ;;  %v5527_v59 = vunpack.c.h.bf16 %v5781_v30  ;;  %v5530_v33 = vunpack.c.l.bf16 %v8545_v39 }
 0x3a4   : > { %v2914_v4 = vadd.f32 %v2882_v6, %v2749_v19  ;;  %v2915_v3 = vadd.f32 %v2883_v11, %v2750_v13  ;;  %v3343_v20 = vmul.f32 %v5526_v12, %v7417_v54  ;;  %v3421_v48 = vrot.slane %v5526_v12, 1 }
 0x3a5   : > { %v3740_v22 = vmax.f32 %v3708_v23, 0.0  ;;  %v3741_v37 = vmax.f32 %v3709_v60, 0.0  ;;  %v3344_v57 = vmul.f32 %v5527_v59, %v7417_v54  ;;  %v3422_v45 = vrot.slane %v5527_v59, 1 }
 0x3a6   : > { %v3423_v14 = vrot.slane %v5530_v33, 1  ;;  %v3062_v62 = vadd.f32 %v3030_v52, %v2914_v4  ;;  %v3063_v53 = vadd.f32 %v3031_v42, %v2915_v3  ;;  %v3569_v8 = vrot.slane %v5526_v12, 2  ;;  %v2801_v52 = vld [vmem:[#allocation2 + $0xc8] sm:$0xf] }
 0x3a7   : > { %v3759_v36 = vpack.c.bf16 %v3741_v37, %v3740_v22  ;;  %v3570_v31 = vrot.slane %v5527_v59, 2  ;;  %v3430_v63 = vsel %vm2503_vm0, %v3421_v48, %v3422_v45  ;;  %v3571_v51 = vrot.slane %v5530_v33, 2  ;;  %v5783_v37 = vld [vmem:[#allocation2 + $0xd0] sm:$0xff]  }
 0x3a8   : > { %v3429_v2 = vsel %vm2503_vm0, %v3422_v45, %v3423_v14  ;;  %v3210_v61 = vadd.f32 %v3178_v1, %v3062_v62  ;;  %v3211_v24 = vadd.f32 %v3179_v38, %v3063_v53  ;;  %v3491_v44 = vmul.f32 %v7419_v55, %v3430_v63 }
 0x3a9   : > { %6029 = vmatmul.mubr.bf16.gmra.mrb[24].mxu1 %v3759_v36  ;;  %v3492_v35 = vmul.f32 %v7419_v55, %v3429_v2  ;;  %v3577_v26 = vsel %vm2652_vm1, %v3570_v31, %v3571_v51  ;;  %v3578_v56 = vsel %vm2652_vm1, %v3569_v8, %v3570_v31  ;;  %v2419_v47 = vmul.f32 %v8491_v15, %v7393_v29 }
 0x3aa   : > { %v3375_v16 = vadd.f32 %v3343_v20, %v3210_v61  ;;  %v3376_v34 = vadd.f32 %v3344_v57, %v3211_v24  ;;  %v3639_v7 = vmul.f32 %v8568_v27, %v3578_v56  ;;  %v3640_v28 = vmul.f32 %v8568_v27, %v3577_v26 }
 0x3ab   : > { %v2420_v6 = vmul.f32 %v8493_v21, %v7393_v29  ;;  %v2570_v5 = vmul.f32 %v8509_v58, %v7404_v40  ;;  %v2571_v11 = vmul.f32 %v8505_v18, %v7404_v40  ;;  %v2719_v23 = vmul.f32 %v8521_v32, %v7406_v41  ;;  %v6325_v58 = vld [vmem:[#allocation12] ss:$0 sm:$0xff] }
 0x3ac   : > { %v3523_v30 = vadd.f32 %v3491_v44, %v3375_v16  ;;  %v3524_v43 = vadd.f32 %v3492_v35, %v3376_v34  ;;  %v2720_v60 = vmul.f32 %v8517_v9, %v7406_v41  ;;  %v2849_v29 = vunpack.c.l.bf16 %v2801_v52 }
 0x3ad   : > { %v2602_v1 = vadd.f32 %v2570_v5, %v2419_v47  ;;  %v2603_v19 = vadd.f32 %v2571_v11, %v2420_v6  ;;  %v2884_v21 = vmul.f32 %v5526_v12, %v7410_v46  ;;  %v2885_v13 = vmul.f32 %v5527_v59, %v7410_v46 }
 0x3ae   : > { %v3671_v42 = vadd.f32 %v3639_v7, %v3523_v30  ;;  %v3672_v15 = vadd.f32 %v3640_v28, %v3524_v43  ;;  %v2965_v33 = vrot.slane %v2849_v29, 1  ;;  %v3032_v32 = vmul.f32 %v3430_v63, %v7413_v49 }
 0x3af   : > { %v2751_v40 = vadd.f32 %v2719_v23, %v2602_v1  ;;  %v2752_v18 = vadd.f32 %v2720_v60, %v2603_v19  ;;  %v3113_v0 = vrot.slane %v2849_v29, 2  ;;  %v5531_v12 = vunpack.c.h.bf16 %v8545_v39 }
 0x3b0   : > { %v3710_v38 = vadd.f32 %v6325_v58, %v3671_v42  ;;  %v3711_v22 = vadd.f32 %v6325_v58, %v3672_v15  ;;  %v2966_v20 = vsel %vm2503_vm0, %v3422_v45, %v2965_v33  ;;  %v5534_v59 = vunpack.c.l.bf16 %v5783_v37  ;;  %v6304_v42 = vld [vmem:[#allocation17] sm:$0xff]  }
 0x3b1   : > { %v2916_v4 = vadd.f32 %v2884_v21, %v2751_v40  ;;  %v2917_v3 = vadd.f32 %v2885_v13, %v2752_v18  ;;  %v3114_v46 = vsel %vm2652_vm1, %v3570_v31, %v3113_v0  ;;  %v3033_v36 = vmul.f32 %v7413_v49, %v2966_v20  ;;  %v6306_v40 = vld [vmem:[#allocation17 + $0x10] sm:$0xff]   ;;  %v6308_v0 = vld [vmem:[#allocation17 + $0x20] sm:$0xff]   ;;  %v6309_v20 = vld [vmem:[#allocation17 + $0x28] sm:$0xff]  }
 0x3b2   : > { %v3742_v41 = vmax.f32 %v3710_v38, 0.0  ;;  %v3743_v9 = vmax.f32 %v3711_v22, 0.0  ;;  %v3180_v14 = vmul.f32 %v3578_v56, %v7415_v50  ;;  %v3181_v62 = vmul.f32 %v7415_v50, %v3114_v46  ;;  %v6310_v46 = vld [vmem:[#allocation17 + $0x30] sm:$0xff]  }
 0x3b3   : > { %v3064_v57 = vadd.f32 %v3032_v32, %v2916_v4  ;;  %v5535_v53 = vunpack.c.h.bf16 %v5783_v37  ;;  %v3345_v8 = vmul.f32 %v5531_v12, %v7417_v54  ;;  %v3346_v2 = vmul.f32 %v5534_v59, %v7417_v54 }
 0x3b4   : > { %v3760_v48 = vpack.c.bf16 %v3743_v9, %v3742_v41  ;;  %v3065_v45 = vadd.f32 %v3033_v36, %v2917_v3  ;;  %v3424_v31 = vrot.slane %v5531_v12, 1  ;;  %v3425_v51 = vrot.slane %v5534_v59, 1 }
 0x3b5   : > { %v3212_v63 = vadd.f32 %v3180_v14, %v3064_v57  ;;  %v3426_v39 = vrot.slane %v5535_v53, 1  ;;  %v3572_v61 = vrot.slane %v5531_v12, 2  ;;  %v3573_v24 = vrot.slane %v5534_v59, 2  ;;  %v6311_v12 = vld [vmem:[#allocation17 + $0x38] sm:$0xff]  }
 0x3b6   : > { %6032 = vmatprep.mubr.bf16.mxu1 %v3760_v48  ;;  %v3574_v44 = vrot.slane %v5535_v53, 2  ;;  %v3213_v35 = vadd.f32 %v3181_v62, %v3065_v45  ;;  %v3428_v50 = vsel %vm2503_vm0, %v3424_v31, %v3425_v51  ;;  %v6808_v29 = vmov 0.0   ;;  %v8625_v59 = vld [vmem:[#allocation15] ss:$0 sm:$0xff] }
 0x3b7   : > { %v3377_v26 = vadd.f32 %v3345_v8, %v3212_v63  ;;  %v3427_v54 = vsel %vm2503_vm0, %v3425_v51, %v3426_v39  ;;  %v3493_v25 = vmul.f32 %v7419_v55, %v3428_v50  ;;  %v3576_v34 = vsel %vm2652_vm1, %v3572_v61, %v3573_v24  ;;  %6036 = vmatprep.subr.bf16.mxu1 %v6808_v29 }
 0x3b8   : > { %v3575_v16 = vsel %vm2652_vm1, %v3573_v24, %v3574_v44  ;;  %v3378_v28 = vadd.f32 %v3346_v2, %v3213_v35  ;;  %v3494_v47 = vmul.f32 %v7419_v55, %v3427_v54  ;;  %v3641_v43 = vmul.f32 %v8568_v27, %v3576_v34  ;;  %6037 = vmatpush3.bf16.msra.mxu1 %v6304_v42  ;;  %v6305_v55 = vld [vmem:[#allocation17 + $0x8] sm:$0xff]  }
 0x3b9   : > { %v3525_v30 = vadd.f32 %v3493_v25, %v3377_v26  ;;  %v3642_v11 = vmul.f32 %v8568_v27, %v3575_v16  ;;  %6038 = vmatprep.subr.bf16.mxu1 %v6808_v29 }
 0x3ba   : > { %v3526_v5 = vadd.f32 %v3494_v47, %v3378_v28 }
 0x3bb   : > { %v3673_v52 = vadd.f32 %v3641_v43, %v3525_v30 }
 0x3bc   : > { %v3674_v23 = vadd.f32 %v3642_v11, %v3526_v5  ;;  %6039 = vmatpush3.bf16.msra.mxu1 %v6305_v55 }
 0x3bd   : > { %v3712_v60 = vadd.f32 %v6325_v58, %v3673_v52  ;;  %6040 = vmatprep.subr.bf16.mxu1 %v6808_v29 }
 0x3be   : > { %v3713_v15 = vadd.f32 %v6325_v58, %v3674_v23  ;;  %v6307_v58 = vld [vmem:[#allocation17 + $0x18] sm:$0xff]  }
 0x3bf   : > { %v3744_v1 = vmax.f32 %v3712_v60, 0.0 }
 0x3c0   : > { %v3745_v19 = vmax.f32 %v3713_v15, 0.0  ;;  %6041 = vmatpush3.bf16.msra.mxu1 %v6306_v40 }
 0x3c1   : > { %6042 = vmatprep.subr.bf16.mxu1 %v6808_v29 }
 0x3c2   : > { %v3761_v21 = vpack.c.bf16 %v3745_v19, %v3744_v1 }
 0x3c4   : > { %6033 = vmatmul.mubr.bf16.gmra.mrb[28].mxu1 %v3761_v21 }
 0x3c5   : > { %v8597_v49 = vpop.f32.mrb[0].mxu1  ;;  %6043 = vmatpush3.bf16.msra.mxu1 %v6307_v58  ;;  %6052 = vmatprep.mubr.msk.bf16.mxu1 %vm6809_vm2, %v6808_v29 }
 0x3c6   : > { %v8601_v56 = vpop.f32.mrb[1].mxu1  ;;  %6044 = vmatprep.subr.bf16.mxu1 %v6808_v29  ;;  %v8639_v2 = vadd.f32 %v8597_v49, %v8625_v59 }
 0x3c7   : > { %v8610_v7 = vpop.f32.mrb[2].mxu1  ;;  %v8633_v57 = vadd.f32 %v8625_v59, %v8601_v56 }
 0x3c8   : > { %v3870_v6 = vpop.f32.mrb[3].mxu1  ;;  %v8644_v63 = vadd.f32 %v8610_v7, %v8625_v59 }
 0x3c9   : > { %6045 = vmatpush3.bf16.msra.mxu1 %v6308_v0  ;;  %v8629_v48 = vadd.f32 %v8625_v59, %v3870_v6 }
 0x3ca   : > { %6046 = vmatprep.subr.bf16.mxu1 %v6808_v29 }
 0x3cb   : > { %v3994_v53 = vadd.f32 %v8629_v48, %v8633_v57 }
 0x3cd   : > { %6047 = vmatpush3.bf16.msra.mxu1 %v6309_v20  ;;  %v3995_v45 = vadd.f32 %v3994_v53, %v8639_v2 }
 0x3ce   : > { %6048 = vmatprep.subr.bf16.mxu1 %v6808_v29 }
 0x3cf   : > { %v3996_v51 = vadd.f32 %v3995_v45, %v8644_v63 }
 0x3d1   : > { %6049 = vmatpush3.bf16.msra.mxu1 %v6310_v46 }
 0x3d2   : > { %6050 = vmatprep.subr.bf16.mxu1 %v6808_v29 }
 0x3d5   : > { %6051 = vmatpush3.bf16.msra.mxu1 %v6311_v12 }
 0x3d6   : > { %6056 = vmatprep.subr.bf16.mxu1 %v6808_v29 }
 0x3e4   : > { %v6010_v27 = vpop.f32.mrb[4].mxu1 }
 0x3e5   : > { %v3883_v13 = vpop.f32.mrb[5].mxu1  ;;  %v8656_v44 = vadd.f32 %v6010_v27, %v8625_v59 }
 0x3e6   : > { %v6011_v38 = vpop.f32.mrb[6].mxu1  ;;  %v8647_v31 = vadd.f32 %v8625_v59, %v3883_v13 }
 0x3e7   : > { %v3886_v22 = vpop.f32.mrb[7].mxu1  ;;  %v8660_v35 = vadd.f32 %v6011_v38, %v8625_v59 }
 0x3e8   : > { %v3997_v39 = vadd.f32 %v3996_v51, %v8647_v31  ;;  %v8652_v61 = vadd.f32 %v8625_v59, %v3886_v22 }
 0x3ea   : > { %v3998_v24 = vadd.f32 %v3997_v39, %v8652_v61 }
 0x3ec   : > { %v3999_v49 = vadd.f32 %v3998_v24, %v8656_v44 }
 0x3ee   : > { %v4000_v50 = vadd.f32 %v3999_v49, %v8660_v35 }
 0x40d   : > { %v6014_v18 = vpop.f32.mrb[8].mxu1 }
 0x40e   : > { %v3899_v37 = vpop.f32.mrb[9].mxu1  ;;  %v8672_v47 = vadd.f32 %v6014_v18, %v8625_v59 }
 0x40f   : > { %v6015_v33 = vpop.f32.mrb[10].mxu1  ;;  %v8663_v26 = vadd.f32 %v8625_v59, %v3899_v37 }
 0x410   : > { %v3902_v32 = vpop.f32.mrb[11].mxu1  ;;  %v8676_v30 = vadd.f32 %v6015_v33, %v8625_v59 }
 0x411   : > { %v4001_v56 = vadd.f32 %v4000_v50, %v8663_v26  ;;  %v8668_v54 = vadd.f32 %v8625_v59, %v3902_v32 }
 0x413   : > { %v4002_v34 = vadd.f32 %v4001_v56, %v8668_v54 }
 0x415   : > { %v4003_v6 = vadd.f32 %v4002_v34, %v8672_v47 }
 0x417   : > { %v4004_v5 = vadd.f32 %v4003_v6, %v8676_v30 }
 0x429   : > { %v6018_v41 = vpop.f32.mrb[12].mxu1 }
 0x42a   : > { %v3915_v9 = vpop.f32.mrb[13].mxu1  ;;  %v8688_v60 = vadd.f32 %v6018_v41, %v8625_v59 }
 0x42b   : > { %v6019_v4 = vpop.f32.mrb[14].mxu1  ;;  %v8679_v43 = vadd.f32 %v8625_v59, %v3915_v9 }
 0x42c   : > { %v3918_v3 = vpop.f32.mrb[15].mxu1  ;;  %v8692_v15 = vadd.f32 %v6019_v4, %v8625_v59 }
 0x42d   : > { %v4005_v11 = vadd.f32 %v4004_v5, %v8679_v43  ;;  %v8684_v52 = vadd.f32 %v8625_v59, %v3918_v3 }
 0x42f   : > { %v4006_v23 = vadd.f32 %v4005_v11, %v8684_v52 }
 0x431   : > { %v4007_v42 = vadd.f32 %v4006_v23, %v8688_v60 }
 0x433   : > { %v4008_v19 = vadd.f32 %v4007_v42, %v8692_v15 }
 0x448   : > { %v6022_v36 = vpop.f32.mrb[16].mxu1 }
 0x449   : > { %v3931_v14 = vpop.f32.mrb[17].mxu1  ;;  %v8704_v13 = vadd.f32 %v6022_v36, %v8625_v59 }
 0x44a   : > { %v6023_v62 = vpop.f32.mrb[18].mxu1  ;;  %v8695_v1 = vadd.f32 %v8625_v59, %v3931_v14 }
 0x44b   : > { %v3934_v8 = vpop.f32.mrb[19].mxu1  ;;  %v8708_v18 = vadd.f32 %v6023_v62, %v8625_v59 }
 0x44c   : > { %v4009_v21 = vadd.f32 %v4008_v19, %v8695_v1  ;;  %v8700_v55 = vadd.f32 %v8625_v59, %v3934_v8 }
 0x44e   : > { %v4010_v27 = vadd.f32 %v4009_v21, %v8700_v55 }
 0x450   : > { %v4011_v22 = vadd.f32 %v4010_v27, %v8704_v13 }
 0x452   : > { %v4012_v32 = vadd.f32 %v4011_v22, %v8708_v18  ;;  %v6312_v22 = vld [vmem:[#allocation20] sm:$0xff]  }
 0x462   : > { %v6026_v25 = vpop.f32.mrb[20].mxu1 }
 0x463   : > { %v3947_v16 = vpop.f32.mrb[21].mxu1  ;;  %v8720_v4 = vadd.f32 %v6026_v25, %v8625_v59 }
 0x464   : > { %v6027_v7 = vpop.f32.mrb[22].mxu1  ;;  %v8711_v37 = vadd.f32 %v8625_v59, %v3947_v16 }
 0x465   : > { %v3950_v28 = vpop.f32.mrb[23].mxu1  ;;  %v8724_v20 = vadd.f32 %v6027_v7, %v8625_v59 }
 0x466   : > { %v4013_v0 = vadd.f32 %v4012_v32, %v8711_v37  ;;  %v8716_v41 = vadd.f32 %v8625_v59, %v3950_v28  ;;  %v6316_v32 = vld [vmem:[#allocation20 + $0x20] sm:$0xff]  }
 0x468   : > { %v4014_v9 = vadd.f32 %v4013_v0, %v8716_v41  ;;  %v6317_v0 = vld [vmem:[#allocation20 + $0x28] sm:$0xff]  }
 0x46a   : > { %v4015_v3 = vadd.f32 %v4014_v9, %v8720_v4  ;;  %v6318_v9 = vld [vmem:[#allocation20 + $0x30] sm:$0xff]  }
 0x46c   : > { %v4016_v12 = vadd.f32 %v4015_v3, %v8724_v20  ;;  %v6319_v3 = vld [vmem:[#allocation20 + $0x38] sm:$0xff]  }
 0x47c   : > { %v6030_v38 = vpop.f32.mrb[24].mxu1 }
 0x47d   : > { %v3963_v40 = vpop.f32.mrb[25].mxu1  ;;  %v8736_v53 = vadd.f32 %v6030_v38, %v8625_v59 }
 0x47e   : > { %v6031_v58 = vpop.f32.mrb[26].mxu1  ;;  %v8727_v46 = vadd.f32 %v8625_v59, %v3963_v40 }
 0x47f   : > { %v3966_v33 = vpop.f32.mrb[27].mxu1  ;;  %v8740_v45 = vadd.f32 %v6031_v58, %v8625_v59  ;;  %v6313_v58 = vld [vmem:[#allocation20 + $0x8] sm:$0xff]  }
 0x480   : > { %v4017_v36 = vadd.f32 %v4016_v12, %v8727_v46  ;;  %v8732_v14 = vadd.f32 %v8625_v59, %v3966_v33  ;;  %v6315_v33 = vld [vmem:[#allocation20 + $0x18] sm:$0xff]  }
 0x481   : > { %v4049_v12 = vld [vmem:[#allocation18] sm:$0x1] }
 0x482   : > { %v4018_v62 = vadd.f32 %v4017_v36, %v8732_v14 }
 0x484   : > { %v4019_v8 = vadd.f32 %v4018_v62, %v8736_v53 }
 0x486   : > { %v4020_v49 = vadd.f32 %v4019_v8, %v8740_v45 }
 0x497   : > { %v6034_v51 = vpop.f32.mrb[28].mxu1 }
 0x498   : > { %v3979_v39 = vpop.f32.mrb[29].mxu1  ;;  %v8751_v34 = vadd.f32 %v6034_v51, %v8625_v59 }
 0x499   : > { %v8743_v24 = vadd.f32 %v8625_v59, %v3979_v39  ;;  %v6035_v50 = vpop.f32.mrb[30].mxu1 }
 0x49a   : > { %v3982_v56 = vpop.f32.mrb[31].mxu1  ;;  %v8755_v28 = vadd.f32 %v6035_v50, %v8625_v59 }
 0x49b   : > { %v4021_v25 = vadd.f32 %v4020_v49, %v8743_v24  ;;  %v8748_v16 = vadd.f32 %v8625_v59, %v3982_v56  ;;  %v6314_v59 = vld [vmem:[#allocation20 + $0x10] sm:$0xff]   ;;  %v4156_v56 = vld [vmem:[#allocation21] sm:$0x1] }
 0x49d   : > { %v4022_v7 = vadd.f32 %v4021_v25, %v8748_v16 }
 0x49f   : > { %v4023_v6 = vadd.f32 %v4022_v7, %v8751_v34  ;;  %v8769_v7 = vld [vmem:[%s7321_s7 + $0x8] sm:$0xff]  }
 0x4a1   : > { %v4024_v5 = vadd.f32 %v4023_v6, %v8755_v28 }
 0x4a3   : > { %v4025_v11 = vrot.slane %v4024_v5, 4 }
 0x4a5   : > { %v4026_v23 = vadd.f32 %v4025_v11, %v4024_v5  ;;  %v8775_v11 = vld [vmem:[%s7321_s7 + $0x18] sm:$0xff]  }
 0x4a7   : > { %v4027_v42 = vrot.slane %v4026_v23, 2 }
 0x4a9   : > { %v4028_v19 = vadd.f32 %v4027_v42, %v4026_v23  ;;  %v8778_v23 = vld [vmem:[%s7321_s7 + $0x10] sm:$0xff]  }
 0x4ab   : > { %v4029_v21 = vrot.slane %v4028_v19, 1 }
 0x4ad   : > { %v4030_v27 = vadd.f32 %v4029_v21, %v4028_v19  ;;  %v8781_v19 = vld [vmem:[%s7321_s7 + $0x28] sm:$0xff]   ;;  %v8784_v21 = vld [vmem:[%s7321_s7 + $0x20] sm:$0xff]  }
 0x4af   : > { %v4031_v38 = vmul.f32 0.00390625, %v4030_v27 }
 0x4b1   : > { %v4032_v40 = vpack.c.bf16 %v4031_v38, %v4031_v38 }
 0x4b3   : > { %6053 = vmatmul.mubr.bf16.vlgmr.msra.gmra.mrb[32].mxu1 %v4032_v40 }
 0x4b4   : > { %6057 = vmatpush3.bf16.msra.mxu1 %v6312_v22  ;;  %6072 = vmatprep.mubr.msk.bf16.mxu1 %vm6809_vm2, %v6808_v29  ;;  %v5542_v22 = vunpack.c.l.bf16 %v8769_v7 }
 0x4b5   : > { %6058 = vmatprep.subr.bf16.mxu1 %v6808_v29 }
 0x4b8   : > { %6059 = vmatpush3.bf16.msra.mxu1 %v6313_v58 }
 0x4b9   : > { %6060 = vmatprep.subr.bf16.mxu1 %v6808_v29 }
 0x4bc   : > { %6061 = vmatpush3.bf16.msra.mxu1 %v6314_v59 }
 0x4bd   : > { %6062 = vmatprep.subr.bf16.mxu1 %v6808_v29 }
 0x4c0   : > { %6063 = vmatpush3.bf16.msra.mxu1 %v6315_v33  ;;  %v8791_v33 = vld [vmem:[%s7321_s7 + $0x38] sm:$0xff]  }
 0x4c1   : > { %6064 = vmatprep.subr.bf16.mxu1 %v6808_v29 }
 0x4c4   : > { %6065 = vmatpush3.bf16.msra.mxu1 %v6316_v32  ;;  %v8794_v32 = vld [vmem:[%s7321_s7 + $0x30] sm:$0xff]  }
 0x4c5   : > { %6066 = vmatprep.subr.bf16.mxu1 %v6808_v29 }
 0x4c8   : > { %6067 = vmatpush3.bf16.msra.mxu1 %v6317_v0  ;;  %v8832_v0 = vld [vmem:[%s7321_s7 + $0x78] sm:$0xff]  }
 0x4c9   : > { %6068 = vmatprep.subr.bf16.mxu1 %v6808_v29 }
 0x4cc   : > { %6069 = vmatpush3.bf16.msra.mxu1 %v6318_v9 }
 0x4cd   : > { %6070 = vmatprep.subr.bf16.mxu1 %v6808_v29  ;;  %v8772_v29 = vld [vmem:[%s7321_s7] sm:$0xff]  }
 0x4ce   : > { %v5538_v40 = vunpack.c.l.bf16 %v8772_v29  ;;  %v5539_v59 = vunpack.c.h.bf16 %v8772_v29  ;;  %v9113_v29 = vunpack.c.l.bf16 %v8784_v21 }
 0x4d0   : > { %6071 = vmatpush3.bf16.msra.mxu1 %v6319_v3  ;;  %v8826_v3 = vld [vmem:[%s7321_s7 + $0x60] sm:$0xff]  }
 0x586   : > { %v4132_v36 = vpop.f32.mrb[32].mxu1 }
 0x587   : > { %v4133_v62 = vadd.f32 %v4132_v36, %v4049_v12  ;;  %v6054_v8 = vpop.f32.mrb[33].mxu1  ;;  %v8800_v12 = vld [vmem:[%s7321_s7 + $0x48] sm:$0xff]   ;;  %v8803_v36 = vld [vmem:[%s7321_s7 + $0x40] sm:$0xff]  }
 0x588   : > { %v4135_v51 = vpop.f32.mrb[34].mxu1  ;;  %v8835_v8 = vld [vmem:[%s7321_s7 + $0x70] sm:$0xff]  }
 0x589   : > { %v4138_v39 = vmax.f32 %v4133_v62, 0.0  ;;  %v6055_v49 = vpop.f32.mrb[35].mxu1  ;;  %v5595_v51 = vunpack.c.h.bf16 %v8835_v8 }
 0x58b   : > { %v4139_v50 = vpack.c.bf16 %v4138_v39, %v4138_v39 }
 0x58d   : > { %6073 = vmatmul.mubr.bf16.vlgmr.msra.gmra.mrb[36].mxu1 %v4139_v50  ;;  %v8810_v50 = vld [vmem:[%s7321_s7 + $0x58] sm:$0xff]  }
 0x660   : > { %v4239_v25 = vpop.f32.mrb[36].mxu1 }
 0x661   : > { %v4240_v6 = vadd.f32 %v4239_v25, %v4156_v56  ;;  %v6074_v5 = vpop.f32.mrb[37].mxu1 }
 0x662   : > { %v4242_v42 = vpop.f32.mrb[38].mxu1  ;;  %v8816_v5 = vld [vmem:[%s7321_s7 + $0x50] sm:$0xff]  }
 0x663   : > { %v4245_v27 = vadd.f32 3.0, %v4240_v6  ;;  %v6075_v38 = vpop.f32.mrb[39].mxu1  ;;  %v8819_v42 = vld [vmem:[%s7321_s7 + $0x68] sm:$0xff]  }
 0x665   : > { %v4246_v62 = vmax.f32 %v4245_v27, 0.0 }
 0x667   : > { %v4247_v27 = vmin.f32 %v4246_v62, 6.0 }
 0x669   : > { %v4248_v62 = vmul.f32 0.16666667, %v4247_v27  ;;  %v5594_v27 = vunpack.c.l.bf16 %v8835_v8 }
 0x66b   : > { %v4252_v6 = vrot.slane %v4248_v62, %v2387_v17 }
 0x66d   : > { %v4253_v49 = vmul.f32 %v4252_v6, %v8633_v57  ;;  %v4254_v39 = vmul.f32 %v4252_v6, %v8629_v48  ;;  %v4255_v9 = vmul.f32 %v4252_v6, %v8639_v2  ;;  %v4256_v56 = vmul.f32 %v4252_v6, %v8644_v63 }
 0x66e   : > { %v4257_v25 = vmul.f32 %v4252_v6, %v8647_v31  ;;  %v4258_v10 = vmul.f32 %v4252_v6, %v8652_v61  ;;  %v4259_v17 = vmul.f32 %v4252_v6, %v8656_v44  ;;  %v4260_v62 = vmul.f32 %v4252_v6, %v8660_v35 }
 0x66f   : > { %v4261_v38 = vmul.f32 %v4252_v6, %v8663_v26  ;;  %v4262_v58 = vmul.f32 %v4252_v6, %v8668_v54  ;;  %v4263_v57 = vmul.f32 %v4252_v6, %v8672_v47  ;;  %v4264_v48 = vmul.f32 %v4252_v6, %v8676_v30 }
 0x670   : > { %v4265_v2 = vmul.f32 %v4252_v6, %v8679_v43  ;;  %v4266_v63 = vmul.f32 %v4252_v6, %v8684_v52  ;;  %v4267_v31 = vmul.f32 %v4252_v6, %v8688_v60  ;;  %v4268_v61 = vmul.f32 %v4252_v6, %v8692_v15 }
 0x671   : > { %v4269_v44 = vmul.f32 %v4252_v6, %v8695_v1  ;;  %v4270_v35 = vmul.f32 %v4252_v6, %v8700_v55  ;;  %v4271_v26 = vmul.f32 %v4252_v6, %v8704_v13  ;;  %v4272_v54 = vmul.f32 %v4252_v6, %v8708_v18 }
 0x672   : > { %v4273_v47 = vmul.f32 %v4252_v6, %v8711_v37  ;;  %v4274_v30 = vmul.f32 %v4252_v6, %v8716_v41  ;;  %v4275_v43 = vmul.f32 %v4252_v6, %v8720_v4  ;;  %v4276_v52 = vmul.f32 %v4252_v6, %v8724_v20 }
 0x673   : > { %v4277_v60 = vmul.f32 %v4252_v6, %v8727_v46  ;;  %v4278_v15 = vmul.f32 %v4252_v6, %v8732_v14  ;;  %v4279_v1 = vmul.f32 %v4252_v6, %v8736_v53  ;;  %v4280_v55 = vmul.f32 %v4252_v6, %v8740_v45 }
 0x674   : > { %v4281_v13 = vmul.f32 %v4252_v6, %v8743_v24  ;;  %v4282_v18 = vmul.f32 %v4252_v6, %v8748_v16  ;;  %v4283_v37 = vmul.f32 %v4252_v6, %v8751_v34  ;;  %v4284_v41 = vmul.f32 %v4252_v6, %v8755_v28 }
 0x675   : > { %v4349_v4 = vadd.f32 %v5538_v40, %v4253_v49  ;;  %v4350_v20 = vadd.f32 %v5539_v59, %v4254_v39  ;;  %v4351_v46 = vadd.f32 %v5542_v22, %v4255_v9  ;;  %v9108_v14 = vunpack.c.h.bf16 %v8769_v7 }
 0x676   : > { %v9109_v45 = vunpack.c.l.bf16 %v8778_v23  ;;  %v9110_v16 = vunpack.c.h.bf16 %v8778_v23  ;;  %v9111_v28 = vunpack.c.l.bf16 %v8775_v11  ;;  %v9112_v40 = vunpack.c.h.bf16 %v8775_v11 }
 0x677   : > { %v4352_v53 = vadd.f32 %v9108_v14, %v4256_v56  ;;  %v4357_v59 = vadd.f32 %v9113_v29, %v4261_v38  ;;  %v9114_v22 = vunpack.c.h.bf16 %v8784_v21  ;;  %v9115_v7 = vunpack.c.l.bf16 %v8781_v19 }
 0x678   : > { %v4353_v24 = vadd.f32 %v9109_v45, %v4257_v25  ;;  %v4354_v34 = vadd.f32 %v9110_v16, %v4258_v10  ;;  %v4355_v6 = vadd.f32 %v9111_v28, %v4259_v17  ;;  %v4356_v49 = vadd.f32 %v9112_v40, %v4260_v62 }
 0x679   : > { %v4358_v9 = vadd.f32 %v9114_v22, %v4262_v58  ;;  %v4359_v39 = vadd.f32 %v9115_v7, %v4263_v57  ;;  %v9116_v56 = vunpack.c.h.bf16 %v8781_v19  ;;  %v9117_v23 = vunpack.c.l.bf16 %v8794_v32 }
 0x67a   : > { %v9118_v17 = vunpack.c.h.bf16 %v8794_v32  ;;  %v9119_v11 = vunpack.c.l.bf16 %v8791_v33  ;;  %v9120_v38 = vunpack.c.h.bf16 %v8791_v33  ;;  %v9121_v21 = vunpack.c.l.bf16 %v8803_v36 }
 0x67b   : > { %v4360_v25 = vadd.f32 %v9116_v56, %v4264_v48  ;;  %v4361_v10 = vadd.f32 %v9117_v23, %v4265_v2  ;;  %v9122_v57 = vunpack.c.h.bf16 %v8803_v36  ;;  %v9123_v48 = vunpack.c.l.bf16 %v8800_v12 }
 0x67c   : > { %v4362_v14 = vadd.f32 %v9118_v17, %v4266_v63  ;;  %v4363_v62 = vadd.f32 %v9119_v11, %v4267_v31  ;;  %v4364_v45 = vadd.f32 %v9120_v38, %v4268_v61  ;;  %v4365_v58 = vadd.f32 %v9121_v21, %v4269_v44 }
 0x67d   : > { %v4366_v19 = vadd.f32 %v9122_v57, %v4270_v35  ;;  %v4367_v2 = vadd.f32 %v9123_v48, %v4271_v26  ;;  %v9124_v32 = vunpack.c.h.bf16 %v8800_v12  ;;  %v9125_v16 = vunpack.c.l.bf16 %v8816_v5 }
 0x67e   : > { %v9126_v33 = vunpack.c.h.bf16 %v8816_v5  ;;  %v9127_v28 = vunpack.c.l.bf16 %v8810_v50  ;;  %v9128_v36 = vunpack.c.h.bf16 %v8810_v50  ;;  %v9129_v35 = vunpack.c.l.bf16 %v8826_v3 }
 0x67f   : > { %v4368_v63 = vadd.f32 %v9124_v32, %v4272_v54  ;;  %v4369_v31 = vadd.f32 %v9125_v16, %v4273_v47  ;;  %v9130_v26 = vunpack.c.h.bf16 %v8826_v3  ;;  %v9131_v12 = vunpack.c.l.bf16 %v8819_v42 }
 0x680   : > { %v4370_v61 = vadd.f32 %v9126_v33, %v4274_v30  ;;  %v4371_v44 = vadd.f32 %v9127_v28, %v4275_v43  ;;  %v4372_v40 = vadd.f32 %v9128_v36, %v4276_v52  ;;  %v4373_v29 = vadd.f32 %v9129_v35, %v4277_v60 }
 0x681   : > { %v4374_v22 = vadd.f32 %v9130_v26, %v4278_v15  ;;  %v4375_v54 = vadd.f32 %v9131_v12, %v4279_v1  ;;  %v9132_v47 = vunpack.c.h.bf16 %v8819_v42  ;;  %v4377_v5 = vadd.f32 %v5594_v27, %v4281_v13 }
 0x682   : > { %v4378_v30 = vadd.f32 %v5595_v51, %v4282_v18  ;;  %v9133_v43 = vunpack.c.l.bf16 %v8832_v0  ;;  %v9134_v52 = vunpack.c.h.bf16 %v8832_v0  ;;  %v5603_v3 = vpack.c.bf16 %v4350_v20, %v4349_v4 }
 0x683   : > { %v4376_v7 = vadd.f32 %v9132_v47, %v4280_v55  ;;  %v5608_v8 = vpack.c.bf16 %v4352_v53, %v4351_v46  ;;  %v5613_v42 = vpack.c.bf16 %v4354_v34, %v4353_v24  ;;  %v5618_v51 = vpack.c.bf16 %v4356_v49, %v4355_v6 }
 0x684   : > { %v4379_v50 = vadd.f32 %v9133_v43, %v4283_v37  ;;  %v4380_v56 = vadd.f32 %v9134_v52, %v4284_v41  ;;  %v5623_v27 = vpack.c.bf16 %v4358_v9, %v4357_v59  ;;  %v5628_v60 = vpack.c.bf16 %v4360_v25, %v4359_v39  ;;  %5604 = vst [vmem:[%s8947_s11] sm:$0xff] %v5603_v3  }
 0x685   : > { %v5633_v15 = vpack.c.bf16 %v4362_v14, %v4361_v10  ;;  %v5638_v0 = vpack.c.bf16 %v4364_v45, %v4363_v62  ;;  %v5643_v1 = vpack.c.bf16 %v4366_v19, %v4365_v58  ;;  %v5648_v55 = vpack.c.bf16 %v4368_v63, %v4367_v2  ;;  %5799 = vst [vmem:[%s8947_s11 + $0x8] sm:$0xff] %v5608_v8  }
 0x686   : > { %v5653_v13 = vpack.c.bf16 %v4370_v61, %v4369_v31  ;;  %v5658_v18 = vpack.c.bf16 %v4372_v40, %v4371_v44  ;;  %5800 = vst [vmem:[%s8947_s11 + $0x10] sm:$0xff] %v5613_v42   ;;  %5801 = vst [vmem:[%s8947_s11 + $0x18] sm:$0xff] %v5618_v51   ;;  %v5663_v37 = vpack.c.bf16 %v4374_v22, %v4373_v29 }
 0x687   : > { %v5668_v41 = vpack.c.bf16 %v4376_v7, %v4375_v54  ;;  %v5673_v4 = vpack.c.bf16 %v4378_v30, %v4377_v5  ;;  %v5678_v20 = vpack.c.bf16 %v4380_v56, %v4379_v50  ;;  %5802 = vst [vmem:[%s8947_s11 + $0x20] sm:$0xff] %v5623_v27   ;;  %5803 = vst [vmem:[%s8947_s11 + $0x28] sm:$0xff] %v5628_v60  }
 0x688   : > { %5804 = vst [vmem:[%s8947_s11 + $0x30] sm:$0xff] %v5633_v15   ;;  %5805 = vst [vmem:[%s8947_s11 + $0x38] sm:$0xff] %v5638_v0  }
 0x689   : > { %5806 = vst [vmem:[%s8947_s11 + $0x40] sm:$0xff] %v5643_v1   ;;  %5807 = vst [vmem:[%s8947_s11 + $0x48] sm:$0xff] %v5648_v55  }
 0x68a   : > { %5808 = vst [vmem:[%s8947_s11 + $0x50] sm:$0xff] %v5653_v13   ;;  %5809 = vst [vmem:[%s8947_s11 + $0x58] sm:$0xff] %v5658_v18  }
 0x68b   : > { %5810 = vst [vmem:[%s8947_s11 + $0x60] sm:$0xff] %v5663_v37   ;;  %5811 = vst [vmem:[%s8947_s11 + $0x68] sm:$0xff] %v5668_v41  }
 0x68c   : > { %5812 = vst [vmem:[%s8947_s11 + $0x70] sm:$0xff] %v5673_v4   ;;  %5813 = vst [vmem:[%s8947_s11 + $0x78] sm:$0xff] %v5678_v20  }
 0x68d   : > { %6707 = shalt.err (!%p6704_p7)
}
 0x68e   : > { %s6708_s23 = scalar_lea.hbm %s8957_s13, 2048  ;;  %s6712_s20 = scalar_lea.hbm %s9135_s3, 4096 }
 0x68f   : > { %p6709_p10 = scmp.ne.s32.totalorder %s8957_s13, %s6708_s23  ;;  %p6713_p1 = scmp.lt.u32.totalorder %s8957_s13, %s9135_s3 }
 0x690   : > { %p6714_p6 = scmp.lt.u32.totalorder %s6712_s20, %s6708_s23  ;;  %p6716_p4 = scmp.lt.u32.totalorder %s6708_s23, %s8957_s13 }
 0x691   : > { %p6710_p8 = pnand %p6709_p10, %p9136_p2 }
 0x692   : > { %p6715_p11 = por %p6714_p6, %p6713_p1 }
 0x693   : > { %p6711_p9 = pneg %p6710_p8 }
 0x694   : > { %p6717_p0 = por %p6716_p4, %p6715_p11 }
 0x696   : > { %p6718_p12 = pnand %p6717_p0, %p6711_p9 }
 0x698   : > { %6721 = shalt.err (!%p6718_p12)
}
 0x699   : > { %s6811_s7 = smov 64   ;;  %s6812_s29 = smov 4  }
 0x69a   : > { %6127 = dma.vmem_to_hbm [thread:$0]  (%p9136_p2), %s8959_s16, 2048, %s8957_s13, %s4542_s2, %s6811_s7, %s6811_s7, %s6812_s29  }
 0x69b PF: > { %s4570_s11 = sand.u32 1, %s6776_s25   ;;  %p9137_p13 = scmp.ne.s32.totalorder %s9078_s12, 0 }
 0x69c   : > { %p9138_p3 = scmp.ge.s32.totalorder %s6788_s28, 2  ;;  %s4571_s14 = scalar_lea.sflag [#allocation5], %s4570_s11 }
 0x69e   : > { %p6171_p5 = pnand %p9138_p3, %p9137_p13 }
 0x6a0   : > { %6771 = dma.done.wait (!%p6171_p5), %s4571_s14, 2048  }
 0x6a1   : > { %6773 = vsyncadd (!%p6171_p5), %s4571_s14, 4294965248  ;;  %s9139_s28 = sld [smem:[#allocation36_spill]]  ;;  %s9140_s30 = sld [smem:[#allocation34_spill]] }
 0x6a2   : > { %s9141_s27 = sld [smem:[#allocation37_spill]]  ;;  %s9142_s25 = smov %s6780_s26 }
 0x6a7   : > { %p32_p7 = scmp.ge.s32.totalorder %s9139_s28, 4   ;;  %s9143_s26 = smov %s9140_s30 }
 0x6a9   :  { %34 = sbr.rel (!%p32_p7) target bundleno = 23 (0x17), region = 174 }
 0x6b0   :  { %4576 = vsyncpa [#allocation4], 1 }
 0x6b1   :  { %4578 = vsyncpa [#allocation4 + $0x1], 1 }
 0x6b2   :  { %4579 = vsyncpa [#allocation7], 1 }
 0x6b3   :  { %4580 = vsyncpa [#allocation10], 1 }
 0x6b4   :  { %4581 = vsyncpa [#allocation13], 1 }
 0x6b5   :  { %4582 = vsyncpa [#allocation16], 1 }
 0x6b6   :  { %4583 = vsyncpa [#allocation19], 1 }
 0x6b7   :  { %4584 = vsyncpa [#allocation22], 1 }
 0x6b8   :  { %4585 = vsyncpa [#allocation5], 1 }
 0x6b9   :  { %4587 = vsyncpa [#allocation5 + $0x1], 1 }

</bundles_post_ra>
